<compile_context>
chip_gen: v6e
topology: v6e:2x2x1
jax: 0.10.0
libtpu: 0.0.40
codegen_flags: <defaults>
</compile_context>

<pallas_src>
from functools import partial

import numpy as np
import jax
import jax.numpy as jnp
from jax import lax
from jax.experimental import pallas as pl
from jax.experimental.pallas import tpu as pltpu

# Static network geometry.
_H0 = 28            # input spatial
_K = 5              # conv kernel size
_C1, _H1 = 6, 24    # conv1 channels / output spatial
_P1 = 12            # pool1 output spatial
_C2, _H2 = 16, 8    # conv2 channels / output spatial
_P2 = 4             # pool2 output spatial
_FC_IN = _C2 * _P2 * _P2     # 256
_FC_OUT = 120
_FC_PAD = 128                # lane-dense padded FC output width


def _lenet5s_kernel(x_ref, t1_ref, b1_ref, sc1_ref, t2_ref, b2_ref, sc2_ref,
                    wf_ref, bf_ref, o_ref):
    f32, bf16 = jnp.float32, jnp.bfloat16
    bt = x_ref.shape[0]
    x = x_ref[...]                                                    # (bt, 28, 28) f32

    # ---- conv1: single (bt*24, 140) @ (140, 144) MXU matmul, f32 accumulation ----
    lhs1 = jnp.concatenate([x[:, ki:ki + _H1, :] for ki in range(_K)], axis=-1)
    lhs1 = lhs1.reshape(bt * _H1, _K * _H0).astype(bf16)              # (bt*24, 140)
    a1 = jnp.dot(lhs1, t1_ref[...], preferred_element_type=f32) + b1_ref[...]  # (bt*24,144)

    # ---- pool1 (2x2 max) + relu1: bf16 column-selection dots + sublane-pair max ----
    a1b = a1.astype(bf16)
    cw1 = jnp.maximum(jnp.dot(a1b, sc1_ref[0], preferred_element_type=f32),
                      jnp.dot(a1b, sc1_ref[1], preferred_element_type=f32))    # (bt*24, 72)
    r1 = cw1.reshape(bt, _P1, 2, _C1 * _P1)                           # free reshape
    p1 = jnp.maximum(jnp.maximum(r1[:, :, 0, :], r1[:, :, 1, :]), 0.0)          # (bt, 12, 72)

    # ---- conv2: single (bt*8, 360) @ (360, 128) MXU matmul ----
    lhs2 = jnp.concatenate([p1[:, ki:ki + _H2, :] for ki in range(_K)], axis=-1)
    lhs2 = lhs2.reshape(bt * _H2, _K * _C1 * _P1).astype(bf16)        # (bt*8, 360)
    a2 = jnp.dot(lhs2, t2_ref[...], preferred_element_type=f32) + b2_ref[...]   # (bt*8, 128)

    # ---- pool2 + relu2 ----
    a2b = a2.astype(bf16)
    cw2 = jnp.maximum(jnp.dot(a2b, sc2_ref[0], preferred_element_type=f32),
                      jnp.dot(a2b, sc2_ref[1], preferred_element_type=f32))    # (bt*8, 64)
    r2 = cw2.reshape(bt, _P2, 2, _C2 * _P2)
    p2 = jnp.maximum(jnp.maximum(r2[:, :, 0, :], r2[:, :, 1, :]), 0.0)          # (bt, 4, 64)

    # ---- fc: NCHW flatten folded into permuted weight; one (bt, 256) @ (256, 128) dot ----
    p2f = jnp.concatenate([p2[:, h, :] for h in range(_P2)], axis=-1).astype(bf16)
    o_ref[...] = jnp.dot(p2f, wf_ref[...], preferred_element_type=f32) + bf_ref[...]


def prepare_params(params):
    """One-time host-side weight prep: torch layouts -> stacked kernel operands."""
    w1 = np.asarray(params["w1"], np.float32)     # (6, 1, 5, 5)
    b1 = np.asarray(params["b1"], np.float32)     # (6,)
    w2 = np.asarray(params["w2"], np.float32)     # (16, 6, 5, 5)
    b2 = np.asarray(params["b2"], np.float32)     # (16,)
    wf = np.asarray(params["wf"], np.float32)     # (120, 256) torch (out, in)
    bf = np.asarray(params["bf"], np.float32)     # (120,)

    # conv1 stacked Toeplitz: t1[ki*28 + w_in, c*24 + w_out] = w1[c, 0, ki, w_in - w_out].
    t1 = np.zeros((_K * _H0, _C1 * _H1), np.float32)                  # (140, 144)
    for ki in range(_K):
        for c in range(_C1):
            for wo in range(_H1):
                for kj in range(_K):
                    t1[ki * _H0 + wo + kj, c * _H1 + wo] = w1[c, 0, ki, kj]
    b1row = np.repeat(b1, _H1)[None, :]                               # (1, 144)

    # conv2 stacked Toeplitz over (ki, ci, w_in) rows and (co, w_out) cols.
    t2 = np.zeros((_K * _C1 * _P1, _C2 * _H2), np.float32)            # (360, 128)
    for ki in range(_K):
        for co in range(_C2):
            for ci in range(_C1):
                for wo in range(_H2):
                    for kj in range(_K):
                        t2[ki * (_C1 * _P1) + ci * _P1 + wo + kj, co * _H2 + wo] = \
                            w2[co, ci, ki, kj]
    b2row = np.repeat(b2, _H2)[None, :]                               # (1, 128)

    # 2x2 max-pool column (W) pickers: even/odd columns within each channel block.
    def col_sel(ch, w_in, w_out):
        s = np.zeros((2, ch * w_in, ch * w_out), np.float32)
        for c in range(ch):
            for q in range(w_out):
                s[0, c * w_in + 2 * q,     c * w_out + q] = 1.0
                s[1, c * w_in + 2 * q + 1, c * w_out + q] = 1.0
        return s

    sc1 = col_sel(_C1, _H1, _P1)      # (2, 144, 72)
    sc2 = col_sel(_C2, _H2, _P2)      # (2, 128, 64)

    # FC weight: kernel flat index is h*64 + c*4 + q; torch flatten index is c*16 + h*4 + q.
    # Zero-pad 120 -> 128 output lanes for a lane-dense store.
    wfk = np.zeros((_FC_IN, _FC_PAD), np.float32)                     # (256, 128)
    for h in range(_P2):
        for c in range(_C2):
            for q in range(_P2):
                wfk[h * (_C2 * _P2) + c * _P2 + q, :_FC_OUT] = \
                    wf[:, c * _P2 * _P2 + h * _P2 + q]
    bfrow = np.zeros((1, _FC_PAD), np.float32)
    bfrow[0, :_FC_OUT] = bf

    as_bf16 = lambda a: jnp.asarray(a, jnp.bfloat16)
    as_f32 = lambda a: jnp.asarray(a, jnp.float32)
    return dict(t1=as_bf16(t1), b1=as_f32(b1row), sc1=as_bf16(sc1),
                t2=as_bf16(t2), b2=as_f32(b2row), sc2=as_bf16(sc2),
                wf=as_bf16(wfk), bf=as_f32(bfrow))


@partial(jax.jit, static_argnames=("batch_tile",))
def lenet5s_forward(x_nchw, prepped, batch_tile=32):
    n = x_nchw.shape[0]
    bt = min(batch_tile, n)
    if bt < n:
        bt = max(8, (bt // 8) * 8)            # sublane-aligned tile when grid > 1
    n_pad = pl.cdiv(n, bt) * bt
    x3 = x_nchw.reshape(n, _H0, _H0)          # Cin == 1: metadata-only squeeze
    if n_pad != n:
        x3 = jnp.pad(x3, ((0, n_pad - n), (0, 0), (0, 0)))

    c2 = lambda i: (0, 0)
    c3 = lambda i: (0, 0, 0)
    out_pad = pl.pallas_call(
        _lenet5s_kernel,
        out_shape=jax.ShapeDtypeStruct((n_pad, _FC_PAD), jnp.float32),
        grid=(n_pad // bt,),
        in_specs=[
            pl.BlockSpec((bt, _H0, _H0), lambda i: (i, 0, 0)),        # image tile
            pl.BlockSpec((_K * _H0, _C1 * _H1), c2),                  # t1  (140, 144)
            pl.BlockSpec((1, _C1 * _H1), c2),                         # b1  (1, 144)
            pl.BlockSpec((2, _C1 * _H1, _C1 * _P1), c3),              # sc1 (2, 144, 72)
            pl.BlockSpec((_K * _C1 * _P1, _C2 * _H2), c2),            # t2  (360, 128)
            pl.BlockSpec((1, _C2 * _H2), c2),                         # b2  (1, 128)
            pl.BlockSpec((2, _C2 * _H2, _C2 * _P2), c3),              # sc2 (2, 128, 64)
            pl.BlockSpec((_FC_IN, _FC_PAD), c2),                      # fc weight (256, 128)
            pl.BlockSpec((1, _FC_PAD), c2),                           # fc bias   (1, 128)
        ],
        out_specs=pl.BlockSpec((bt, _FC_PAD), lambda i: (i, 0)),
        compiler_params=pltpu.CompilerParams(
            dimension_semantics=("parallel",)),
    )(x3, prepped["t1"], prepped["b1"], prepped["sc1"],
      prepped["t2"], prepped["b2"], prepped["sc2"],
      prepped["wf"], prepped["bf"])
    return out_pad[:n, :_FC_OUT]


def _reference_forward(x_nchw, params):
    """Pure-JAX (XLA) reference matching the torch forward, in f32."""
    dn = ("NCHW", "OIHW", "NCHW")
    y = lax.conv_general_dilated(x_nchw, params["w1"], (1, 1), "VALID",
                                 dimension_numbers=dn)
    y = y + params["b1"][None, :, None, None]
    y = lax.reduce_window(y, -jnp.inf, lax.max, (1, 1, 2, 2), (1, 1, 2, 2), "VALID")
    y = jnp.maximum(y, 0.0)
    y = lax.conv_general_dilated(y, params["w2"], (1, 1), "VALID",
                                 dimension_numbers=dn)
    y = y + params["b2"][None, :, None, None]
    y = lax.reduce_window(y, -jnp.inf, lax.max, (1, 1, 2, 2), (1, 1, 2, 2), "VALID")
    y = jnp.maximum(y, 0.0)
    y = y.reshape(y.shape[0], -1)                       # torch NCHW flatten
    return y @ params["wf"].T + params["bf"]


def init_params(key):
    k1, k2, k3 = jax.random.split(key, 3)
    # torch layouts: conv (Cout, Cin, kh, kw); linear (out_features, in_features).
    # Biases zero-initialized, matching nn.init.constant_(bias, 0) in LeNet5S.
    return dict(
        w1=0.1 * jax.random.normal(k1, (_C1, 1, _K, _K), dtype=jnp.float32),
        b1=jnp.zeros((_C1,), jnp.float32),
        w2=0.1 * jax.random.normal(k2, (_C2, _C1, _K, _K), dtype=jnp.float32),
        b2=jnp.zeros((_C2,), jnp.float32),
        wf=0.05 * jax.random.normal(k3, (_FC_OUT, _FC_IN), dtype=jnp.float32),
        bf=jnp.zeros((_FC_OUT,), jnp.float32),
    )


if __name__ == "__main__":
    key = jax.random.PRNGKey(0)
    kx, kp = jax.random.split(key)
    n = 16
    x = jax.random.normal(kx, (n, 1, _H0, _H0), dtype=jnp.float32)
    params = init_params(kp)
    prepped = prepare_params(params)                    # one-time host-side weight prep

    out = jax.block_until_ready(lenet5s_forward(x, prepped, batch_tile=8))  # grid=(2,)
    assert out.shape == (n, _FC_OUT) and out.dtype == jnp.float32
    assert bool(jnp.all(jnp.isfinite(out)))

    ref = jax.block_until_ready(_reference_forward(x, params))
    err = float(jnp.max(jnp.abs(out - ref)))
    assert err < 5e-2, f"max abs err vs f32 reference too large: {err}"
    print("KERNEL_OK")
</pallas_src>

<mosaic_0001>
module attributes {stable_mosaic.version = 11 : i64} {
  func.func @_lenet5s_kernel(%arg0: i32, %arg1: memref<8x28x28xf32, #tpu.memory_space<vmem>>, %arg2: memref<140x144xbf16, #tpu.memory_space<vmem>>, %arg3: memref<1x144xf32, #tpu.memory_space<vmem>>, %arg4: memref<2x144x72xbf16, #tpu.memory_space<vmem>>, %arg5: memref<360x128xbf16, #tpu.memory_space<vmem>>, %arg6: memref<1x128xf32, #tpu.memory_space<vmem>>, %arg7: memref<2x128x64xbf16, #tpu.memory_space<vmem>>, %arg8: memref<256x128xbf16, #tpu.memory_space<vmem>>, %arg9: memref<1x128xf32, #tpu.memory_space<vmem>>, %arg10: memref<8x128xf32, #tpu.memory_space<vmem>>) attributes {dimension_semantics = [#tpu.dimension_semantics<parallel>], iteration_bounds = array<i64: 2>, scalar_prefetch = 0 : i64, scratch_operands = 0 : i64, tpu.core_type = #tpu.core_type<tc>, window_params = [{transform_indices = @transform_0, window_bounds = array<i64: 8, 28, 28>}, {pipeline_mode = #tpu.pipeline_mode<synchronous>, transform_indices = @transform_1, window_bounds = array<i64: 140, 144>}, {pipeline_mode = #tpu.pipeline_mode<synchronous>, transform_indices = @transform_2, window_bounds = array<i64: 1, 144>}, {pipeline_mode = #tpu.pipeline_mode<synchronous>, transform_indices = @transform_3, window_bounds = array<i64: 2, 144, 72>}, {pipeline_mode = #tpu.pipeline_mode<synchronous>, transform_indices = @transform_4, window_bounds = array<i64: 360, 128>}, {pipeline_mode = #tpu.pipeline_mode<synchronous>, transform_indices = @transform_5, window_bounds = array<i64: 1, 128>}, {pipeline_mode = #tpu.pipeline_mode<synchronous>, transform_indices = @transform_6, window_bounds = array<i64: 2, 128, 64>}, {pipeline_mode = #tpu.pipeline_mode<synchronous>, transform_indices = @transform_7, window_bounds = array<i64: 256, 128>}, {pipeline_mode = #tpu.pipeline_mode<synchronous>, transform_indices = @transform_8, window_bounds = array<i64: 1, 128>}, {transform_indices = @transform_9, window_bounds = array<i64: 8, 128>}]} {
    %c0 = arith.constant 0 : index
    %c0_0 = arith.constant 0 : index
    %c0_1 = arith.constant 0 : index
    %0 = vector.load %arg1[%c0, %c0_0, %c0_1] : memref<8x28x28xf32, #tpu.memory_space<vmem>>, vector<8x28x28xf32>
    %1 = vector.extract_strided_slice %0 {offsets = [0, 0, 0], sizes = [8, 24, 28], strides = [1, 1, 1]} : vector<8x28x28xf32> to vector<8x24x28xf32>
    %2 = vector.extract_strided_slice %0 {offsets = [0, 1, 0], sizes = [8, 24, 28], strides = [1, 1, 1]} : vector<8x28x28xf32> to vector<8x24x28xf32>
    %3 = vector.extract_strided_slice %0 {offsets = [0, 2, 0], sizes = [8, 24, 28], strides = [1, 1, 1]} : vector<8x28x28xf32> to vector<8x24x28xf32>
    %4 = vector.extract_strided_slice %0 {offsets = [0, 3, 0], sizes = [8, 24, 28], strides = [1, 1, 1]} : vector<8x28x28xf32> to vector<8x24x28xf32>
    %5 = vector.extract_strided_slice %0 {offsets = [0, 4, 0], sizes = [8, 24, 28], strides = [1, 1, 1]} : vector<8x28x28xf32> to vector<8x24x28xf32>
    %6 = tpu.concatenate %1, %2, %3, %4, %5 in 2 : vector<8x24x28xf32>, vector<8x24x28xf32>, vector<8x24x28xf32>, vector<8x24x28xf32>, vector<8x24x28xf32> -> vector<8x24x140xf32>
    %7 = vector.shape_cast %6 : vector<8x24x140xf32> to vector<192x140xf32>
    %8 = arith.truncf %7 : vector<192x140xf32> to vector<192x140xbf16>
    %c0_2 = arith.constant 0 : index
    %c0_3 = arith.constant 0 : index
    %9 = vector.load %arg2[%c0_2, %c0_3] : memref<140x144xbf16, #tpu.memory_space<vmem>>, vector<140x144xbf16>
    %cst = arith.constant dense<0.000000e+00> : vector<192x144xf32>
    %10 = tpu.matmul %8, %9, %cst {dimension_numbers = #tpu.dot_dimension_numbers<[1], [0], [0], [1], [0, 0, 1, 1], [], []>} : vector<192x140xbf16>, vector<140x144xbf16>, vector<192x144xf32> -> vector<192x144xf32>
    %c0_4 = arith.constant 0 : index
    %c0_5 = arith.constant 0 : index
    %11 = vector.load %arg3[%c0_4, %c0_5] : memref<1x144xf32, #tpu.memory_space<vmem>>, vector<1x144xf32>
    %12 = vector.broadcast %11 : vector<1x144xf32> to vector<192x144xf32>
    %13 = arith.addf %10, %12 : vector<192x144xf32>
    %14 = arith.truncf %13 : vector<192x144xf32> to vector<192x144xbf16>
    %c0_6 = arith.constant 0 : index
    %c0_7 = arith.constant 0 : index
    %c0_8 = arith.constant 0 : index
    %15 = vector.load %arg4[%c0_6, %c0_7, %c0_8] : memref<2x144x72xbf16, #tpu.memory_space<vmem>>, vector<1x144x72xbf16>
    %16 = vector.shape_cast %15 : vector<1x144x72xbf16> to vector<144x72xbf16>
    %cst_9 = arith.constant dense<0.000000e+00> : vector<192x72xf32>
    %17 = tpu.matmul %14, %16, %cst_9 {dimension_numbers = #tpu.dot_dimension_numbers<[1], [0], [0], [1], [0, 0, 1, 1], [], []>} : vector<192x144xbf16>, vector<144x72xbf16>, vector<192x72xf32> -> vector<192x72xf32>
    %c1 = arith.constant 1 : index
    %c0_10 = arith.constant 0 : index
    %c0_11 = arith.constant 0 : index
    %18 = vector.load %arg4[%c1, %c0_10, %c0_11] : memref<2x144x72xbf16, #tpu.memory_space<vmem>>, vector<1x144x72xbf16>
    %19 = vector.shape_cast %18 : vector<1x144x72xbf16> to vector<144x72xbf16>
    %cst_12 = arith.constant dense<0.000000e+00> : vector<192x72xf32>
    %20 = tpu.matmul %14, %19, %cst_12 {dimension_numbers = #tpu.dot_dimension_numbers<[1], [0], [0], [1], [0, 0, 1, 1], [], []>} : vector<192x144xbf16>, vector<144x72xbf16>, vector<192x72xf32> -> vector<192x72xf32>
    %21 = arith.maximumf %17, %20 : vector<192x72xf32>
    %22 = vector.shape_cast %21 : vector<192x72xf32> to vector<8x12x2x72xf32>
    %23 = vector.extract_strided_slice %22 {offsets = [0, 0, 0, 0], sizes = [8, 12, 1, 72], strides = [1, 1, 1, 1]} : vector<8x12x2x72xf32> to vector<8x12x1x72xf32>
    %24 = vector.shape_cast %23 : vector<8x12x1x72xf32> to vector<8x12x72xf32>
    %25 = vector.extract_strided_slice %22 {offsets = [0, 0, 1, 0], sizes = [8, 12, 1, 72], strides = [1, 1, 1, 1]} : vector<8x12x2x72xf32> to vector<8x12x1x72xf32>
    %26 = vector.shape_cast %25 : vector<8x12x1x72xf32> to vector<8x12x72xf32>
    %27 = arith.maximumf %24, %26 : vector<8x12x72xf32>
    %cst_13 = arith.constant 0.000000e+00 : f32
    %28 = vector.broadcast %cst_13 : f32 to vector<8x12x72xf32>
    %29 = arith.maximumf %27, %28 : vector<8x12x72xf32>
    %30 = vector.extract_strided_slice %29 {offsets = [0, 0, 0], sizes = [8, 8, 72], strides = [1, 1, 1]} : vector<8x12x72xf32> to vector<8x8x72xf32>
    %31 = vector.extract_strided_slice %29 {offsets = [0, 1, 0], sizes = [8, 8, 72], strides = [1, 1, 1]} : vector<8x12x72xf32> to vector<8x8x72xf32>
    %32 = vector.extract_strided_slice %29 {offsets = [0, 2, 0], sizes = [8, 8, 72], strides = [1, 1, 1]} : vector<8x12x72xf32> to vector<8x8x72xf32>
    %33 = vector.extract_strided_slice %29 {offsets = [0, 3, 0], sizes = [8, 8, 72], strides = [1, 1, 1]} : vector<8x12x72xf32> to vector<8x8x72xf32>
    %34 = vector.extract_strided_slice %29 {offsets = [0, 4, 0], sizes = [8, 8, 72], strides = [1, 1, 1]} : vector<8x12x72xf32> to vector<8x8x72xf32>
    %35 = tpu.concatenate %30, %31, %32, %33, %34 in 2 : vector<8x8x72xf32>, vector<8x8x72xf32>, vector<8x8x72xf32>, vector<8x8x72xf32>, vector<8x8x72xf32> -> vector<8x8x360xf32>
    %36 = vector.shape_cast %35 : vector<8x8x360xf32> to vector<64x360xf32>
    %37 = arith.truncf %36 : vector<64x360xf32> to vector<64x360xbf16>
    %c0_14 = arith.constant 0 : index
    %c0_15 = arith.constant 0 : index
    %38 = vector.load %arg5[%c0_14, %c0_15] : memref<360x128xbf16, #tpu.memory_space<vmem>>, vector<360x128xbf16>
    %cst_16 = arith.constant dense<0.000000e+00> : vector<64x128xf32>
    %39 = tpu.matmul %37, %38, %cst_16 {dimension_numbers = #tpu.dot_dimension_numbers<[1], [0], [0], [1], [0, 0, 1, 1], [], []>} : vector<64x360xbf16>, vector<360x128xbf16>, vector<64x128xf32> -> vector<64x128xf32>
    %c0_17 = arith.constant 0 : index
    %c0_18 = arith.constant 0 : index
    %40 = vector.load %arg6[%c0_17, %c0_18] : memref<1x128xf32, #tpu.memory_space<vmem>>, vector<1x128xf32>
    %41 = vector.broadcast %40 : vector<1x128xf32> to vector<64x128xf32>
    %42 = arith.addf %39, %41 : vector<64x128xf32>
    %43 = arith.truncf %42 : vector<64x128xf32> to vector<64x128xbf16>
    %c0_19 = arith.constant 0 : index
    %c0_20 = arith.constant 0 : index
    %c0_21 = arith.constant 0 : index
    %44 = vector.load %arg7[%c0_19, %c0_20, %c0_21] : memref<2x128x64xbf16, #tpu.memory_space<vmem>>, vector<1x128x64xbf16>
    %45 = vector.shape_cast %44 : vector<1x128x64xbf16> to vector<128x64xbf16>
    %cst_22 = arith.constant dense<0.000000e+00> : vector<64x64xf32>
    %46 = tpu.matmul %43, %45, %cst_22 {dimension_numbers = #tpu.dot_dimension_numbers<[1], [0], [0], [1], [0, 0, 1, 1], [], []>} : vector<64x128xbf16>, vector<128x64xbf16>, vector<64x64xf32> -> vector<64x64xf32>
    %c1_23 = arith.constant 1 : index
    %c0_24 = arith.constant 0 : index
    %c0_25 = arith.constant 0 : index
    %47 = vector.load %arg7[%c1_23, %c0_24, %c0_25] : memref<2x128x64xbf16, #tpu.memory_space<vmem>>, vector<1x128x64xbf16>
    %48 = vector.shape_cast %47 : vector<1x128x64xbf16> to vector<128x64xbf16>
    %cst_26 = arith.constant dense<0.000000e+00> : vector<64x64xf32>
    %49 = tpu.matmul %43, %48, %cst_26 {dimension_numbers = #tpu.dot_dimension_numbers<[1], [0], [0], [1], [0, 0, 1, 1], [], []>} : vector<64x128xbf16>, vector<128x64xbf16>, vector<64x64xf32> -> vector<64x64xf32>
    %50 = arith.maximumf %46, %49 : vector<64x64xf32>
    %51 = vector.shape_cast %50 : vector<64x64xf32> to vector<8x4x2x64xf32>
    %52 = vector.extract_strided_slice %51 {offsets = [0, 0, 0, 0], sizes = [8, 4, 1, 64], strides = [1, 1, 1, 1]} : vector<8x4x2x64xf32> to vector<8x4x1x64xf32>
    %53 = vector.shape_cast %52 : vector<8x4x1x64xf32> to vector<8x4x64xf32>
    %54 = vector.extract_strided_slice %51 {offsets = [0, 0, 1, 0], sizes = [8, 4, 1, 64], strides = [1, 1, 1, 1]} : vector<8x4x2x64xf32> to vector<8x4x1x64xf32>
    %55 = vector.shape_cast %54 : vector<8x4x1x64xf32> to vector<8x4x64xf32>
    %56 = arith.maximumf %53, %55 : vector<8x4x64xf32>
    %cst_27 = arith.constant 0.000000e+00 : f32
    %57 = vector.broadcast %cst_27 : f32 to vector<8x4x64xf32>
    %58 = arith.maximumf %56, %57 : vector<8x4x64xf32>
    %59 = vector.extract_strided_slice %58 {offsets = [0, 0, 0], sizes = [8, 1, 64], strides = [1, 1, 1]} : vector<8x4x64xf32> to vector<8x1x64xf32>
    %60 = vector.shape_cast %59 : vector<8x1x64xf32> to vector<8x64xf32>
    %61 = vector.extract_strided_slice %58 {offsets = [0, 1, 0], sizes = [8, 1, 64], strides = [1, 1, 1]} : vector<8x4x64xf32> to vector<8x1x64xf32>
    %62 = vector.shape_cast %61 : vector<8x1x64xf32> to vector<8x64xf32>
    %63 = vector.extract_strided_slice %58 {offsets = [0, 2, 0], sizes = [8, 1, 64], strides = [1, 1, 1]} : vector<8x4x64xf32> to vector<8x1x64xf32>
    %64 = vector.shape_cast %63 : vector<8x1x64xf32> to vector<8x64xf32>
    %65 = vector.extract_strided_slice %58 {offsets = [0, 3, 0], sizes = [8, 1, 64], strides = [1, 1, 1]} : vector<8x4x64xf32> to vector<8x1x64xf32>
    %66 = vector.shape_cast %65 : vector<8x1x64xf32> to vector<8x64xf32>
    %67 = tpu.concatenate %60, %62, %64, %66 in 1 : vector<8x64xf32>, vector<8x64xf32>, vector<8x64xf32>, vector<8x64xf32> -> vector<8x256xf32>
    %68 = arith.truncf %67 : vector<8x256xf32> to vector<8x256xbf16>
    %c0_28 = arith.constant 0 : index
    %c0_29 = arith.constant 0 : index
    %69 = vector.load %arg8[%c0_28, %c0_29] : memref<256x128xbf16, #tpu.memory_space<vmem>>, vector<256x128xbf16>
    %cst_30 = arith.constant dense<0.000000e+00> : vector<8x128xf32>
    %70 = tpu.matmul %68, %69, %cst_30 {dimension_numbers = #tpu.dot_dimension_numbers<[1], [0], [0], [1], [0, 0, 1, 1], [], []>} : vector<8x256xbf16>, vector<256x128xbf16>, vector<8x128xf32> -> vector<8x128xf32>
    %c0_31 = arith.constant 0 : index
    %c0_32 = arith.constant 0 : index
    %71 = vector.load %arg9[%c0_31, %c0_32] : memref<1x128xf32, #tpu.memory_space<vmem>>, vector<1x128xf32>
    %72 = vector.broadcast %71 : vector<1x128xf32> to vector<8x128xf32>
    %73 = arith.addf %70, %72 : vector<8x128xf32>
    %c0_33 = arith.constant 0 : index
    %c0_34 = arith.constant 0 : index
    %74 = vector.load %arg10[%c0_33, %c0_34] : memref<8x128xf32, #tpu.memory_space<vmem>>, vector<8x128xf32>
    tpu.vector_store %arg10[%c0_33, %c0_34], %73 {strides = array<i32>} : memref<8x128xf32, #tpu.memory_space<vmem>>, vector<8x128xf32>,
    return
  }
  func.func @transform_0(%arg0: i32) -> (i32, i32, i32) {
    %c0_i32 = arith.constant 0 : i32
    %c0_i32_0 = arith.constant 0 : i32
    %c0_i32_1 = arith.constant 0 : i32
    return %arg0, %c0_i32, %c0_i32_0 : i32, i32, i32
  }
  func.func @transform_1(%arg0: i32) -> (i32, i32) {
    %c0_i32 = arith.constant 0 : i32
    %c0_i32_0 = arith.constant 0 : i32
    %c0_i32_1 = arith.constant 0 : i32
    return %c0_i32, %c0_i32_0 : i32, i32
  }
  func.func @transform_2(%arg0: i32) -> (i32, i32) {
    %c0_i32 = arith.constant 0 : i32
    %c0_i32_0 = arith.constant 0 : i32
    %c0_i32_1 = arith.constant 0 : i32
    return %c0_i32, %c0_i32_0 : i32, i32
  }
  func.func @transform_3(%arg0: i32) -> (i32, i32, i32) {
    %c0_i32 = arith.constant 0 : i32
    %c0_i32_0 = arith.constant 0 : i32
    %c0_i32_1 = arith.constant 0 : i32
    %c0_i32_2 = arith.constant 0 : i32
    return %c0_i32, %c0_i32_0, %c0_i32_1 : i32, i32, i32
  }
  func.func @transform_4(%arg0: i32) -> (i32, i32) {
    %c0_i32 = arith.constant 0 : i32
    %c0_i32_0 = arith.constant 0 : i32
    %c0_i32_1 = arith.constant 0 : i32
    return %c0_i32, %c0_i32_0 : i32, i32
  }
  func.func @transform_5(%arg0: i32) -> (i32, i32) {
    %c0_i32 = arith.constant 0 : i32
    %c0_i32_0 = arith.constant 0 : i32
    %c0_i32_1 = arith.constant 0 : i32
    return %c0_i32, %c0_i32_0 : i32, i32
  }
  func.func @transform_6(%arg0: i32) -> (i32, i32, i32) {
    %c0_i32 = arith.constant 0 : i32
    %c0_i32_0 = arith.constant 0 : i32
    %c0_i32_1 = arith.constant 0 : i32
    %c0_i32_2 = arith.constant 0 : i32
    return %c0_i32, %c0_i32_0, %c0_i32_1 : i32, i32, i32
  }
  func.func @transform_7(%arg0: i32) -> (i32, i32) {
    %c0_i32 = arith.constant 0 : i32
    %c0_i32_0 = arith.constant 0 : i32
    %c0_i32_1 = arith.constant 0 : i32
    return %c0_i32, %c0_i32_0 : i32, i32
  }
  func.func @transform_8(%arg0: i32) -> (i32, i32) {
    %c0_i32 = arith.constant 0 : i32
    %c0_i32_0 = arith.constant 0 : i32
    %c0_i32_1 = arith.constant 0 : i32
    return %c0_i32, %c0_i32_0 : i32, i32
  }
  func.func @transform_9(%arg0: i32) -> (i32, i32) {
    %c0_i32 = arith.constant 0 : i32
    %c0_i32_0 = arith.constant 0 : i32
    return %arg0, %c0_i32 : i32, i32
  }
}

</mosaic_0001>

<bundles_post_ra>
// kernel: lenet5s_forward.1
= control target key start
LH: loop header
LB: loop body
LE: loop exit
PB: predicated region body
PF: predicated region fallthrough
CT: control target
= control target key end

     0   :  { %14 = vsyncpa [#allocation3], 0  ;;  %s8526_s0 = inlined_call_operand.vmem [shape: f32[16,28,28], index: 0, kind: input, shape index: {}]   ;;  %s8527_s1 = inlined_call_operand.vmem [shape: bf16[140,144], index: 1, kind: input, shape index: {}]   ;;  %s8528_s2 = inlined_call_operand.vmem [shape: f32[1,144], index: 2, kind: input, shape index: {}]   ;;  %s8529_s3 = inlined_call_operand.vmem [shape: bf16[2,144,72], index: 3, kind: input, shape index: {}]   ;;  %s8530_s4 = inlined_call_operand.vmem [shape: bf16[360,128], index: 4, kind: input, shape index: {}]   ;;  %s8531_s5 = inlined_call_operand.vmem [shape: f32[1,128], index: 5, kind: input, shape index: {}]   ;;  %s8532_s6 = inlined_call_operand.vmem [shape: bf16[2,128,64], index: 6, kind: input, shape index: {}]   ;;  %s8533_s7 = inlined_call_operand.vmem [shape: bf16[256,128], index: 7, kind: input, shape index: {}]   ;;  %s8534_s8 = inlined_call_operand.vmem [shape: f32[1,128], index: 8, kind: input, shape index: {}]   ;;  %s8535_s9 = inlined_call_operand.hbm [shape: f32[16,128], index: 9, kind: output, shape index: {}]  }
   0x1   :  { %16 = vsyncpa [#allocation3 + $0x1], 0  ;;  %s6255_s30 = smov 0   ;;  %s6257_s10 = smov 0  }
   0x2   :  { %s6259_s11 = smov 0   ;;  %s6261_s12 = smov 0  }
   0x3 LB: > { %s6276_s13 = sadd.s32 4294967295, %s6191_s12   ;;  %s5159_s14 = sadd.s32 4294967294, %s6191_s12   ;;  %s6191_s12 = sphi %s6261_s12, %s8700_s12   ;;  %s6187_s11 = sphi %s6259_s11, %s8699_s11   ;;  %s6183_s10 = sphi %s6257_s10, %s8698_s10   ;;  %s6179_s30 = sphi %s6255_s30, %s8697_s30  }
   0x4   : > { %s6280_s15 = sadd.s32 1, %s6191_s12   ;;  %s223_s16 = sadd.s32 1, %s6187_s11 }
   0x5   : > { %s220_s17 = ssub.s32 %s6191_s12, %s6280_s15  ;;  %p233_p0 = scmp.ne.s32.totalorder %s6187_s11, %s6183_s10 }
   0x6   : > { %p221_p1 = scmp.eq.s32.totalorder %s220_s17, 0  ;;  %p234_p2 = scmp.eq.s32.totalorder %s6276_s13, 1 }
   0x7   : > { %p239_p3 = scmp.ne.s32.totalorder %s6183_s10, %s6179_s30  ;;  %p240_p4 = scmp.eq.s32.totalorder %s5159_s14, 1 }
   0x8   : > { %s6291_s18 = scalar_select %p221_p1, %s6187_s11, %s223_s16  }
   0x9   : > { %p6293_p5 = por %p234_p2, %p233_p0  ;;  %p6297_p6 = por %p240_p4, %p239_p3 }
   0xa   : > { %p5162_p7 = scmp.ge.s32.totalorder %s6191_s12, 1  ;;  %p292_p8 = scmp.lt.s32.totalorder %s6191_s12, 3 }
   0xc   : > { %p293_p9 = pnand %p5162_p7, %p292_p8 }
   0xe   : > { %296 = sbr.rel (%p293_p9) target bundleno = 1660 (0x67c), region = 56 }
  0x13   : > { %s5164_s21 = sshll.u32 %s6276_s13, 3  ;;  %v6011_v0 = vld [vmem:[%s8527_s1 + $0x74] ss:$8 sps:$4 sm:$0xff]   ;;  %v6013_v1 = vld [vmem:[%s8527_s1 + $0x70] ss:$8 sps:$4 sm:$0xff]   ;;  %vm401_vm0 = vcmask 1046528  }
  0x14   : > { %p330_p10 = scmp.lt.s32.totalorder %s5164_s21, 15  ;;  %1202 = vmatprep.subr.bf16.mxu0 %v6011_v0  ;;  %v6014_v2 = vld [vmem:[%s8527_s1 + $0x64] ss:$8 sps:$4 sm:$0xff]   ;;  %v6016_v3 = vld [vmem:[%s8527_s1 + $0x60] ss:$8 sps:$4 sm:$0xff]   ;;  %vm659_vm1 = vcmask 1044480  }
  0x15   : > { %1203 = vmatpush1.bf16.msra.mxu0 %v6013_v1  ;;  %v6017_v4 = vld [vmem:[%s8527_s1 + $0x54] ss:$8 sps:$4 sm:$0xff]   ;;  %vm530_vm2 = vcmask 1045504   ;;  %vm788_vm3 = vcmask 1043456   ;;  %v6019_v12 = vld [vmem:[%s8527_s1 + $0x50] ss:$8 sps:$4 sm:$0xff]  }
  0x16   : > { %s8702_s21 = smov (!%p330_p10, %s5164_s21), 15  ;;  %1204 = vmatprep.subr.bf16.mxu0 %v6014_v2  ;;  %v6020_v17 = vld [vmem:[%s8527_s1 + $0x44] ss:$8 sps:$4 sm:$0xff]   ;;  %v6022_v33 = vld [vmem:[%s8527_s1 + $0x40] ss:$8 sps:$4 sm:$0xff]   ;;  %s6194_s16 = smov 84  }
  0x17   : > { %s5467_s14 = sshll.u32 %s8702_s21, 5  ;;  %s6195_s17 = smov 56   ;;  %v6023_v2 = vld [vmem:[%s8527_s1 + $0x34] ss:$8 sps:$4 sm:$0xff]   ;;  %vm917_vm4 = vcmask 228352   ;;  %vm942_vm5 = vcmask 457728  }
  0x18   : > { %s6322_s24 = scalar_lea.vmem %s8526_s0, %s5467_s14  ;;  %s6193_s14 = smov 28   ;;  %vm967_vm6 = vcmask 687104   ;;  %vm992_vm7 = vcmask 916480   ;;  %vm1159_vm8 = vcmask 97280   ;;  %vm1451_vm9 = vcmask 130048  }
  0x19   : > { %v337_v5 = vld [vmem:[%s6322_s24] sm:$0xff]  ;;  %v338_v6 = vld [vmem:[%s6322_s24 + $0x8] sm:$0xff]  ;;  %v6327_v7 = vld [vmem:[%s6322_s24 + $0x10] sm:$0xff]  ;;  %1205 = vmatpush1.bf16.msra.mxu0 %v6016_v3  ;;  %s6196_s22 = smov 112   ;;  %vm3171_vm10 = vcmask 1041409   ;;  %vm3173_vm11 = vcmask 1042434  }
  0x1a   : > { %v402_v8 = vrot.slane %v337_v5, 1  ;;  %v403_v9 = vrot.slane %v338_v6, 1  ;;  %v405_v10 = vrot.slane %v6327_v7, 1  ;;  %v660_v11 = vrot.slane %v337_v5, 3  ;;  %1206 = vmatprep.subr.bf16.mxu0 %v6017_v4  ;;  %v340_v22 = vld [vmem:[%s6322_s24 + $0x18] sm:$0xf] }
  0x1b   : > { %v661_v13 = vrot.slane %v338_v6, 3  ;;  %v663_v14 = vrot.slane %v6327_v7, 3  ;;  %v531_v15 = vrot.slane %v337_v5, 2  ;;  %v532_v16 = vrot.slane %v338_v6, 2  ;;  %v341_v23 = vld [vmem:[%s6322_s24 + $0x20] sm:$0xff]  ;;  %v6343_v24 = vld [vmem:[%s6322_s24 + $0x28] sm:$0xff] }
  0x1c   : > { %v404_v18 = vsel %vm401_vm0, %v402_v8, %v403_v9  ;;  %v406_v19 = vsel %vm401_vm0, %v403_v9, %v405_v10  ;;  %v534_v20 = vrot.slane %v6327_v7, 2  ;;  %v789_v21 = vrot.slane %v337_v5, 4  ;;  %v343_v46 = vld [vmem:[%s6322_s24 + $0x30] sm:$0xff]  ;;  %v344_v51 = vld [vmem:[%s6322_s24 + $0x38] sm:$0xf]  ;;  %v6373_v0 = vld [vmem:[%s6322_s24 + $0x40] sm:$0xff] }
  0x1d   : > { %v5686_v25 = vpack.i.bf16 %v406_v19, %v404_v18  ;;  %v662_v26 = vsel %vm659_vm1, %v660_v11, %v661_v13  ;;  %v664_v27 = vsel %vm659_vm1, %v661_v13, %v663_v14  ;;  %v533_v28 = vsel %vm530_vm2, %v531_v15, %v532_v16  ;;  %1207 = vmatpush1.bf16.msra.mxu0 %v6019_v12  ;;  %v6376_v1 = vld [vmem:[%s6322_s24 + $0x48] sm:$0xff]  ;;  %v6389_v11 = vld [vmem:[%s6322_s24 + $0x50] sm:$0xff]  ;;  %s6199_s28 = smov 72   ;;  %s6200_s29 = smov 16  }
  0x1e   : > { %v5696_v29 = vpack.i.bf16 %v664_v27, %v662_v26  ;;  %v535_v30 = vsel %vm530_vm2, %v532_v16, %v534_v20  ;;  %v790_v31 = vrot.slane %v338_v6, 4  ;;  %v792_v32 = vrot.slane %v6327_v7, 4  ;;  %1208 = vmatprep.subr.bf16.mxu0 %v6020_v17  ;;  %v6025_v6 = vld [vmem:[%s8527_s1 + $0x30] ss:$8 sps:$4 sm:$0xff]   ;;  %v6026_v12 = vld [vmem:[%s8527_s1 + $0x24] ss:$8 sps:$4 sm:$0xff]  }
  0x1f   : > { %5687 = vrot.lane.b32.xlu0 %v5686_v25, %s6193_s14  ;;  %v5691_v34 = vpack.i.bf16 %v535_v30, %v533_v28  ;;  %v407_v35 = vrot.slane %v340_v22, 1  ;;  %v409_v36 = vrot.slane %v341_v23, 1  ;;  %v410_v37 = vrot.slane %v6343_v24, 1  ;;  %v6028_v17 = vld [vmem:[%s8527_s1 + $0x20] ss:$8 sps:$4 sm:$0xff]   ;;  %s6203_s26 = smov 64  }
  0x20   : > { %5697 = vrot.lane.b32.xlu1 %v5696_v29, %s6194_s16  ;;  %v791_v38 = vsel %vm788_vm3, %v789_v21, %v790_v31  ;;  %v793_v39 = vsel %vm788_vm3, %v790_v31, %v792_v32  ;;  %v536_v40 = vrot.slane %v340_v22, 2  ;;  %v538_v41 = vrot.slane %v341_v23, 2  ;;  %s326_s27 = sand.u32 1, %s6183_s10  }
  0x21   : > { %v5701_v42 = vpack.i.bf16 %v793_v39, %v791_v38  ;;  %v408_v43 = vsel %vm401_vm0, %v405_v10, %v407_v35  ;;  %v411_v44 = vsel %vm401_vm0, %v409_v36, %v410_v37  ;;  %v539_v45 = vrot.slane %v6343_v24, 2  ;;  %1209 = vmatpush1.bf16.msra.mxu0 %v6022_v33  ;;  %v349_v38 = vld [vmem:[%s6322_s24 + $0x60] sm:$0xff] }
  0x22   : > { %v5706_v47 = vpack.i.bf16 %v411_v44, %v408_v43  ;;  %v537_v48 = vsel %vm530_vm2, %v534_v20, %v536_v40  ;;  %v665_v49 = vrot.slane %v340_v22, 3  ;;  %v667_v50 = vrot.slane %v341_v23, 3  ;;  %1210 = vmatprep.subr.bf16.mxu0 %v6023_v2  ;;  %v6029_v20 = vld [vmem:[%s8527_s1 + $0x14] ss:$8 sps:$4 sm:$0xff]   ;;  %v6032_v39 = vld [vmem:[%s8527_s1 + $0x4] ss:$8 sps:$4 sm:$0xff]  }
  0x23   : > { %5692 = vrot.lane.b32.xlu0 %v5691_v34, %s6195_s17  ;;  %v540_v52 = vsel %vm530_vm2, %v538_v41, %v539_v45  ;;  %v668_v53 = vrot.slane %v6343_v24, 3  ;;  %v794_v54 = vrot.slane %v340_v22, 4  ;;  %v796_v55 = vrot.slane %v341_v23, 4  ;;  %v6434_v44 = vld [vmem:[%s6322_s24 + $0x68] sm:$0xff]  ;;  %v352_v2 = vld [vmem:[%s6322_s24 + $0x78] sm:$0xf] }
  0x24   : > { %5702 = vrot.lane.b32.xlu1 %v5701_v42, %s6196_s22  ;;  %v5711_v56 = vpack.i.bf16 %v540_v52, %v537_v48  ;;  %v666_v57 = vsel %vm659_vm1, %v663_v14, %v665_v49  ;;  %v797_v58 = vrot.slane %v6343_v24, 4  ;;  %v412_v59 = vrot.slane %v343_v46, 1  ;;  %v6035_v48 = vld [vmem:[%s8527_s1 + $0x84] ss:$8 sps:$4 sm:$0x3f]  }
  0x25   : > { %v669_v60 = vsel %vm659_vm1, %v667_v50, %v668_v53  ;;  %v795_v61 = vsel %vm788_vm3, %v792_v32, %v794_v54  ;;  %v414_v62 = vrot.slane %v344_v51, 1  ;;  %v541_v63 = vrot.slane %v343_v46, 2  ;;  %1211 = vmatpush1.bf16.msra.mxu0 %v6025_v6  ;;  %v6031_v32 = vld [vmem:[%s8527_s1 + $0x10] ss:$8 sps:$4 sm:$0xff]   ;;  %v6034_v50 = vld [vmem:[%s8527_s1] ss:$8 sps:$4 sm:$0xff]  }
  0x26   : > { %v5716_v3 = vpack.i.bf16 %v669_v60, %v666_v57  ;;  %v798_v4 = vsel %vm788_vm3, %v796_v55, %v797_v58  ;;  %v543_v5 = vrot.slane %v344_v51, 2  ;;  %v413_v8 = vsel %vm401_vm0, %v410_v37, %v412_v59  ;;  %1212 = vmatprep.subr.bf16.mxu0 %v6026_v12  ;;  %v348_v37 = vld [vmem:[%s6322_s24 + $0x58] sm:$0xf] }
  0x27   : > { %5707 = vrot.lane.b32.xlu0 %v5706_v47, %s6193_s14  ;;  %v5721_v7 = vpack.i.bf16 %v798_v4, %v795_v61  ;;  %v415_v9 = vsel %vm401_vm0, %v412_v59, %v414_v62  ;;  %v670_v10 = vrot.slane %v343_v46, 3  ;;  %v542_v13 = vsel %vm530_vm2, %v539_v45, %v541_v63  ;;  %v351_v61 = vld [vmem:[%s6322_s24 + $0x70] sm:$0xff] }
  0x28   : > { %5712 = vrot.lane.b32.xlu1 %v5711_v56, %s6195_s17  ;;  %v544_v14 = vsel %vm530_vm2, %v541_v63, %v543_v5  ;;  %v672_v15 = vrot.slane %v344_v51, 3  ;;  %v799_v16 = vrot.slane %v343_v46, 4  ;;  %v801_v18 = vrot.slane %v344_v51, 4 }
  0x29   : > { %v416_v19 = vrot.slane %v6373_v0, 1  ;;  %v5726_v21 = vpack.i.bf16 %v415_v9, %v413_v8  ;;  %v417_v22 = vrot.slane %v6376_v1, 1  ;;  %v419_v23 = vrot.slane %v6389_v11, 1  ;;  %1213 = vmatpush1.bf16.msra.mxu0 %v6028_v17 }
  0x2a   : > { %v5731_v24 = vpack.i.bf16 %v544_v14, %v542_v13  ;;  %v671_v25 = vsel %vm659_vm1, %v668_v53, %v670_v10  ;;  %v545_v26 = vrot.slane %v6373_v0, 2  ;;  %v546_v27 = vrot.slane %v6376_v1, 2  ;;  %1214 = vmatprep.subr.bf16.mxu0 %v6029_v20 }
  0x2b   : > { %5717 = vrot.lane.b32.xlu0 %v5716_v3, %s6194_s16  ;;  %v673_v28 = vsel %vm659_vm1, %v670_v10, %v672_v15  ;;  %v800_v29 = vsel %vm788_vm3, %v797_v58, %v799_v16  ;;  %v802_v30 = vsel %vm788_vm3, %v799_v16, %v801_v18  ;;  %v548_v31 = vrot.slane %v6389_v11, 2 }
  0x2c   : > { %5722 = vrot.lane.b32.xlu1 %v5721_v7, %s6196_s22  ;;  %v418_v33 = vsel %vm401_vm0, %v416_v19, %v417_v22  ;;  %v420_v34 = vsel %vm401_vm0, %v417_v22, %v419_v23  ;;  %v547_v35 = vsel %vm530_vm2, %v545_v26, %v546_v27  ;;  %v674_v36 = vrot.slane %v6373_v0, 3  ;;  %v353_v22 = vld [vmem:[%s6322_s24 + $0x80] sm:$0xff]  ;;  %v6477_v26 = vld [vmem:[%s6322_s24 + $0x90] sm:$0xff] }
  0x2d   : > { %v549_v40 = vsel %vm530_vm2, %v546_v27, %v548_v31  ;;  %v675_v41 = vrot.slane %v6376_v1, 3  ;;  %v677_v42 = vrot.slane %v6389_v11, 3  ;;  %v803_v43 = vrot.slane %v6373_v0, 4  ;;  %1215 = vmatpush1.bf16.msra.mxu0 %v6031_v32 }
  0x2e   : > { %v5736_v45 = vpack.i.bf16 %v673_v28, %v671_v25  ;;  %v804_v46 = vrot.slane %v6376_v1, 4  ;;  %v806_v47 = vrot.slane %v6389_v11, 4  ;;  %v5741_v49 = vpack.i.bf16 %v802_v30, %v800_v29  ;;  %1216 = vmatprep.subr.bf16.mxu0 %v6032_v39 }
  0x2f   : > { %5727 = vrot.lane.b32.xlu0 %v5726_v21, %s6193_s14  ;;  %v5746_v51 = vpack.i.bf16 %v420_v34, %v418_v33  ;;  %v5751_v52 = vpack.i.bf16 %v549_v40, %v547_v35  ;;  %v676_v53 = vsel %vm659_vm1, %v674_v36, %v675_v41  ;;  %v678_v54 = vsel %vm659_vm1, %v675_v41, %v677_v42 }
  0x30   : > { %5732 = vrot.lane.b32.xlu1 %v5731_v24, %s6195_s17  ;;  %v421_v55 = vrot.slane %v348_v37, 1  ;;  %v423_v56 = vrot.slane %v349_v38, 1  ;;  %v805_v57 = vsel %vm788_vm3, %v803_v43, %v804_v46  ;;  %v807_v58 = vsel %vm788_vm3, %v804_v46, %v806_v47  ;;  %v6497_v46 = vld [vmem:[%s6322_s24 + $0xa0] sm:$0xff] }
  0x31   : > { %v424_v59 = vrot.slane %v6434_v44, 1  ;;  %v550_v60 = vrot.slane %v348_v37, 2  ;;  %v552_v62 = vrot.slane %v349_v38, 2  ;;  %v553_v63 = vrot.slane %v6434_v44, 2  ;;  %1217 = vmatpush1.bf16.msra.mxu0 %v6034_v50  ;;  %v6504_v50 = vld [vmem:[%s6322_s24 + $0xb0] sm:$0xff] }
  0x32   : > { %v679_v0 = vrot.slane %v348_v37, 3  ;;  %v681_v1 = vrot.slane %v349_v38, 3  ;;  %v682_v3 = vrot.slane %v6434_v44, 3  ;;  %v808_v4 = vrot.slane %v348_v37, 4  ;;  %5185 = vmatprep.subr.msk.bf16.mxu0 %vm530_vm2, %v6035_v48 }
  0x33   : > { %5737 = vrot.lane.b32.xlu0 %v5736_v45, %s6194_s16  ;;  %v810_v5 = vrot.slane %v349_v38, 4  ;;  %v811_v6 = vrot.slane %v6434_v44, 4  ;;  %v5756_v7 = vpack.i.bf16 %v678_v54, %v676_v53  ;;  %v5761_v8 = vpack.i.bf16 %v807_v58, %v805_v57  ;;  %v6494_v45 = vld [vmem:[%s6322_s24 + $0x98] sm:$0xf] }
  0x34   : > { %5742 = vrot.lane.b32.xlu1 %v5741_v49, %s6196_s22  ;;  %v422_v9 = vsel %vm401_vm0, %v419_v23, %v421_v55  ;;  %v425_v10 = vsel %vm401_vm0, %v423_v56, %v424_v59  ;;  %v551_v12 = vsel %vm530_vm2, %v548_v31, %v550_v60  ;;  %v554_v13 = vsel %vm530_vm2, %v552_v62, %v553_v63  ;;  %v6473_v23 = vld [vmem:[%s6322_s24 + $0x88] sm:$0xff]  ;;  %v6509_v55 = vld [vmem:[%s6322_s24 + $0xb8] sm:$0xf] }
  0x35   : > { %v426_v14 = vrot.slane %v351_v61, 1  ;;  %v680_v15 = vsel %vm659_vm1, %v677_v42, %v679_v0  ;;  %v683_v16 = vsel %vm659_vm1, %v681_v1, %v682_v3  ;;  %v428_v17 = vrot.slane %v352_v2, 1 }
  0x36   : > { %v555_v18 = vrot.slane %v351_v61, 2  ;;  %v809_v11 = vsel %vm788_vm3, %v806_v47, %v808_v4  ;;  %v812_v19 = vsel %vm788_vm3, %v810_v5, %v811_v6  ;;  %v557_v20 = vrot.slane %v352_v2, 2  ;;  %v6500_v47 = vld [vmem:[%s6322_s24 + $0xa8] sm:$0xff] }
  0x37   : > { %5747 = vrot.lane.b32.xlu0 %v5746_v51, %s6193_s14  ;;  %v684_v21 = vrot.slane %v351_v61, 3  ;;  %v5766_v24 = vpack.i.bf16 %v425_v10, %v422_v9  ;;  %v686_v25 = vrot.slane %v352_v2, 3  ;;  %v5771_v27 = vpack.i.bf16 %v554_v13, %v551_v12 }
  0x38   : > { %5752 = vrot.lane.b32.xlu1 %v5751_v52, %s6195_s17  ;;  %v813_v28 = vrot.slane %v351_v61, 4  ;;  %v815_v29 = vrot.slane %v352_v2, 4  ;;  %v5776_v30 = vpack.i.bf16 %v683_v16, %v680_v15  ;;  %v5781_v31 = vpack.i.bf16 %v812_v19, %v809_v11 }
  0x39   : > { %v427_v32 = vsel %vm401_vm0, %v424_v59, %v426_v14  ;;  %v429_v33 = vsel %vm401_vm0, %v426_v14, %v428_v17  ;;  %v556_v34 = vsel %vm530_vm2, %v553_v63, %v555_v18  ;;  %v558_v35 = vsel %vm530_vm2, %v555_v18, %v557_v20 }
  0x3a   : > { %v685_v36 = vsel %vm659_vm1, %v682_v3, %v684_v21  ;;  %v687_v37 = vsel %vm659_vm1, %v684_v21, %v686_v25  ;;  %v430_v38 = vrot.slane %v353_v22, 1  ;;  %v431_v39 = vrot.slane %v6473_v23, 1 }
  0x3b   : > { %5757 = vrot.lane.b32.xlu0 %v5756_v7, %s6194_s16  ;;  %v433_v40 = vrot.slane %v6477_v26, 1  ;;  %v814_v41 = vsel %vm788_vm3, %v811_v6, %v813_v28  ;;  %v816_v42 = vsel %vm788_vm3, %v813_v28, %v815_v29  ;;  %v559_v43 = vrot.slane %v353_v22, 2  ;;  %v6566_v29 = vld [vmem:[%s6322_s24 + $0xc0] sm:$0xff] }
  0x3c   : > { %5762 = vrot.lane.b32.xlu1 %v5761_v8, %s6196_s22  ;;  %v560_v44 = vrot.slane %v6473_v23, 2  ;;  %v562_v48 = vrot.slane %v6477_v26, 2  ;;  %v688_v49 = vrot.slane %v353_v22, 3  ;;  %v5786_v51 = vpack.i.bf16 %v429_v33, %v427_v32 }
  0x3d   : > { %v5791_v52 = vpack.i.bf16 %v558_v35, %v556_v34  ;;  %v689_v53 = vrot.slane %v6473_v23, 3  ;;  %v691_v54 = vrot.slane %v6477_v26, 3  ;;  %v5796_v56 = vpack.i.bf16 %v687_v37, %v685_v36  ;;  %v6581_v36 = vld [vmem:[%s6322_s24 + $0xd8] sm:$0xf] }
  0x3e   : > { %v5801_v57 = vpack.i.bf16 %v816_v42, %v814_v41  ;;  %v817_v58 = vrot.slane %v353_v22, 4  ;;  %v818_v59 = vrot.slane %v6473_v23, 4  ;;  %v432_v60 = vsel %vm401_vm0, %v430_v38, %v431_v39  ;;  %v6590_v41 = vld [vmem:[%s6322_s24 + $0xe0] sm:$0xff] }
  0x3f   : > { %5767 = vrot.lane.b32.xlu0 %v5766_v24, %s6193_s14  ;;  %v434_v61 = vsel %vm401_vm0, %v431_v39, %v433_v40  ;;  %v561_v62 = vsel %vm530_vm2, %v559_v43, %v560_v44  ;;  %v820_v63 = vrot.slane %v6477_v26, 4  ;;  %v435_v0 = vrot.slane %v6494_v45, 1 }
  0x40   : > { %5772 = vrot.lane.b32.xlu1 %v5771_v27, %s6195_s17  ;;  %v437_v1 = vrot.slane %v6497_v46, 1  ;;  %v438_v2 = vrot.slane %v6500_v47, 1  ;;  %v564_v3 = vrot.slane %v6494_v45, 2  ;;  %v563_v4 = vsel %vm530_vm2, %v560_v44, %v562_v48 }
  0x41   : > { %v6526_v5 = vsel %vm659_vm1, %v688_v49, %v689_v53  ;;  %v566_v6 = vrot.slane %v6497_v46, 2  ;;  %v440_v7 = vrot.slane %v6504_v50, 1  ;;  %v692_v8 = vsel %vm659_vm1, %v689_v53, %v691_v54 }
  0x42   : > { %v6533_v9 = vsel %vm788_vm3, %v817_v58, %v818_v59  ;;  %v567_v10 = vrot.slane %v6500_v47, 2  ;;  %v442_v12 = vrot.slane %v6509_v55, 1  ;;  %v821_v13 = vsel %vm788_vm3, %v818_v59, %v820_v63 }
  0x43   : > { %5777 = vrot.lane.b32.xlu0 %v5776_v30, %s6194_s16  ;;  %v693_v14 = vrot.slane %v6494_v45, 3  ;;  %v695_v15 = vrot.slane %v6497_v46, 3  ;;  %v6542_v16 = vsel %vm401_vm0, %v438_v2, %v440_v7  ;;  %v6545_v17 = vsel %vm401_vm0, %v433_v40, %v435_v0  ;;  %v6569_v30 = vld [vmem:[%s6322_s24 + $0xc8] sm:$0xff] }
  0x44   : > { %5782 = vrot.lane.b32.xlu1 %v5781_v31, %s6196_s22  ;;  %v696_v18 = vrot.slane %v6500_v47, 3  ;;  %v6549_v11 = vsel %vm401_vm0, %v440_v7, %v442_v12  ;;  %v698_v19 = vrot.slane %v6504_v50, 3  ;;  %v6553_v20 = vsel %vm401_vm0, %v437_v1, %v438_v2  ;;  %v6572_v31 = vld [vmem:[%s6322_s24 + $0xd0] sm:$0xff] }
  0x45   : > { %v822_v21 = vrot.slane %v6494_v45, 4  ;;  %v5846_v22 = vpack.i.bf16 %v6549_v11, %v6542_v16  ;;  %v700_v23 = vrot.slane %v6509_v55, 3  ;;  %v5806_v24 = vpack.i.bf16 %v434_v61, %v432_v60  ;;  %v6624_v1 = vld [vmem:[%s6322_s24 + $0xf0] sm:$0xff] }
  0x46   : > { %v824_v25 = vrot.slane %v6497_v46, 4  ;;  %v825_v27 = vrot.slane %v6500_v47, 4  ;;  %v6563_v28 = vsel %vm659_vm1, %v696_v18, %v698_v19  ;;  %v5811_v32 = vpack.i.bf16 %v563_v4, %v561_v62  ;;  %v6599_v46 = vld [vmem:[%s6322_s24 + $0xe8] sm:$0xff] }
  0x47   : > { %5787 = vrot.lane.b32.xlu0 %v5786_v51, %s6193_s14  ;;  %v5816_v33 = vpack.i.bf16 %v692_v8, %v6526_v5  ;;  %v5821_v34 = vpack.i.bf16 %v821_v13, %v6533_v9  ;;  %v6578_v35 = vsel %vm659_vm1, %v698_v19, %v700_v23  ;;  %v5826_v37 = vpack.i.bf16 %v6553_v20, %v6545_v17 }
  0x48   : > { %5792 = vrot.lane.b32.xlu1 %v5791_v52, %s6195_s17  ;;  %v569_v38 = vrot.slane %v6504_v50, 2  ;;  %v571_v39 = vrot.slane %v6509_v55, 2  ;;  %v5856_v40 = vpack.i.bf16 %v6578_v35, %v6563_v28  ;;  %v565_v42 = vsel %vm530_vm2, %v562_v48, %v564_v3 }
  0x49   : > { %v568_v43 = vsel %vm530_vm2, %v566_v6, %v567_v10  ;;  %v694_v44 = vsel %vm659_vm1, %v691_v54, %v693_v14  ;;  %v697_v45 = vsel %vm659_vm1, %v695_v15, %v696_v18  ;;  %v823_v49 = vsel %vm788_vm3, %v820_v63, %v822_v21  ;;  %v6635_v6 = vld [vmem:[%s6322_s24 + $0xf8] sm:$0xf]  ;;  %v6037_v21 = vld [vmem:[%s8527_s1 + $0x80] ss:$8 sps:$4 sm:$0x3f]  }
  0x4a   : > { %v826_v51 = vsel %vm788_vm3, %v824_v25, %v825_v27  ;;  %v827_v26 = vrot.slane %v6504_v50, 4  ;;  %v829_v48 = vrot.slane %v6509_v55, 4  ;;  %v444_v52 = vrot.slane %v6566_v29, 1 }
  0x4b   : > { %5797 = vrot.lane.b32.xlu0 %v5796_v56, %s6194_s16  ;;  %v445_v53 = vrot.slane %v6569_v30, 1  ;;  %v447_v54 = vrot.slane %v6572_v31, 1  ;;  %v573_v56 = vrot.slane %v6566_v29, 2  ;;  %v6617_v58 = vsel %vm530_vm2, %v569_v38, %v571_v39 }
  0x4c   : > { %5802 = vrot.lane.b32.xlu1 %v5801_v57, %s6196_s22  ;;  %v6614_v57 = vsel %vm530_vm2, %v567_v10, %v569_v38  ;;  %v576_v59 = vrot.slane %v6572_v31, 2  ;;  %v449_v60 = vrot.slane %v6581_v36, 1  ;;  %v5831_v61 = vpack.i.bf16 %v568_v43, %v565_v42 }
  0x4d   : > { %v5836_v62 = vpack.i.bf16 %v697_v45, %v694_v44  ;;  %v451_v63 = vrot.slane %v6590_v41, 1  ;;  %v452_v0 = vrot.slane %v6599_v46, 1  ;;  %v5841_v2 = vpack.i.bf16 %v826_v51, %v823_v49 }
  0x4e   : > { %v705_v3 = vrot.slane %v6572_v31, 3  ;;  %v6631_v4 = vsel %vm401_vm0, %v447_v54, %v449_v60  ;;  %v578_v5 = vrot.slane %v6581_v36, 2  ;;  %v5851_v7 = vpack.i.bf16 %v6617_v58, %v6614_v57 }
  0x4f   : > { %5807 = vrot.lane.b32.xlu0 %v5806_v24, %s6193_s14  ;;  %v6641_v8 = vsel %vm401_vm0, %v451_v63, %v452_v0  ;;  %v580_v9 = vrot.slane %v6590_v41, 2  ;;  %v581_v10 = vrot.slane %v6599_v46, 2  ;;  %v707_v14 = vrot.slane %v6581_v36, 3 }
  0x50   : > { %5812 = vrot.lane.b32.xlu1 %v5811_v32, %s6195_s17  ;;  %v5886_v12 = vpack.i.bf16 %v6641_v8, %v6631_v4  ;;  %v6650_v13 = vsel %vm530_vm2, %v576_v59, %v578_v5  ;;  %v709_v15 = vrot.slane %v6590_v41, 3  ;;  %v574_v17 = vrot.slane %v6569_v30, 2  ;;  %v6044_v4 = vld [vmem:[%s8529_s3 + $0x38] sm:$0xff]   ;;  %v6046_v8 = vld [vmem:[%s8529_s3 + $0x30] sm:$0xff]  }
  0x51   : > { %v702_v18 = vrot.slane %v6566_v29, 3  ;;  %v582_v19 = vsel %vm530_vm2, %v580_v9, %v581_v10  ;;  %v710_v20 = vrot.slane %v6599_v46, 3  ;;  %v703_v23 = vrot.slane %v6569_v30, 3 }
  0x52   : > { %v5891_v24 = vpack.i.bf16 %v582_v19, %v6650_v13  ;;  %v708_v25 = vsel %vm659_vm1, %v705_v3, %v707_v14  ;;  %v454_v32 = vrot.slane %v6624_v1, 1  ;;  %v583_v38 = vrot.slane %v6624_v1, 2 }
  0x53   : > { %5817 = vrot.lane.b32.xlu0 %v5816_v33, %s6194_s16  ;;  %v828_v33 = vsel %vm788_vm3, %v825_v27, %v827_v26  ;;  %v831_v39 = vrot.slane %v6566_v29, 4  ;;  %v585_v44 = vrot.slane %v6635_v6, 2  ;;  %v832_v45 = vrot.slane %v6569_v30, 4 }
  0x54   : > { %5822 = vrot.lane.b32.xlu1 %v5821_v34, %s6196_s22  ;;  %v711_v34 = vsel %vm659_vm1, %v709_v15, %v710_v20  ;;  %v455_v43 = vsel %vm401_vm0, %v452_v0, %v454_v32  ;;  %v584_v47 = vsel %vm530_vm2, %v581_v10, %v583_v38  ;;  %v712_v27 = vrot.slane %v6624_v1, 3  ;;  %v6048_v15 = vld [vmem:[%s8529_s3 + $0x20] sm:$0xff]  }
  0x55   : > { %v5896_v42 = vpack.i.bf16 %v711_v34, %v708_v25  ;;  %v834_v51 = vrot.slane %v6572_v31, 4  ;;  %v586_v58 = vsel %vm530_vm2, %v583_v38, %v585_v44  ;;  %v714_v60 = vrot.slane %v6635_v6, 3  ;;  %v6111_v38 = vld [vmem:[%s6322_s24 + $0x8] sm:$0xff] }
  0x56   : > { %v5911_v63 = vpack.i.bf16 %v586_v58, %v584_v47  ;;  %v713_v0 = vsel %vm659_vm1, %v710_v20, %v712_v27  ;;  %v1197_v5 = vsel %vm530_vm2, %v6037_v21, 0  ;;  %v838_v9 = vrot.slane %v6590_v41, 4 }
  0x57   : > { %5827 = vrot.lane.b32.xlu0 %v5826_v37, %s6193_s14  ;;  %v456_v37 = vrot.slane %v6635_v6, 1  ;;  %v839_v10 = vrot.slane %v6599_v46, 4  ;;  %v715_v13 = vsel %vm659_vm1, %v712_v27, %v714_v60  ;;  %1233 = vmatpush2.bf16.msra.mxu0 %v1197_v5  ;;  %v446_v50 = vsel %vm401_vm0, %v444_v52, %v445_v53 }
  0x58   : > { %5832 = vrot.lane.b32.xlu1 %v5831_v61, %s6195_s17  ;;  %v836_v61 = vrot.slane %v6581_v36, 4  ;;  %v448_v36 = vsel %vm401_vm0, %v445_v53, %v447_v54  ;;  %v575_v16 = vsel %vm530_vm2, %v573_v56, %v574_v17  ;;  %v577_v11 = vsel %vm530_vm2, %v574_v17, %v576_v59  ;;  %v6050_v17 = vld [vmem:[%s8529_s3 + $0x18] sm:$0xff]  }
  0x59   : > { %v457_v49 = vsel %vm401_vm0, %v454_v32, %v456_v37  ;;  %v5871_v46 = vpack.i.bf16 %v577_v11, %v575_v16  ;;  %v833_v52 = vsel %vm788_vm3, %v831_v39, %v832_v45  ;;  %v835_v53 = vsel %vm788_vm3, %v832_v45, %v834_v51 }
  0x5a   : > { %v5906_v57 = vpack.i.bf16 %v457_v49, %v455_v43  ;;  %v5881_v28 = vpack.i.bf16 %v835_v53, %v833_v52  ;;  %v837_v35 = vsel %vm788_vm3, %v834_v51, %v836_v61  ;;  %v840_v31 = vsel %vm788_vm3, %v838_v9, %v839_v10  ;;  %v6039_v52 = vld [vmem:[%s8529_s3 + $0x78] sm:$0xff]  }
  0x5b   : > { %5837 = vrot.lane.b32.xlu0 %v5836_v62, %s6194_s16  ;;  %v830_v62 = vsel %vm788_vm3, %v827_v26, %v829_v48  ;;  %v704_v26 = vsel %vm659_vm1, %v702_v18, %v703_v23  ;;  %v706_v48 = vsel %vm659_vm1, %v703_v23, %v705_v3  ;;  %v841_v56 = vrot.slane %v6624_v1, 4  ;;  %v6051_v18 = vld [vmem:[%s8529_s3 + $0x10] sm:$0xff]  }
  0x5c   : > { %5842 = vrot.lane.b32.xlu1 %v5841_v2, %s6196_s22  ;;  %v5916_v2 = vpack.i.bf16 %v715_v13, %v713_v0  ;;  %v5861_v55 = vpack.i.bf16 %v830_v62, %v828_v33  ;;  %v5876_v54 = vpack.i.bf16 %v706_v48, %v704_v26  ;;  %v843_v59 = vrot.slane %v6635_v6, 4  ;;  %v6038_v62 = vld [vmem:[%s8529_s3 + $0x80] sm:$0xff]  }
  0x5d   : > { %v842_v3 = vsel %vm788_vm3, %v839_v10, %v841_v56  ;;  %v6197_v14 = vmov 0   ;;  %vm3175_vm12 = vcmask 1043459   ;;  %vm3177_vm13 = vcmask 1044484  }
  0x5e   : > { %1690 = vmatprep.subr.bf16.mxu0 %v6197_v14  ;;  %1488 = vmatprep.subr.bf16.mxu1 %v6197_v14  ;;  %vm3179_vm14 = vcmask 1045509   ;;  %vm3181_vm15 = vcmask 1046534   ;;  %vm3183_vm0 = vcmask 1047559   ;;  %vm3722_vm1 = vcmask 588800  }
  0x5f   : > { %5847 = vrot.lane.b32.xlu0 %v5846_v22, %s6193_s14  ;;  %v5866_v22 = vpack.i.bf16 %v448_v36, %v446_v50  ;;  %1489 = vmatpush1.bf16.msra.mxu1 %v6044_v4  ;;  %v6114_v50 = vld [vmem:[%s6322_s24 + $0x10] sm:$0xff]  ;;  %vm3739_vm2 = vcmask 719872  }
  0x60   : > { %5852 = vrot.lane.b32.xlu1 %v5851_v7, %s6195_s17  ;;  %v844_v7 = vsel %vm788_vm3, %v841_v56, %v843_v59  ;;  %1490 = vmatprep.subr.bf16.mxu1 %v6197_v14 }
  0x61   : > { %v5921_v6 = vpack.i.bf16 %v844_v7, %v842_v3 }
  0x63   : > { %5857 = vrot.lane.b32.xlu0 %v5856_v40, %s6194_s16  ;;  %v5901_v40 = vpack.i.bf16 %v840_v31, %v837_v35  ;;  %1491 = vmatpush1.bf16.msra.mxu1 %v6046_v8  ;;  %v6040_v8 = vld [vmem:[%s8529_s3 + $0x70] sm:$0xff]  }
  0x64   : > { %5862 = vrot.lane.b32.xlu1 %v5861_v55, %s6196_s22  ;;  %1492 = vmatprep.subr.bf16.mxu1 %v6197_v14 }
  0x67   : > { %5867 = vrot.lane.b32.xlu0 %v5866_v22, %s6193_s14 }
  0x68   : > { %5872 = vrot.lane.b32.xlu1 %v5871_v46, %s6195_s17 }
  0x6b   : > { %5877 = vrot.lane.b32.xlu0 %v5876_v54, %s6194_s16 }
  0x6c   : > { %5882 = vrot.lane.b32.xlu1 %v5881_v28, %s6196_s22 }
  0x6f   : > { %5887 = vrot.lane.b32.xlu0 %v5886_v12, %s6193_s14  ;;  %v6047_v12 = vld [vmem:[%s8529_s3 + $0x28] sm:$0xff]  }
  0x70   : > { %5892 = vrot.lane.b32.xlu1 %v5891_v24, %s6195_s17  ;;  %1493 = vmatpush1.bf16.msra.mxu1 %v6047_v12 }
  0x71   : > { %1494 = vmatprep.subr.bf16.mxu1 %v6197_v14 }
  0x73   : > { %5897 = vrot.lane.b32.xlu0 %v5896_v42, %s6194_s16  ;;  %v6112_v42 = vld [vmem:[%s6322_s24] sm:$0xff] }
  0x74   : > { %5902 = vrot.lane.b32.xlu1 %v5901_v40, %s6196_s22  ;;  %1495 = vmatpush1.bf16.msra.mxu1 %v6048_v15 }
  0x75   : > { %1496 = vmatprep.subr.bf16.mxu1 %v6197_v14 }
  0x77   : > { %5907 = vrot.lane.b32.xlu0 %v5906_v57, %s6193_s14  ;;  %s5087_s14 = scalar_lea.sflag [#allocation3], %s326_s27 }
  0x78   : > { %5912 = vrot.lane.b32.xlu1 %v5911_v63, %s6195_s17  ;;  %1497 = vmatpush1.bf16.msra.mxu1 %v6050_v17  ;;  %v6115_v17 = vld [vmem:[%s6322_s24 + $0x30] sm:$0xff]  ;;  %s6201_s17 = smov 88  }
  0x79   : > { %1498 = vmatprep.subr.bf16.mxu1 %v6197_v14 }
  0x7b   : > { %5917 = vrot.lane.b32.xlu0 %v5916_v2, %s6194_s16  ;;  %v6113_v2 = vld [vmem:[%s6322_s24 + $0x20] sm:$0xff]  ;;  %s5163_s16 = sshll.u32 %s326_s27, 3 }
  0x7c   : > { %5922 = vrot.lane.b32.xlu1 %v5921_v6, %s6196_s22  ;;  %1499 = vmatpush1.bf16.msra.mxu1 %v6051_v18 }
  0x7d   : > { %1500 = vmatprep.subr.bf16.mxu1 %v6197_v14 }
  0x91   : > { %v5688_v19 = vpop.permute.xlu0 %5687 }
  0x92   : > { %v5698_v20 = vpop.permute.xlu1 %5697  ;;  %v5690_v21 = vunpack.i.h.bf16 %v5688_v19  ;;  %v5689_v23 = vunpack.i.l.bf16 %v5688_v19  ;;  %v6116_v19 = vld [vmem:[%s6322_s24 + $0x28] sm:$0xff] }
  0x93   : > { %v5700_v25 = vunpack.i.h.bf16 %v5698_v20  ;;  %v5699_v32 = vunpack.i.l.bf16 %v5698_v20 }
  0x94   : > { %v919_v39 = vsel %vm917_vm4, %v6111_v38, %v5690_v21  ;;  %v918_v43 = vsel %vm917_vm4, %v6112_v42, %v5689_v23 }
  0x95   : > { %v5693_v24 = vpop.permute.xlu0 %5692 }
  0x96   : > { %v5695_v33 = vunpack.i.h.bf16 %v5693_v24  ;;  %v5694_v34 = vunpack.i.l.bf16 %v5693_v24  ;;  %v5703_v37 = vpop.permute.xlu1 %5702 }
  0x97   : > { %v5705_v44 = vunpack.i.h.bf16 %v5703_v37  ;;  %v5704_v45 = vunpack.i.l.bf16 %v5703_v37 }
  0x98   : > { %v943_v49 = vsel %vm942_vm5, %v918_v43, %v5694_v34  ;;  %v944_v47 = vsel %vm942_vm5, %v919_v39, %v5695_v33  ;;  %v6041_v34 = vld [vmem:[%s8529_s3 + $0x68] sm:$0xff]  }
  0x99   : > { %v5708_v27 = vpop.permute.xlu0 %5707  ;;  %v1018_v51 = vpack.c.bf16 %v5705_v44, %v5704_v45  ;;  %v968_v57 = vsel %vm967_vm6, %v943_v49, %v5699_v32  ;;  %v969_v58 = vsel %vm967_vm6, %v944_v47, %v5700_v25 }
  0x9a   : > { %v5710_v60 = vunpack.i.h.bf16 %v5708_v27  ;;  %v5709_v61 = vunpack.i.l.bf16 %v5708_v27  ;;  %v5713_v63 = vpop.permute.xlu1 %5712  ;;  %v993_v0 = vsel %vm992_vm7, %v968_v57, %v5704_v45  ;;  %v994_v5 = vsel %vm992_vm7, %v969_v58, %v5705_v44  ;;  %v6042_v58 = vld [vmem:[%s8529_s3 + $0x60] sm:$0xff]  }
  0x9b   : > { %v5715_v9 = vunpack.i.h.bf16 %v5713_v63  ;;  %v5714_v10 = vunpack.i.l.bf16 %v5713_v63  ;;  %5186 = vmatprep.mubr.msk.bf16.mxu0 %vm1159_vm8, %v1018_v51  ;;  %v1017_v13 = vpack.c.bf16 %v994_v5, %v993_v0  ;;  %v6117_v63 = vld [vmem:[%s6322_s24 + $0x48] sm:$0xff]  ;;  %v6118_v5 = vld [vmem:[%s6322_s24 + $0x40] sm:$0xff] }
  0x9c   : > { %v921_v55 = vsel %vm917_vm4, %v6113_v2, %v5710_v60  ;;  %v920_v36 = vsel %vm917_vm4, %v6114_v50, %v5709_v61 }
  0x9d   : > { %v945_v16 = vsel %vm942_vm5, %v920_v36, %v5714_v10  ;;  %v946_v11 = vsel %vm942_vm5, %v921_v55, %v5715_v9  ;;  %v5718_v22 = vpop.permute.xlu0 %5717  ;;  %1235 = vmatmul.mubr.bf16.vlgmr.msra.gmra.mxu0 %v1017_v13  ;;  %v6043_v36 = vld [vmem:[%s8529_s3 + $0x58] sm:$0xff]  }
  0x9e   : > { %v5720_v46 = vunpack.i.h.bf16 %v5718_v22  ;;  %v5719_v26 = vunpack.i.l.bf16 %v5718_v22  ;;  %v5723_v48 = vpop.permute.xlu1 %5722  ;;  %1691 = vmatpush1.bf16.msra.mxu0 %v6038_v62 }
  0x9f   : > { %v5725_v53 = vunpack.i.h.bf16 %v5723_v48  ;;  %v5724_v54 = vunpack.i.l.bf16 %v5723_v48  ;;  %1692 = vmatprep.subr.bf16.mxu0 %v6197_v14 }
  0xa0   : > { %v970_v28 = vsel %vm967_vm6, %v945_v16, %v5719_v26  ;;  %v971_v35 = vsel %vm967_vm6, %v946_v11, %v5720_v46 }
  0xa1   : > { %v1020_v31 = vpack.c.bf16 %v5725_v53, %v5724_v54  ;;  %v5728_v40 = vpop.permute.xlu0 %5727  ;;  %v995_v56 = vsel %vm992_vm7, %v970_v28, %v5724_v54  ;;  %v996_v59 = vsel %vm992_vm7, %v971_v35, %v5725_v53 }
  0xa2   : > { %v5730_v3 = vunpack.i.h.bf16 %v5728_v40  ;;  %v5729_v7 = vunpack.i.l.bf16 %v5728_v40  ;;  %v5733_v4 = vpop.permute.xlu1 %5732  ;;  %v1019_v6 = vpack.c.bf16 %v996_v59, %v995_v56  ;;  %1693 = vmatpush1.bf16.msra.mxu0 %v6039_v52  ;;  %v6045_v40 = vld [vmem:[%s8529_s3 + $0x50] sm:$0xff]  }
  0xa3   : > { %v5735_v12 = vunpack.i.h.bf16 %v5733_v4  ;;  %v5734_v15 = vunpack.i.l.bf16 %v5733_v4  ;;  %5187 = vmatprep.mubr.msk.bf16.mxu0 %vm1159_vm8, %v1020_v31  ;;  %1694 = vmatprep.subr.bf16.mxu0 %v6197_v14  ;;  %v6120_v4 = vld [vmem:[%s6322_s24 + $0x50] sm:$0xff] }
  0xa4   : > { %v923_v18 = vsel %vm917_vm4, %v6115_v17, %v5730_v3  ;;  %v922_v20 = vsel %vm917_vm4, %v6116_v19, %v5729_v7  ;;  %v6119_v3 = vld [vmem:[%s6322_s24 + $0x60] sm:$0xff] }
  0xa5   : > { %v947_v21 = vsel %vm942_vm5, %v922_v20, %v5734_v15  ;;  %v948_v23 = vsel %vm942_vm5, %v923_v18, %v5735_v12  ;;  %v5738_v24 = vpop.permute.xlu0 %5737  ;;  %1245 = vmatmul.mubr.bf16.gmra.mxu0 %v1019_v6  ;;  %v6049_v20 = vld [vmem:[%s8529_s3 + $0x48] sm:$0xff]  }
  0xa6   : > { %v5740_v25 = vunpack.i.h.bf16 %v5738_v24  ;;  %v5739_v32 = vunpack.i.l.bf16 %v5738_v24  ;;  %v5743_v33 = vpop.permute.xlu1 %5742  ;;  %1695 = vmatpush1.bf16.msra.mxu0 %v6040_v8 }
  0xa7   : > { %v5745_v37 = vunpack.i.h.bf16 %v5743_v33  ;;  %v5744_v38 = vunpack.i.l.bf16 %v5743_v33  ;;  %1696 = vmatprep.subr.bf16.mxu0 %v6197_v14 }
  0xa8   : > { %v972_v39 = vsel %vm967_vm6, %v947_v21, %v5739_v32  ;;  %v973_v42 = vsel %vm967_vm6, %v948_v23, %v5740_v25 }
  0xa9   : > { %v1022_v43 = vpack.c.bf16 %v5745_v37, %v5744_v38  ;;  %v5748_v44 = vpop.permute.xlu0 %5747  ;;  %v997_v45 = vsel %vm992_vm7, %v972_v39, %v5744_v38  ;;  %v998_v49 = vsel %vm992_vm7, %v973_v42, %v5745_v37 }
  0xaa   : > { %v5750_v47 = vunpack.i.h.bf16 %v5748_v44  ;;  %v5749_v27 = vunpack.i.l.bf16 %v5748_v44  ;;  %v5753_v51 = vpop.permute.xlu1 %5752  ;;  %v1021_v57 = vpack.c.bf16 %v998_v49, %v997_v45  ;;  %1697 = vmatpush1.bf16.msra.mxu0 %v6041_v34  ;;  %v6121_v49 = vld [vmem:[%s6322_s24 + $0x70] sm:$0xff] }
  0xab   : > { %v5755_v60 = vunpack.i.h.bf16 %v5753_v51  ;;  %v5754_v61 = vunpack.i.l.bf16 %v5753_v51  ;;  %5188 = vmatprep.mubr.msk.bf16.mxu0 %vm1159_vm8, %v1022_v43  ;;  %1698 = vmatprep.subr.bf16.mxu0 %v6197_v14 }
  0xac   : > { %v925_v0 = vsel %vm917_vm4, %v6117_v63, %v5750_v47  ;;  %v924_v62 = vsel %vm917_vm4, %v6118_v5, %v5749_v27  ;;  %v6122_v27 = vld [vmem:[%s6322_s24 + $0x68] sm:$0xff] }
  0xad   : > { %v949_v9 = vsel %vm942_vm5, %v924_v62, %v5754_v61  ;;  %v950_v10 = vsel %vm942_vm5, %v925_v0, %v5755_v60  ;;  %v5758_v13 = vpop.permute.xlu0 %5757  ;;  %1255 = vmatmul.mubr.bf16.gmra.mxu0 %v1021_v57 }
  0xae   : > { %v5760_v2 = vunpack.i.h.bf16 %v5758_v13  ;;  %v5759_v55 = vunpack.i.l.bf16 %v5758_v13  ;;  %v5763_v50 = vpop.permute.xlu1 %5762  ;;  %1699 = vmatpush1.bf16.msra.mxu0 %v6042_v58 }
  0xaf   : > { %v5765_v16 = vunpack.i.h.bf16 %v5763_v50  ;;  %v5764_v11 = vunpack.i.l.bf16 %v5763_v50  ;;  %1700 = vmatprep.subr.bf16.mxu0 %v6197_v14 }
  0xb0   : > { %v974_v22 = vsel %vm967_vm6, %v949_v9, %v5759_v55  ;;  %v975_v46 = vsel %vm967_vm6, %v950_v10, %v5760_v2 }
  0xb1   : > { %v1024_v26 = vpack.c.bf16 %v5765_v16, %v5764_v11  ;;  %v5768_v48 = vpop.permute.xlu0 %5767  ;;  %v999_v52 = vsel %vm992_vm7, %v974_v22, %v5764_v11  ;;  %v1000_v53 = vsel %vm992_vm7, %v975_v46, %v5765_v16 }
  0xb2   : > { %v5770_v54 = vunpack.i.h.bf16 %v5768_v48  ;;  %v5769_v28 = vunpack.i.l.bf16 %v5768_v48  ;;  %v5773_v35 = vpop.permute.xlu1 %5772  ;;  %v1023_v31 = vpack.c.bf16 %v1000_v53, %v999_v52  ;;  %1701 = vmatpush1.bf16.msra.mxu0 %v6043_v36  ;;  %v6123_v48 = vld [vmem:[%s6322_s24 + $0x88] sm:$0xff]  ;;  %v6124_v53 = vld [vmem:[%s6322_s24 + $0x80] sm:$0xff] }
  0xb3   : > { %v5775_v56 = vunpack.i.h.bf16 %v5773_v35  ;;  %v5774_v59 = vunpack.i.l.bf16 %v5773_v35  ;;  %5189 = vmatprep.mubr.msk.bf16.mxu0 %vm1159_vm8, %v1024_v26  ;;  %1702 = vmatprep.subr.bf16.mxu0 %v6197_v14 }
  0xb4   : > { %v927_v7 = vsel %vm917_vm4, %v6119_v3, %v5770_v54  ;;  %v926_v6 = vsel %vm917_vm4, %v6120_v4, %v5769_v28 }
  0xb5   : > { %v951_v8 = vsel %vm942_vm5, %v926_v6, %v5774_v59  ;;  %v952_v12 = vsel %vm942_vm5, %v927_v7, %v5775_v56  ;;  %v5778_v15 = vpop.permute.xlu0 %5777  ;;  %1265 = vmatmul.mubr.bf16.gmra.mxu0 %v1023_v31 }
  0xb6   : > { %v5780_v17 = vunpack.i.h.bf16 %v5778_v15  ;;  %v5779_v18 = vunpack.i.l.bf16 %v5778_v15  ;;  %v5783_v19 = vpop.permute.xlu1 %5782  ;;  %1703 = vmatpush1.bf16.msra.mxu0 %v6045_v40 }
  0xb7   : > { %v5785_v21 = vunpack.i.h.bf16 %v5783_v19  ;;  %v5784_v23 = vunpack.i.l.bf16 %v5783_v19  ;;  %1704 = vmatprep.subr.bf16.mxu0 %v6197_v14 }
  0xb8   : > { %v976_v24 = vsel %vm967_vm6, %v951_v8, %v5779_v18  ;;  %v977_v25 = vsel %vm967_vm6, %v952_v12, %v5780_v17 }
  0xb9   : > { %v1026_v32 = vpack.c.bf16 %v5785_v21, %v5784_v23  ;;  %v5788_v33 = vpop.permute.xlu0 %5787  ;;  %v1001_v34 = vsel %vm992_vm7, %v976_v24, %v5784_v23  ;;  %v1002_v37 = vsel %vm992_vm7, %v977_v25, %v5785_v21  ;;  %v6125_v25 = vld [vmem:[%s6322_s24 + $0xa0] sm:$0xff] }
  0xba   : > { %v5790_v38 = vunpack.i.h.bf16 %v5788_v33  ;;  %v5789_v39 = vunpack.i.l.bf16 %v5788_v33  ;;  %v5793_v42 = vpop.permute.xlu1 %5792  ;;  %v1025_v43 = vpack.c.bf16 %v1002_v37, %v1001_v34  ;;  %1705 = vmatpush1.bf16.msra.mxu0 %v6049_v20  ;;  %v6126_v33 = vld [vmem:[%s6322_s24 + $0x90] sm:$0xff] }
  0xbb   : > { %v5795_v44 = vunpack.i.h.bf16 %v5793_v42  ;;  %v5794_v45 = vunpack.i.l.bf16 %v5793_v42  ;;  %5190 = vmatprep.mubr.msk.bf16.mxu0 %vm1159_vm8, %v1026_v32  ;;  %1720 = vmatprep.subr.bf16.mxu0 %v6197_v14 }
  0xbc   : > { %v929_v47 = vsel %vm917_vm4, %v6121_v49, %v5790_v38  ;;  %v928_v51 = vsel %vm917_vm4, %v6122_v27, %v5789_v39 }
  0xbd   : > { %v953_v57 = vsel %vm942_vm5, %v928_v51, %v5794_v45  ;;  %v954_v58 = vsel %vm942_vm5, %v929_v47, %v5795_v44  ;;  %v5798_v60 = vpop.permute.xlu0 %5797  ;;  %1275 = vmatmul.mubr.bf16.gmra.mxu0 %v1025_v43 }
  0xbe   : > { %v5800_v61 = vunpack.i.h.bf16 %v5798_v60  ;;  %v5799_v63 = vunpack.i.l.bf16 %v5798_v60  ;;  %v5803_v0 = vpop.permute.xlu1 %5802 }
  0xbf   : > { %v5805_v5 = vunpack.i.h.bf16 %v5803_v0  ;;  %v5804_v62 = vunpack.i.l.bf16 %v5803_v0 }
  0xc0   : > { %v978_v9 = vsel %vm967_vm6, %v953_v57, %v5799_v63  ;;  %v979_v10 = vsel %vm967_vm6, %v954_v58, %v5800_v61 }
  0xc1   : > { %v1028_v13 = vpack.c.bf16 %v5805_v5, %v5804_v62  ;;  %v5808_v2 = vpop.permute.xlu0 %5807  ;;  %v1003_v55 = vsel %vm992_vm7, %v978_v9, %v5804_v62  ;;  %v1004_v50 = vsel %vm992_vm7, %v979_v10, %v5805_v5  ;;  %v6127_v10 = vld [vmem:[%s6322_s24 + $0xb0] sm:$0xff] }
  0xc2   : > { %v5810_v36 = vunpack.i.h.bf16 %v5808_v2  ;;  %v5809_v16 = vunpack.i.l.bf16 %v5808_v2  ;;  %v5813_v11 = vpop.permute.xlu1 %5812  ;;  %v1027_v22 = vpack.c.bf16 %v1004_v50, %v1003_v55  ;;  %v6128_v2 = vld [vmem:[%s6322_s24 + $0xa8] sm:$0xff] }
  0xc3   : > { %v5815_v46 = vunpack.i.h.bf16 %v5813_v11  ;;  %v5814_v26 = vunpack.i.l.bf16 %v5813_v11  ;;  %5191 = vmatprep.mubr.msk.bf16.mxu0 %vm1159_vm8, %v1028_v13 }
  0xc4   : > { %v931_v52 = vsel %vm917_vm4, %v6123_v48, %v5810_v36  ;;  %v930_v54 = vsel %vm917_vm4, %v6124_v53, %v5809_v16 }
  0xc5   : > { %v955_v28 = vsel %vm942_vm5, %v930_v54, %v5814_v26  ;;  %v956_v35 = vsel %vm942_vm5, %v931_v52, %v5815_v46  ;;  %v5818_v31 = vpop.permute.xlu0 %5817  ;;  %1285 = vmatmul.mubr.bf16.gmra.mxu0 %v1027_v22 }
  0xc6   : > { %v5820_v40 = vunpack.i.h.bf16 %v5818_v31  ;;  %v5819_v56 = vunpack.i.l.bf16 %v5818_v31  ;;  %v5823_v59 = vpop.permute.xlu1 %5822 }
  0xc7   : > { %v5825_v3 = vunpack.i.h.bf16 %v5823_v59  ;;  %v5824_v7 = vunpack.i.l.bf16 %v5823_v59 }
  0xc8   : > { %v980_v4 = vsel %vm967_vm6, %v955_v28, %v5819_v56  ;;  %v981_v6 = vsel %vm967_vm6, %v956_v35, %v5820_v40 }
  0xc9   : > { %v1030_v8 = vpack.c.bf16 %v5825_v3, %v5824_v7  ;;  %v5828_v12 = vpop.permute.xlu0 %5827  ;;  %v1005_v15 = vsel %vm992_vm7, %v980_v4, %v5824_v7  ;;  %v1006_v17 = vsel %vm992_vm7, %v981_v6, %v5825_v3 }
  0xca   : > { %v5830_v18 = vunpack.i.h.bf16 %v5828_v12  ;;  %v5829_v19 = vunpack.i.l.bf16 %v5828_v12  ;;  %v5833_v20 = vpop.permute.xlu1 %5832  ;;  %v1029_v21 = vpack.c.bf16 %v1006_v17, %v1005_v15  ;;  %v6052_v12 = vld [vmem:[%s8529_s3 + $0x8] sm:$0xff]  }
  0xcb   : > { %v5835_v23 = vunpack.i.h.bf16 %v5833_v20  ;;  %v5834_v24 = vunpack.i.l.bf16 %v5833_v20  ;;  %5192 = vmatprep.mubr.msk.bf16.mxu0 %vm1159_vm8, %v1030_v8  ;;  %1501 = vmatpush1.bf16.msra.mxu1 %v6052_v12  ;;  %v1061_v12 = vlaneseq }
  0xcc   : > { %v933_v32 = vsel %vm917_vm4, %v6125_v25, %v5830_v18  ;;  %v932_v34 = vsel %vm917_vm4, %v6126_v33, %v5829_v19  ;;  %1502 = vmatprep.subr.bf16.mxu1 %v6197_v14  ;;  %v6053_v25 = vld [vmem:[%s8529_s3 + $0x88] sm:$0xff]  }
  0xcd   : > { %v957_v37 = vsel %vm942_vm5, %v932_v34, %v5834_v24  ;;  %v958_v38 = vsel %vm942_vm5, %v933_v32, %v5835_v23  ;;  %v5838_v39 = vpop.permute.xlu0 %5837  ;;  %1295 = vmatmul.mubr.bf16.gmra.mxu0 %v1029_v21  ;;  %v6054_v32 = vld [vmem:[%s8529_s3] sm:$0xff]  }
  0xce   : > { %v5840_v42 = vunpack.i.h.bf16 %v5838_v39  ;;  %v5839_v43 = vunpack.i.l.bf16 %v5838_v39  ;;  %v5843_v44 = vpop.permute.xlu1 %5842  ;;  %1721 = vmatpush2.bf16.msra.mxu0 %v6053_v25 }
  0xcf   : > { %v5845_v45 = vunpack.i.h.bf16 %v5843_v44  ;;  %v5844_v49 = vunpack.i.l.bf16 %v5843_v44  ;;  %1503 = vmatpush1.bf16.msra.mxu1 %v6054_v32 }
  0xd0   : > { %v982_v47 = vsel %vm967_vm6, %v957_v37, %v5839_v43  ;;  %v983_v27 = vsel %vm967_vm6, %v958_v38, %v5840_v42  ;;  %1518 = vmatprep.subr.bf16.mxu1 %v6197_v14 }
  0xd1   : > { %v1032_v51 = vpack.c.bf16 %v5845_v45, %v5844_v49  ;;  %v5848_v57 = vpop.permute.xlu0 %5847  ;;  %v1007_v58 = vsel %vm992_vm7, %v982_v47, %v5844_v49  ;;  %v1008_v60 = vsel %vm992_vm7, %v983_v27, %v5845_v45  ;;  %v6129_v27 = vld [vmem:[%s6322_s24 + $0xd0] sm:$0xff] }
  0xd2   : > { %v5850_v61 = vunpack.i.h.bf16 %v5848_v57  ;;  %v5849_v63 = vunpack.i.l.bf16 %v5848_v57  ;;  %v5853_v0 = vpop.permute.xlu1 %5852  ;;  %v1031_v5 = vpack.c.bf16 %v1008_v60, %v1007_v58  ;;  %v6055_v57 = vld [vmem:[%s8529_s3 + $0x40] sm:$0xff]  }
  0xd3   : > { %v5855_v62 = vunpack.i.h.bf16 %v5853_v0  ;;  %v5854_v9 = vunpack.i.l.bf16 %v5853_v0  ;;  %5193 = vmatprep.mubr.msk.bf16.mxu0 %vm1159_vm8, %v1032_v51  ;;  %1519 = vmatpush2.bf16.msra.mxu1 %v6055_v57 }
  0xd4   : > { %v935_v13 = vsel %vm917_vm4, %v6127_v10, %v5850_v61  ;;  %v934_v55 = vsel %vm917_vm4, %v6128_v2, %v5849_v63 }
  0xd5   : > { %v959_v50 = vsel %vm942_vm5, %v934_v55, %v5854_v9  ;;  %v960_v36 = vsel %vm942_vm5, %v935_v13, %v5855_v62  ;;  %v5858_v16 = vpop.permute.xlu0 %5857  ;;  %1305 = vmatmul.mubr.bf16.gmra.mxu0 %v1031_v5 }
  0xd6   : > { %v5860_v11 = vunpack.i.h.bf16 %v5858_v16  ;;  %v5859_v22 = vunpack.i.l.bf16 %v5858_v16  ;;  %v5863_v46 = vpop.permute.xlu1 %5862 }
  0xd7   : > { %v5865_v26 = vunpack.i.h.bf16 %v5863_v46  ;;  %v5864_v48 = vunpack.i.l.bf16 %v5863_v46 }
  0xd8   : > { %v984_v52 = vsel %vm967_vm6, %v959_v50, %v5859_v22  ;;  %v985_v53 = vsel %vm967_vm6, %v960_v36, %v5860_v11 }
  0xd9   : > { %v1034_v54 = vpack.c.bf16 %v5865_v26, %v5864_v48  ;;  %v5868_v28 = vpop.permute.xlu0 %5867  ;;  %v1009_v35 = vsel %vm992_vm7, %v984_v52, %v5864_v48  ;;  %v1010_v31 = vsel %vm992_vm7, %v985_v53, %v5865_v26  ;;  %v6130_v48 = vld [vmem:[%s6322_s24 + $0xe8] sm:$0xff] }
  0xda   : > { %v5870_v40 = vunpack.i.h.bf16 %v5868_v28  ;;  %v5869_v56 = vunpack.i.l.bf16 %v5868_v28  ;;  %v5873_v59 = vpop.permute.xlu1 %5872  ;;  %v1033_v3 = vpack.c.bf16 %v1010_v31, %v1009_v35 }
  0xdb   : > { %v5875_v7 = vunpack.i.h.bf16 %v5873_v59  ;;  %v5874_v4 = vunpack.i.l.bf16 %v5873_v59  ;;  %5194 = vmatprep.mubr.msk.bf16.mxu0 %vm1159_vm8, %v1034_v54 }
  0xdc   : > { %v937_v6 = vsel %vm917_vm4, %v6569_v30, %v5870_v40  ;;  %v936_v8 = vsel %vm917_vm4, %v6566_v29, %v5869_v56 }
  0xdd   : > { %v961_v15 = vsel %vm942_vm5, %v936_v8, %v5874_v4  ;;  %v962_v17 = vsel %vm942_vm5, %v937_v6, %v5875_v7  ;;  %v5878_v18 = vpop.permute.xlu0 %5877  ;;  %1315 = vmatmul.mubr.bf16.gmra.mxu0 %v1033_v3 }
  0xde   : > { %v5880_v19 = vunpack.i.h.bf16 %v5878_v18  ;;  %v5879_v20 = vunpack.i.l.bf16 %v5878_v18  ;;  %v5883_v21 = vpop.permute.xlu1 %5882 }
  0xdf   : > { %v5885_v23 = vunpack.i.h.bf16 %v5883_v21  ;;  %v5884_v24 = vunpack.i.l.bf16 %v5883_v21 }
  0xe0   : > { %v986_v29 = vsel %vm967_vm6, %v961_v15, %v5879_v20  ;;  %v987_v30 = vsel %vm967_vm6, %v962_v17, %v5880_v19  ;;  %v6957_v15 = vshrl.u32 %v1061_v12, 7  ;;  %v1059_v20 = vld [vmem:[%s8528_s2] sm:$0x3] }
  0xe1   : > { %v1036_v33 = vpack.c.bf16 %v5885_v23, %v5884_v24  ;;  %v5888_v34 = vpop.permute.xlu0 %5887  ;;  %v1011_v37 = vsel %vm992_vm7, %v986_v29, %v5884_v24  ;;  %v1012_v38 = vsel %vm992_vm7, %v987_v30, %v5885_v23 }
  0xe2   : > { %v5890_v39 = vunpack.i.h.bf16 %v5888_v34  ;;  %v5889_v42 = vunpack.i.l.bf16 %v5888_v34  ;;  %v5893_v43 = vpop.permute.xlu1 %5892  ;;  %v1035_v44 = vpack.c.bf16 %v1012_v38, %v1011_v37  ;;  %v1067_v17 = vsub.s32 1, %v6957_v15 }
  0xe3   : > { %v5895_v45 = vunpack.i.h.bf16 %v5893_v43  ;;  %v5894_v49 = vunpack.i.l.bf16 %v5893_v43  ;;  %5195 = vmatprep.mubr.msk.bf16.mxu0 %vm1159_vm8, %v1036_v33  ;;  %v6961_v18 = vsub.s32 0, %v6957_v15 }
  0xe4   : > { %v939_v47 = vsel %vm917_vm4, %v6590_v41, %v5890_v39  ;;  %v938_v51 = vsel %vm917_vm4, %v6129_v27, %v5889_v42  ;;  %v6966_v23 = vrot.slane %v1059_v20, %v1067_v17 }
  0xe5   : > { %v963_v58 = vsel %vm942_vm5, %v938_v51, %v5894_v49  ;;  %v964_v60 = vsel %vm942_vm5, %v939_v47, %v5895_v45  ;;  %v5898_v61 = vpop.permute.xlu0 %5897  ;;  %1325 = vmatmul.mubr.bf16.gmra.mxu0 %v1035_v44  ;;  %v6969_v24 = vrot.slane %v1059_v20, %v6961_v18 }
  0xe6   : > { %v5900_v63 = vunpack.i.h.bf16 %v5898_v61  ;;  %v5899_v0 = vunpack.i.l.bf16 %v5898_v61  ;;  %v5903_v5 = vpop.permute.xlu1 %5902 }
  0xe7   : > { %v5905_v14 = vunpack.i.h.bf16 %v5903_v5  ;;  %v5904_v41 = vunpack.i.l.bf16 %v5903_v5 }
  0xe8   : > { %v988_v62 = vsel %vm967_vm6, %v963_v58, %v5899_v0  ;;  %v989_v9 = vsel %vm967_vm6, %v964_v60, %v5900_v63 }
  0xe9   : > { %v1038_v10 = vpack.c.bf16 %v5905_v14, %v5904_v41  ;;  %v5908_v13 = vpop.permute.xlu0 %5907  ;;  %v1013_v2 = vsel %vm992_vm7, %v988_v62, %v5904_v41  ;;  %v1014_v55 = vsel %vm992_vm7, %v989_v9, %v5905_v14 }
  0xea   : > { %v5910_v50 = vunpack.i.h.bf16 %v5908_v13  ;;  %v5909_v36 = vunpack.i.l.bf16 %v5908_v13  ;;  %v5913_v16 = vpop.permute.xlu1 %5912  ;;  %v1037_v11 = vpack.c.bf16 %v1014_v55, %v1013_v2 }
  0xeb   : > { %v5915_v22 = vunpack.i.h.bf16 %v5913_v16  ;;  %v5914_v46 = vunpack.i.l.bf16 %v5913_v16  ;;  %5196 = vmatprep.mubr.msk.bf16.mxu0 %vm1159_vm8, %v1038_v10 }
  0xec   : > { %v941_v26 = vsel %vm917_vm4, %v6624_v1, %v5910_v50  ;;  %v940_v52 = vsel %vm917_vm4, %v6130_v48, %v5909_v36  ;;  %vm3956_vm4 = vcmask 850944  }
  0xed   : > { %v965_v53 = vsel %vm942_vm5, %v940_v52, %v5914_v46  ;;  %v966_v54 = vsel %vm942_vm5, %v941_v26, %v5915_v22  ;;  %v5918_v28 = vpop.permute.xlu0 %5917  ;;  %1335 = vmatmul.mubr.bf16.gmra.mxu0 %v1037_v11  ;;  %vm4905_vm5 = vcmask 523264  }
  0xee   : > { %v5920_v35 = vunpack.i.h.bf16 %v5918_v28  ;;  %v5919_v31 = vunpack.i.l.bf16 %v5918_v28  ;;  %v5923_v40 = vpop.permute.xlu1 %5922 }
  0xef   : > { %v5925_v56 = vunpack.i.h.bf16 %v5923_v40  ;;  %v5924_v59 = vunpack.i.l.bf16 %v5923_v40 }
  0xf0   : > { %v990_v3 = vsel %vm967_vm6, %v965_v53, %v5919_v31  ;;  %v991_v7 = vsel %vm967_vm6, %v966_v54, %v5920_v35 }
  0xf1   : > { %v1040_v4 = vpack.c.bf16 %v5925_v56, %v5924_v59  ;;  %v1015_v1 = vsel %vm992_vm7, %v990_v3, %v5924_v59  ;;  %v1016_v6 = vsel %vm992_vm7, %v991_v7, %v5925_v56 }
  0xf2   : > { %v1039_v8 = vpack.c.bf16 %v1016_v6, %v1015_v1 }
  0xf3   : > { %5197 = vmatprep.mubr.msk.bf16.mxu0 %vm1159_vm8, %v1040_v4 }
  0xf5   : > { %1345 = vmatmul.mubr.bf16.gmra.mxu0 %v1039_v8 }
 0x15d   : > { %v1236_v19 = vpop.f32.mrf.mxu0 }
 0x15e   : > { %v1237_v34 = vadd.f32 %v1236_v19, %v6969_v24 }
 0x15f   : > { %v1238_v21 = vpop.f32.mrf.mxu0 }
 0x160   : > { %v1239_v32 = vadd.f32 %v1238_v21, %v6966_v23 }
 0x161   : > { %v1240_v29 = vpop.f32.mrf.mxu0 }
 0x162   : > { %v1241_v30 = vadd.f32 %v1240_v29, %v6969_v24 }
 0x163   : > { %v1242_v25 = vpop.f32.mrf.mxu0 }
 0x164   : > { %v1243_v33 = vadd.f32 %v1242_v25, %v6966_v23  ;;  %v1355_v39 = vpack.c.bf16 %v1241_v30, %v1237_v34 }
 0x165   : > { %v1246_v37 = vpop.f32.mrf.mxu0 }
 0x166   : > { %v1356_v38 = vpack.c.bf16 %v1243_v33, %v1239_v32  ;;  %v1247_v27 = vadd.f32 %v1246_v37, %v6969_v24 }
 0x167   : > { %v1248_v42 = vpop.f32.mrf.mxu0 }
 0x168   : > { %5207 = vmatprep.mubr.msk.bf16.mxu1 %vm1451_vm9, %v1356_v38  ;;  %5246 = vmatprep.mubr.msk.bf16.mxu0 %vm1451_vm9, %v1356_v38  ;;  %v1249_v49 = vadd.f32 %v1248_v42, %v6966_v23 }
 0x169   : > { %v1250_v43 = vpop.f32.mrf.mxu0  ;;  %1521 = vmatmul.mubr.bf16.vlgmr.msra.gmra.mxu1 %v1355_v39  ;;  %1723 = vmatmul.mubr.bf16.vlgmr.msra.gmra.mxu0 %v1355_v39 }
 0x16a   : > { %v1251_v44 = vadd.f32 %v1250_v43, %v6969_v24 }
 0x16b   : > { %v1252_v45 = vpop.f32.mrf.mxu0 }
 0x16c   : > { %v1253_v47 = vadd.f32 %v1252_v45, %v6966_v23  ;;  %v1357_v58 = vpack.c.bf16 %v1251_v44, %v1247_v27 }
 0x16d   : > { %v1256_v51 = vpop.f32.mrf.mxu0 }
 0x16e   : > { %v1358_v57 = vpack.c.bf16 %v1253_v47, %v1249_v49  ;;  %v1257_v41 = vadd.f32 %v1256_v51, %v6969_v24 }
 0x16f   : > { %v1258_v60 = vpop.f32.mrf.mxu0 }
 0x170   : > { %5208 = vmatprep.mubr.msk.bf16.mxu1 %vm1451_vm9, %v1358_v57  ;;  %5247 = vmatprep.mubr.msk.bf16.mxu0 %vm1451_vm9, %v1358_v57  ;;  %v1259_v5 = vadd.f32 %v1258_v60, %v6966_v23 }
 0x171   : > { %v1260_v61 = vpop.f32.mrf.mxu0  ;;  %1529 = vmatmul.mubr.bf16.gmra.mxu1 %v1357_v58  ;;  %1731 = vmatmul.mubr.bf16.gmra.mxu0 %v1357_v58 }
 0x172   : > { %v1261_v63 = vadd.f32 %v1260_v61, %v6969_v24 }
 0x173   : > { %v1262_v0 = vpop.f32.mrf.mxu0 }
 0x174   : > { %v1263_v14 = vadd.f32 %v1262_v0, %v6966_v23  ;;  %v1359_v10 = vpack.c.bf16 %v1261_v63, %v1257_v41 }
 0x175   : > { %v1266_v62 = vpop.f32.mrf.mxu0 }
 0x176   : > { %v1360_v9 = vpack.c.bf16 %v1263_v14, %v1259_v5  ;;  %v1267_v11 = vadd.f32 %v1266_v62, %v6969_v24 }
 0x177   : > { %v1268_v13 = vpop.f32.mrf.mxu0 }
 0x178   : > { %5209 = vmatprep.mubr.msk.bf16.mxu1 %vm1451_vm9, %v1360_v9  ;;  %5248 = vmatprep.mubr.msk.bf16.mxu0 %vm1451_vm9, %v1360_v9  ;;  %v1269_v36 = vadd.f32 %v1268_v13, %v6966_v23 }
 0x179   : > { %v1270_v2 = vpop.f32.mrf.mxu0  ;;  %1537 = vmatmul.mubr.bf16.gmra.mxu1 %v1359_v10  ;;  %1739 = vmatmul.mubr.bf16.gmra.mxu0 %v1359_v10 }
 0x17a   : > { %v1271_v55 = vadd.f32 %v1270_v2, %v6969_v24 }
 0x17b   : > { %v1272_v50 = vpop.f32.mrf.mxu0 }
 0x17c   : > { %v1273_v16 = vadd.f32 %v1272_v50, %v6966_v23  ;;  %v1361_v26 = vpack.c.bf16 %v1271_v55, %v1267_v11 }
 0x17d   : > { %v1276_v22 = vpop.f32.mrf.mxu0 }
 0x17e   : > { %v1362_v46 = vpack.c.bf16 %v1273_v16, %v1269_v36  ;;  %v1277_v31 = vadd.f32 %v1276_v22, %v6969_v24 }
 0x17f   : > { %v1278_v48 = vpop.f32.mrf.mxu0 }
 0x180   : > { %5210 = vmatprep.mubr.msk.bf16.mxu1 %vm1451_vm9, %v1362_v46  ;;  %5249 = vmatprep.mubr.msk.bf16.mxu0 %vm1451_vm9, %v1362_v46  ;;  %v1279_v28 = vadd.f32 %v1278_v48, %v6966_v23 }
 0x181   : > { %v1280_v52 = vpop.f32.mrf.mxu0  ;;  %1545 = vmatmul.mubr.bf16.gmra.mxu1 %v1361_v26  ;;  %1747 = vmatmul.mubr.bf16.gmra.mxu0 %v1361_v26 }
 0x182   : > { %v1281_v53 = vadd.f32 %v1280_v52, %v6969_v24 }
 0x183   : > { %v1282_v54 = vpop.f32.mrf.mxu0 }
 0x184   : > { %v1283_v35 = vadd.f32 %v1282_v54, %v6966_v23  ;;  %v1363_v59 = vpack.c.bf16 %v1281_v53, %v1277_v31 }
 0x185   : > { %v1286_v40 = vpop.f32.mrf.mxu0 }
 0x186   : > { %v1364_v56 = vpack.c.bf16 %v1283_v35, %v1279_v28  ;;  %v1287_v12 = vadd.f32 %v1286_v40, %v6969_v24 }
 0x187   : > { %v1288_v3 = vpop.f32.mrf.mxu0 }
 0x188   : > { %5211 = vmatprep.mubr.msk.bf16.mxu1 %vm1451_vm9, %v1364_v56  ;;  %5250 = vmatprep.mubr.msk.bf16.mxu0 %vm1451_vm9, %v1364_v56  ;;  %v1289_v6 = vadd.f32 %v1288_v3, %v6966_v23 }
 0x189   : > { %v1290_v7 = vpop.f32.mrf.mxu0  ;;  %1553 = vmatmul.mubr.bf16.gmra.mxu1 %v1363_v59  ;;  %1755 = vmatmul.mubr.bf16.gmra.mxu0 %v1363_v59 }
 0x18a   : > { %v1291_v4 = vadd.f32 %v1290_v7, %v6969_v24 }
 0x18b   : > { %v1292_v1 = vpop.f32.mrf.mxu0 }
 0x18c   : > { %v1293_v8 = vadd.f32 %v1292_v1, %v6966_v23  ;;  %v1365_v20 = vpack.c.bf16 %v1291_v4, %v1287_v12 }
 0x18d   : > { %v1296_v17 = vpop.f32.mrf.mxu0 }
 0x18e   : > { %v1366_v19 = vpack.c.bf16 %v1293_v8, %v1289_v6  ;;  %v1297_v34 = vadd.f32 %v1296_v17, %v6969_v24 }
 0x18f   : > { %v1298_v21 = vpop.f32.mrf.mxu0 }
 0x190   : > { %5212 = vmatprep.mubr.msk.bf16.mxu1 %vm1451_vm9, %v1366_v19  ;;  %5251 = vmatprep.mubr.msk.bf16.mxu0 %vm1451_vm9, %v1366_v19  ;;  %v1299_v32 = vadd.f32 %v1298_v21, %v6966_v23 }
 0x191   : > { %v1300_v29 = vpop.f32.mrf.mxu0  ;;  %1561 = vmatmul.mubr.bf16.gmra.mxu1 %v1365_v20  ;;  %1763 = vmatmul.mubr.bf16.gmra.mxu0 %v1365_v20  ;;  %v6198_v20 = vmov 1983009808  }
 0x192   : > { %v1301_v30 = vadd.f32 %v1300_v29, %v6969_v24  ;;  %v1869_v21 = vunpack.c.l.s4 %v6198_v20 }
 0x193   : > { %v1302_v25 = vpop.f32.mrf.mxu0 }
 0x194   : > { %v1303_v33 = vadd.f32 %v1302_v25, %v6966_v23  ;;  %v1367_v39 = vpack.c.bf16 %v1301_v30, %v1297_v34  ;;  %v1870_v29 = vunpack.c.0.s8 %v1869_v21 }
 0x195   : > { %v1306_v37 = vpop.f32.mrf.mxu0 }
 0x196   : > { %v1368_v38 = vpack.c.bf16 %v1303_v33, %v1299_v32  ;;  %v1307_v27 = vadd.f32 %v1306_v37, %v6969_v24  ;;  %v7044_v30 = vsub.s32 %v1870_v29, %v6957_v15 }
 0x197   : > { %v1308_v42 = vpop.f32.mrf.mxu0 }
 0x198   : > { %5213 = vmatprep.mubr.msk.bf16.mxu1 %vm1451_vm9, %v1368_v38  ;;  %5252 = vmatprep.mubr.msk.bf16.mxu0 %vm1451_vm9, %v1368_v38  ;;  %v1309_v49 = vadd.f32 %v1308_v42, %v6966_v23  ;;  %8578 = vst [vmem:[#allocation5_spill] sm:$0xff] %v7044_v30 }
 0x199   : > { %v1310_v43 = vpop.f32.mrf.mxu0  ;;  %1569 = vmatmul.mubr.bf16.gmra.mxu1 %v1367_v39  ;;  %1771 = vmatmul.mubr.bf16.gmra.mxu0 %v1367_v39 }
 0x19a   : > { %v1311_v44 = vadd.f32 %v1310_v43, %v6969_v24 }
 0x19b   : > { %v1312_v45 = vpop.f32.mrf.mxu0 }
 0x19c   : > { %v1313_v47 = vadd.f32 %v1312_v45, %v6966_v23  ;;  %v1369_v58 = vpack.c.bf16 %v1311_v44, %v1307_v27 }
 0x19d   : > { %v1316_v51 = vpop.f32.mrf.mxu0 }
 0x19e   : > { %v1370_v57 = vpack.c.bf16 %v1313_v47, %v1309_v49  ;;  %v1317_v41 = vadd.f32 %v1316_v51, %v6969_v24 }
 0x19f   : > { %v1318_v60 = vpop.f32.mrf.mxu0 }
 0x1a0   : > { %5214 = vmatprep.mubr.msk.bf16.mxu1 %vm1451_vm9, %v1370_v57  ;;  %5253 = vmatprep.mubr.msk.bf16.mxu0 %vm1451_vm9, %v1370_v57  ;;  %v1319_v5 = vadd.f32 %v1318_v60, %v6966_v23 }
 0x1a1   : > { %v1320_v61 = vpop.f32.mrf.mxu0  ;;  %1577 = vmatmul.mubr.bf16.gmra.mxu1 %v1369_v58  ;;  %1779 = vmatmul.mubr.bf16.gmra.mxu0 %v1369_v58 }
 0x1a2   : > { %v1321_v63 = vadd.f32 %v1320_v61, %v6969_v24 }
 0x1a3   : > { %v1322_v0 = vpop.f32.mrf.mxu0 }
 0x1a4   : > { %v1323_v14 = vadd.f32 %v1322_v0, %v6966_v23  ;;  %v1371_v10 = vpack.c.bf16 %v1321_v63, %v1317_v41 }
 0x1a5   : > { %v1326_v62 = vpop.f32.mrf.mxu0 }
 0x1a6   : > { %v1372_v9 = vpack.c.bf16 %v1323_v14, %v1319_v5  ;;  %v1327_v11 = vadd.f32 %v1326_v62, %v6969_v24 }
 0x1a7   : > { %v1328_v13 = vpop.f32.mrf.mxu0 }
 0x1a8   : > { %5215 = vmatprep.mubr.msk.bf16.mxu1 %vm1451_vm9, %v1372_v9  ;;  %5254 = vmatprep.mubr.msk.bf16.mxu0 %vm1451_vm9, %v1372_v9  ;;  %v1329_v36 = vadd.f32 %v1328_v13, %v6966_v23 }
 0x1a9   : > { %v1330_v2 = vpop.f32.mrf.mxu0  ;;  %1585 = vmatmul.mubr.bf16.gmra.mxu1 %v1371_v10  ;;  %1787 = vmatmul.mubr.bf16.gmra.mxu0 %v1371_v10 }
 0x1aa   : > { %v1331_v55 = vadd.f32 %v1330_v2, %v6969_v24 }
 0x1ab   : > { %v1332_v50 = vpop.f32.mrf.mxu0 }
 0x1ac   : > { %v1333_v16 = vadd.f32 %v1332_v50, %v6966_v23  ;;  %v1373_v26 = vpack.c.bf16 %v1331_v55, %v1327_v11 }
 0x1ad   : > { %v1336_v22 = vpop.f32.mrf.mxu0 }
 0x1ae   : > { %v1374_v46 = vpack.c.bf16 %v1333_v16, %v1329_v36  ;;  %v1337_v31 = vadd.f32 %v1336_v22, %v6969_v24 }
 0x1af   : > { %v1338_v48 = vpop.f32.mrf.mxu0 }
 0x1b0   : > { %5216 = vmatprep.mubr.msk.bf16.mxu1 %vm1451_vm9, %v1374_v46  ;;  %5255 = vmatprep.mubr.msk.bf16.mxu0 %vm1451_vm9, %v1374_v46  ;;  %v1339_v28 = vadd.f32 %v1338_v48, %v6966_v23 }
 0x1b1   : > { %v1340_v52 = vpop.f32.mrf.mxu0  ;;  %1593 = vmatmul.mubr.bf16.gmra.mxu1 %v1373_v26  ;;  %1795 = vmatmul.mubr.bf16.gmra.mxu0 %v1373_v26 }
 0x1b2   : > { %v1341_v53 = vadd.f32 %v1340_v52, %v6969_v24 }
 0x1b3   : > { %v1342_v54 = vpop.f32.mrf.mxu0 }
 0x1b4   : > { %v1343_v35 = vadd.f32 %v1342_v54, %v6966_v23  ;;  %v1375_v59 = vpack.c.bf16 %v1341_v53, %v1337_v31 }
 0x1b5   : > { %v1346_v40 = vpop.f32.mrf.mxu0 }
 0x1b6   : > { %v1376_v56 = vpack.c.bf16 %v1343_v35, %v1339_v28  ;;  %v1347_v12 = vadd.f32 %v1346_v40, %v6969_v24 }
 0x1b7   : > { %v1348_v3 = vpop.f32.mrf.mxu0 }
 0x1b8   : > { %5217 = vmatprep.mubr.msk.bf16.mxu1 %vm1451_vm9, %v1376_v56  ;;  %5256 = vmatprep.mubr.msk.bf16.mxu0 %vm1451_vm9, %v1376_v56  ;;  %v1349_v6 = vadd.f32 %v1348_v3, %v6966_v23 }
 0x1b9   : > { %v1350_v7 = vpop.f32.mrf.mxu0  ;;  %1601 = vmatmul.mubr.bf16.gmra.mxu1 %v1375_v59  ;;  %1803 = vmatmul.mubr.bf16.gmra.mxu0 %v1375_v59 }
 0x1ba   : > { %v1351_v4 = vadd.f32 %v1350_v7, %v6969_v24 }
 0x1bb   : > { %v1352_v1 = vpop.f32.mrf.mxu0 }
 0x1bc   : > { %v1353_v8 = vadd.f32 %v1352_v1, %v6966_v23  ;;  %v1377_v19 = vpack.c.bf16 %v1351_v4, %v1347_v12 }
 0x1be   : > { %v1378_v17 = vpack.c.bf16 %v1353_v8, %v1349_v6 }
 0x1c0   : > { %5218 = vmatprep.mubr.msk.bf16.mxu1 %vm1451_vm9, %v1378_v17  ;;  %5257 = vmatprep.mubr.msk.bf16.mxu0 %vm1451_vm9, %v1378_v17 }
 0x1c1   : > { %1609 = vmatmul.mubr.bf16.gmra.mxu1 %v1377_v19  ;;  %1811 = vmatmul.mubr.bf16.gmra.mxu0 %v1377_v19 }
 0x229   : > { %v1522_v25 = vpop.f32.mrf.mxu1  ;;  %v1724_v32 = vpop.f32.mrf.mxu0 }
 0x22a   : > { %v1819_v33 = vmax.f32 %v1522_v25, %v1724_v32 }
 0x22b   : > { %v1524_v23 = vpop.f32.mrf.mxu1  ;;  %v1726_v34 = vpop.f32.mrf.mxu0 }
 0x22c   : > { %v1867_v24 = vcombine.high %v1819_v33, %v1819_v33  ;;  %v1874_v37 = vrot.slane %v1819_v33, %v7044_v30 }
 0x22d   : > { %v1525_v38 = vpop.f32.mrf.mxu1  ;;  %v1727_v39 = vpop.f32.mrf.mxu0 }
 0x22e   : > { %v1881_v42 = vrot.slane %v1867_v24, %v7044_v30  ;;  %v1882_v43 = vcombine.high %v1874_v37, %v1874_v37  ;;  %v5258_v44 = vrot.slane %v1874_v37, 9  ;;  %v1820_v45 = vmax.f32 %v1525_v38, %v1727_v39 }
 0x22f   : > { %v1527_v49 = vpop.f32.mrf.mxu1  ;;  %v1729_v47 = vpop.f32.mrf.mxu0 }
 0x230   : > { %v1883_v27 = vcombine.high %v1881_v42, %v1881_v42  ;;  %v5259_v15 = vrot.slane %v1882_v43, 9  ;;  %v5260_v51 = vrot.slane %v1881_v42, 9  ;;  %v2659_v57 = vmax.f32 %v1874_v37, %v5258_v44 }
 0x231   : > { %v1884_v58 = vcombine.high %v1820_v45, %v1820_v45  ;;  %v1891_v60 = vrot.slane %v1820_v45, %v7044_v30  ;;  %v1530_v61 = vpop.f32.mrf.mxu1  ;;  %v1732_v63 = vpop.f32.mrf.mxu0 }
 0x232   : > { %v5261_v0 = vrot.slane %v1883_v27, 9  ;;  %v2660_v5 = vmax.f32 %v1882_v43, %v5259_v15  ;;  %v2661_v14 = vmax.f32 %v1881_v42, %v5260_v51  ;;  %v2755_v41 = vmax.f32 %v2659_v57, 0.0 }
 0x233   : > { %v1898_v62 = vrot.slane %v1884_v58, %v7044_v30  ;;  %v1899_v9 = vcombine.high %v1891_v60, %v1891_v60  ;;  %v5262_v10 = vrot.slane %v1891_v60, 9  ;;  %v1821_v13 = vmax.f32 %v1530_v61, %v1732_v63  ;;  %v1532_v2 = vpop.f32.mrf.mxu1  ;;  %v1734_v55 = vpop.f32.mrf.mxu0 }
 0x234   : > { %v2662_v50 = vmax.f32 %v1883_v27, %v5261_v0  ;;  %v2756_v36 = vmax.f32 %v2660_v5, 0.0  ;;  %v2757_v16 = vmax.f32 %v2661_v14, 0.0  ;;  %v2918_v11 = vrot.slane %v2755_v41, %v6961_v18 }
 0x235   : > { %v1900_v22 = vcombine.high %v1898_v62, %v1898_v62  ;;  %v5263_v46 = vrot.slane %v1899_v9, 9  ;;  %v5264_v26 = vrot.slane %v1898_v62, 9  ;;  %v2663_v48 = vmax.f32 %v1891_v60, %v5262_v10  ;;  %v1533_v52 = vpop.f32.mrf.mxu1  ;;  %v1735_v53 = vpop.f32.mrf.mxu0 }
 0x236   : > { %v2758_v54 = vmax.f32 %v2662_v50, 0.0  ;;  %v2922_v28 = vrot.slane %v2756_v36, %v6961_v18  ;;  %v2926_v35 = vrot.slane %v2757_v16, %v6961_v18  ;;  %v1901_v31 = vcombine.high %v1821_v13, %v1821_v13 }
 0x237   : > { %v5265_v40 = vrot.slane %v1900_v22, 9  ;;  %v2664_v56 = vmax.f32 %v1899_v9, %v5263_v46  ;;  %v2665_v59 = vmax.f32 %v1898_v62, %v5264_v26  ;;  %v2759_v3 = vmax.f32 %v2663_v48, 0.0  ;;  %v1535_v7 = vpop.f32.mrf.mxu1  ;;  %v1737_v4 = vpop.f32.mrf.mxu0 }
 0x238   : > { %v7054_v1 = vrot.slane %v2758_v54, %v6961_v18  ;;  %v3172_v6 = vsel %vm3171_vm10, %v2922_v28, %v2918_v11  ;;  %v3282_v8 = vsel %vm3171_vm10, %v2926_v35, %v2922_v28  ;;  %v1908_v12 = vrot.slane %v1821_v13, %v7044_v30 }
 0x239   : > { %v7060_v17 = vsel %vm3173_vm11, %v2926_v35, %v3172_v6  ;;  %v2666_v19 = vmax.f32 %v1900_v22, %v5265_v40  ;;  %v2760_v20 = vmax.f32 %v2664_v56, 0.0  ;;  %v2761_v21 = vmax.f32 %v2665_v59, 0.0  ;;  %v1538_v29 = vpop.f32.mrf.mxu1  ;;  %v1740_v25 = vpop.f32.mrf.mxu0 }
 0x23a   : > { %8579 = vst [vmem:[#allocation6_spill] sm:$0xff] %v7054_v1  ;;  %8580 = vst [vmem:[#allocation7_spill] sm:$0xff] %v7060_v17  ;;  %v7064_v32 = vsel %vm3171_vm10, %v7054_v1, %v2926_v35  ;;  %v7067_v33 = vrot.slane %v2759_v3, %v6961_v18  ;;  %v1915_v23 = vrot.slane %v1901_v31, %v7044_v30  ;;  %v5266_v39 = vrot.slane %v1908_v12, 9 }
 0x23b   : > { %v1916_v34 = vcombine.high %v1908_v12, %v1908_v12  ;;  %v2762_v24 = vmax.f32 %v2666_v19, 0.0  ;;  %v7071_v37 = vrot.slane %v2760_v20, %v6961_v18  ;;  %v7074_v38 = vrot.slane %v2761_v21, %v6961_v18  ;;  %v1540_v42 = vpop.f32.mrf.mxu1  ;;  %v1742_v43 = vpop.f32.mrf.mxu0 }
 0x23c   : > { %8581 = vst [vmem:[#allocation8_spill] sm:$0xff] %v7067_v33  ;;  %v1917_v44 = vcombine.high %v1915_v23, %v1915_v23  ;;  %v5268_v49 = vrot.slane %v1915_v23, 9  ;;  %v1822_v47 = vmax.f32 %v1533_v52, %v1735_v53  ;;  %v2667_v15 = vmax.f32 %v1908_v12, %v5266_v39 }
 0x23d   : > { %8582 = vst [vmem:[#allocation9_spill] sm:$0xff] %v7071_v37  ;;  %8583 = vst [vmem:[#allocation10_spill] sm:$0xff] %v7074_v38  ;;  %v5267_v45 = vrot.slane %v1916_v34, 9  ;;  %v7077_v27 = vrot.slane %v2762_v24, %v6961_v18  ;;  %v1823_v51 = vmax.f32 %v1538_v29, %v1740_v25  ;;  %v1541_v57 = vpop.f32.mrf.mxu1  ;;  %v1743_v58 = vpop.f32.mrf.mxu0  ;;  %v7081_v60 = vsel %vm3173_vm11, %v7054_v1, %v3282_v8 }
 0x23e   : > { %v5269_v61 = vrot.slane %v1917_v44, 9  ;;  %v7085_v0 = vmax.f32 %v1915_v23, %v5268_v49  ;;  %v1918_v5 = vcombine.high %v1822_v47, %v1822_v47  ;;  %v2763_v14 = vmax.f32 %v2667_v15, 0.0 }
 0x23f   : > { %8584 = vst [vmem:[#allocation11_spill] sm:$0xff] %v7077_v27  ;;  %v7083_v63 = vmax.f32 %v1916_v34, %v5267_v45  ;;  %v1925_v41 = vrot.slane %v1822_v47, %v7044_v30  ;;  %v1935_v62 = vcombine.high %v1823_v51, %v1823_v51  ;;  %v1942_v9 = vrot.slane %v1823_v51, %v7044_v30  ;;  %v1543_v10 = vpop.f32.mrf.mxu1  ;;  %v1745_v13 = vpop.f32.mrf.mxu0 }
 0x240   : > { %v7089_v2 = vmax.f32 %v1917_v44, %v5269_v61  ;;  %v1932_v36 = vrot.slane %v1918_v5, %v7044_v30  ;;  %v7095_v16 = vrot.slane %v2763_v14, %v6961_v18 }
 0x241   : > { %v2764_v55 = vmax.f32 %v7083_v63, 0.0  ;;  %v1933_v11 = vcombine.high %v1925_v41, %v1925_v41  ;;  %v5270_v22 = vrot.slane %v1925_v41, 9  ;;  %v1949_v46 = vrot.slane %v1935_v62, %v7044_v30  ;;  %v1546_v26 = vpop.f32.mrf.mxu1  ;;  %v1748_v48 = vpop.f32.mrf.mxu0 }
 0x242   : > { %8585 = vst [vmem:[#allocation12_spill] sm:$0xff] %v7089_v2  ;;  %8586 = vst [vmem:[#allocation13_spill] sm:$0xff] %v7095_v16  ;;  %v1934_v52 = vcombine.high %v1932_v36, %v1932_v36  ;;  %v5272_v53 = vrot.slane %v1932_v36, 9  ;;  %v1950_v54 = vcombine.high %v1942_v9, %v1942_v9  ;;  %v5274_v28 = vrot.slane %v1942_v9, 9 }
 0x243   : > { %v5271_v35 = vrot.slane %v1933_v11, 9  ;;  %v2671_v31 = vmax.f32 %v1925_v41, %v5270_v22  ;;  %v1951_v40 = vcombine.high %v1949_v46, %v1949_v46  ;;  %v5276_v56 = vrot.slane %v1949_v46, 9  ;;  %v1548_v59 = vpop.f32.mrf.mxu1  ;;  %v1750_v3 = vpop.f32.mrf.mxu0 }
 0x244   : > { %v5273_v7 = vrot.slane %v1934_v52, 9  ;;  %v2673_v4 = vmax.f32 %v1932_v36, %v5272_v53  ;;  %v5275_v6 = vrot.slane %v1950_v54, 9  ;;  %v2675_v8 = vmax.f32 %v1942_v9, %v5274_v28 }
 0x245   : > { %v2672_v12 = vmax.f32 %v1933_v11, %v5271_v35  ;;  %v2767_v19 = vmax.f32 %v2671_v31, 0.0  ;;  %v5277_v20 = vrot.slane %v1951_v40, 9  ;;  %v2677_v21 = vmax.f32 %v1949_v46, %v5276_v56  ;;  %v1549_v29 = vpop.f32.mrf.mxu1  ;;  %v1751_v25 = vpop.f32.mrf.mxu0 }
 0x246   : > { %v2674_v23 = vmax.f32 %v1934_v52, %v5273_v7  ;;  %v2769_v34 = vmax.f32 %v2673_v4, 0.0  ;;  %v2676_v24 = vmax.f32 %v1950_v54, %v5275_v6  ;;  %v2771_v39 = vmax.f32 %v2675_v8, 0.0 }
 0x247   : > { %v2768_v42 = vmax.f32 %v2672_v12, 0.0  ;;  %v2950_v43 = vrot.slane %v2767_v19, %v6961_v18  ;;  %v2678_v44 = vmax.f32 %v1951_v40, %v5277_v20  ;;  %v2773_v45 = vmax.f32 %v2677_v21, 0.0  ;;  %v1551_v49 = vpop.f32.mrf.mxu1  ;;  %v1753_v47 = vpop.f32.mrf.mxu0 }
 0x248   : > { %v2770_v15 = vmax.f32 %v2674_v23, 0.0  ;;  %v2958_v51 = vrot.slane %v2769_v34, %v6961_v18  ;;  %v2772_v61 = vmax.f32 %v2676_v24, 0.0  ;;  %v7101_v5 = vrot.slane %v2771_v39, %v6961_v18 }
 0x249   : > { %v2954_v14 = vrot.slane %v2768_v42, %v6961_v18  ;;  %v2774_v41 = vmax.f32 %v2678_v44, 0.0  ;;  %v7105_v62 = vrot.slane %v2773_v45, %v6961_v18  ;;  %v1824_v9 = vmax.f32 %v1541_v57, %v1743_v58  ;;  %v1554_v10 = vpop.f32.mrf.mxu1  ;;  %v1756_v13 = vpop.f32.mrf.mxu0 }
 0x24a   : > { %8587 = vst [vmem:[#allocation14_spill] sm:$0xff] %v7101_v5  ;;  %v7108_v36 = vrot.slane %v2770_v15, %v6961_v18  ;;  %v7111_v11 = vrot.slane %v2772_v61, %v6961_v18  ;;  %v1825_v22 = vmax.f32 %v1546_v26, %v1748_v48  ;;  %v1826_v46 = vmax.f32 %v1549_v29, %v1751_v25 }
 0x24b   : > { %8588 = vst [vmem:[#allocation15_spill] sm:$0xff] %v7105_v62  ;;  %v3185_v52 = vsel %vm3171_vm10, %v2954_v14, %v2950_v43  ;;  %v7115_v53 = vsel %vm3171_vm10, %v2958_v51, %v2954_v14  ;;  %v7118_v54 = vrot.slane %v2774_v41, %v6961_v18  ;;  %v1952_v28 = vcombine.high %v1824_v9, %v1824_v9  ;;  %v1556_v57 = vpop.f32.mrf.mxu1  ;;  %v1758_v58 = vpop.f32.mrf.mxu0 }
 0x24c   : > { %8589 = vst [vmem:[#allocation16_spill] sm:$0xff] %v7108_v36  ;;  %8590 = vst [vmem:[#allocation17_spill] sm:$0xff] %v7111_v11  ;;  %v7121_v35 = vsel %vm3173_vm11, %v2958_v51, %v3185_v52  ;;  %v7125_v31 = vsel %vm3171_vm10, %v7108_v36, %v2958_v51  ;;  %v1959_v26 = vrot.slane %v1824_v9, %v7044_v30 }
 0x24d   : > { %8591 = vst [vmem:[#allocation18_spill] sm:$0xff] %v7118_v54  ;;  %8592 = vst [vmem:[#allocation19_spill] sm:$0xff] %v7121_v35  ;;  %v1969_v48 = vcombine.high %v1825_v22, %v1825_v22  ;;  %v1966_v40 = vrot.slane %v1952_v28, %v7044_v30  ;;  %v1976_v56 = vrot.slane %v1825_v22, %v7044_v30  ;;  %v7131_v7 = vpop.f32.mrf.mxu1  ;;  %v7133_v4 = vpop.f32.mrf.mxu0 }
 0x24e   : > { %v1986_v59 = vcombine.high %v1826_v46, %v1826_v46  ;;  %v1993_v3 = vrot.slane %v1826_v46, %v7044_v30  ;;  %v1967_v6 = vcombine.high %v1959_v26, %v1959_v26  ;;  %v5278_v8 = vrot.slane %v1959_v26, 9 }
 0x24f   : > { %v1983_v12 = vrot.slane %v1969_v48, %v7044_v30  ;;  %v1827_v19 = vmax.f32 %v1554_v10, %v1756_v13  ;;  %v1968_v20 = vcombine.high %v1966_v40, %v1966_v40  ;;  %v5280_v21 = vrot.slane %v1966_v40, 9  ;;  %v1761_v23 = vpop.f32.mrf.mxu0  ;;  %v1559_v34 = vpop.f32.mrf.mxu1 }
 0x250   : > { %v1984_v29 = vcombine.high %v1976_v56, %v1976_v56  ;;  %v5282_v25 = vrot.slane %v1976_v56, 9  ;;  %v5279_v24 = vrot.slane %v1967_v6, 9  ;;  %v2679_v39 = vmax.f32 %v1959_v26, %v5278_v8 }
 0x251   : > { %v1985_v42 = vcombine.high %v1983_v12, %v1983_v12  ;;  %v5284_v43 = vrot.slane %v1983_v12, 9  ;;  %v5281_v44 = vrot.slane %v1968_v20, 9  ;;  %v7136_v45 = vmax.f32 %v1966_v40, %v5280_v21  ;;  %v7138_v15 = vpop.f32.mrf.mxu1  ;;  %v7140_v51 = vpop.f32.mrf.mxu0 }
 0x252   : > { %v5283_v49 = vrot.slane %v1984_v29, 9  ;;  %v2683_v47 = vmax.f32 %v1976_v56, %v5282_v25  ;;  %v7142_v61 = vmax.f32 %v1967_v6, %v5279_v24  ;;  %v2775_v14 = vmax.f32 %v2679_v39, 0.0 }
 0x253   : > { %v5285_v41 = vrot.slane %v1985_v42, 9  ;;  %v2685_v9 = vmax.f32 %v1983_v12, %v5284_v43  ;;  %v7144_v10 = vmax.f32 %v1968_v20, %v5281_v44  ;;  %v1564_v52 = vpop.f32.mrf.mxu1  ;;  %v1766_v28 = vpop.f32.mrf.mxu0  ;;  %v2000_v6 = vrot.slane %v1986_v59, %v7044_v30 }
 0x254   : > { %v2684_v22 = vmax.f32 %v1984_v29, %v5283_v49  ;;  %v2779_v46 = vmax.f32 %v2683_v47, 0.0  ;;  %v2776_v57 = vmax.f32 %v7142_v61, 0.0  ;;  %v7149_v58 = vrot.slane %v2775_v14, %v6961_v18 }
 0x255   : > { %8593 = vst [vmem:[#allocation20_spill] sm:$0xff] %v7144_v10  ;;  %v2686_v26 = vmax.f32 %v1985_v42, %v5285_v41  ;;  %v2781_v48 = vmax.f32 %v2685_v9, 0.0  ;;  %v2001_v8 = vcombine.high %v1993_v3, %v1993_v3  ;;  %v7153_v12 = vpop.f32.mrf.mxu1  ;;  %v7155_v20 = vpop.f32.mrf.mxu0  ;;  %v5286_v25 = vrot.slane %v1993_v3, 9 }
 0x256   : > { %8594 = vst [vmem:[#allocation21_spill] sm:$0xff] %v7149_v58  ;;  %v2780_v40 = vmax.f32 %v2684_v22, 0.0  ;;  %v2982_v56 = vrot.slane %v2779_v46, %v6961_v18  ;;  %v2003_v23 = vcombine.high %v1827_v19, %v1827_v19  ;;  %v2002_v24 = vcombine.high %v2000_v6, %v2000_v6 }
 0x257   : > { %v2782_v21 = vmax.f32 %v2686_v26, 0.0  ;;  %v2990_v29 = vrot.slane %v2781_v48, %v6961_v18  ;;  %v5287_v39 = vrot.slane %v2001_v8, 9  ;;  %v5288_v42 = vrot.slane %v2000_v6, 9  ;;  %v1567_v43 = vpop.f32.mrf.mxu1  ;;  %v1769_v44 = vpop.f32.mrf.mxu0 }
 0x258   : > { %v2986_v34 = vrot.slane %v2780_v40, %v6961_v18  ;;  %v2687_v49 = vmax.f32 %v1993_v3, %v5286_v25  ;;  %v2010_v47 = vrot.slane %v1827_v19, %v7044_v30  ;;  %v2017_v14 = vrot.slane %v2003_v23, %v7044_v30 }
 0x259   : > { %v7160_v59 = vrot.slane %v2782_v21, %v6961_v18  ;;  %v5289_v22 = vrot.slane %v2002_v24, 9  ;;  %v2688_v46 = vmax.f32 %v2001_v8, %v5287_v39  ;;  %v7168_v52 = vpop.f32.mrf.mxu1  ;;  %v7170_v28 = vpop.f32.mrf.mxu0  ;;  %v2689_v19 = vmax.f32 %v2000_v6, %v5288_v42 }
 0x25a   : > { %v3192_v41 = vsel %vm3171_vm10, %v2986_v34, %v2982_v56  ;;  %v7166_v9 = vsel %vm3171_vm10, %v2990_v29, %v2986_v34  ;;  %v2783_v48 = vmax.f32 %v2687_v49, 0.0  ;;  %v2018_v21 = vcombine.high %v2010_v47, %v2010_v47 }
 0x25b   : > { %8595 = vst [vmem:[#allocation22_spill] sm:$0xff] %v7160_v59  ;;  %v7173_v26 = vsel %vm3173_vm11, %v2990_v29, %v3192_v41  ;;  %v7177_v3 = vsel %vm3171_vm10, %v7160_v59, %v2990_v29  ;;  %v2690_v40 = vmax.f32 %v2002_v24, %v5289_v22  ;;  %v2784_v56 = vmax.f32 %v2688_v46, 0.0  ;;  %v1572_v23 = vpop.f32.mrf.mxu1  ;;  %v1774_v8 = vpop.f32.mrf.mxu0 }
 0x25c   : > { %8596 = vst [vmem:[#allocation23_spill] sm:$0xff] %v7173_v26  ;;  %v2019_v25 = vcombine.high %v2017_v14, %v2017_v14  ;;  %v2785_v34 = vmax.f32 %v2689_v19, 0.0  ;;  %v7180_v39 = vrot.slane %v2783_v48, %v6961_v18  ;;  %v5290_v43 = vrot.slane %v2010_v47, 9 }
 0x25d   : > { %v5292_v44 = vrot.slane %v2017_v14, 9  ;;  %v2786_v41 = vmax.f32 %v2690_v40, 0.0  ;;  %v7183_v29 = vrot.slane %v2784_v56, %v6961_v18  ;;  %v5291_v6 = vrot.slane %v2018_v21, 9  ;;  %v7185_v49 = vpop.f32.mrf.mxu1  ;;  %v7187_v24 = vpop.f32.mrf.mxu0 }
 0x25e   : > { %v5293_v42 = vrot.slane %v2019_v25, 9  ;;  %v7190_v22 = vrot.slane %v2785_v34, %v6961_v18  ;;  %v2691_v46 = vmax.f32 %v2010_v47, %v5290_v43  ;;  %v1828_v48 = vmax.f32 %v7131_v7, %v7133_v4  ;;  %v6056_v47 = vld [vmem:[%s8530_s4 + $0x78] sm:$0xff]  }
 0x25f   : > { %v7192_v19 = vmax.f32 %v2017_v14, %v5292_v44  ;;  %v7197_v40 = vrot.slane %v2786_v41, %v6961_v18  ;;  %v7199_v56 = vmax.f32 %v2018_v21, %v5291_v6  ;;  %v3284_v8 = vsel %vm3175_vm12, %v7067_v33, %v7081_v60  ;;  %v1575_v13 = vpop.f32.mrf.mxu1  ;;  %v1777_v34 = vpop.f32.mrf.mxu0  ;;  %5468 = vmatprep.subr.bf16.mxu1 %v6056_v47 }
 0x260   : > { %v7201_v23 = vmax.f32 %v2019_v25, %v5293_v42  ;;  %v2787_v14 = vmax.f32 %v2691_v46, 0.0  ;;  %v2020_v4 = vcombine.high %v1828_v48, %v1828_v48  ;;  %v2027_v43 = vrot.slane %v1828_v48, %v7044_v30 }
 0x261   : > { %v3285_v25 = vsel %vm3177_vm13, %v7071_v37, %v3284_v8  ;;  %v3290_v60 = vsel %vm3173_vm11, %v7108_v36, %v7115_v53  ;;  %v7220_v13 = vrot.slane %v2764_v55, %v6961_v18  ;;  %v7222_v44 = vpop.f32.mrf.mxu1  ;;  %v7224_v41 = vpop.f32.mrf.mxu0  ;;  %v7237_v55 = vrot.slane %v2776_v57, %v6961_v18 }
 0x262   : > { %8597 = vst [vmem:[#allocation24_spill] sm:$0xff] %v7201_v23  ;;  %v7227_v6 = vrot.slane %v2787_v14, %v6961_v18  ;;  %v2034_v42 = vrot.slane %v2020_v4, %v7044_v30  ;;  %v2035_v46 = vcombine.high %v2027_v43, %v2027_v43  ;;  %v5294_v48 = vrot.slane %v2027_v43, 9 }
 0x263   : > { %8598 = vst [vmem:[#allocation25_spill] sm:$0xff] %v7220_v13  ;;  %v3286_v53 = vsel %vm3179_vm14, %v7074_v38, %v3285_v25  ;;  %v3291_v63 = vsel %vm3175_vm12, %v7101_v5, %v3290_v60  ;;  %8599 = vst [vmem:[#allocation26_spill] sm:$0xff] %v7237_v55  ;;  %v3403_v8 = vsel %vm3173_vm11, %v7067_v33, %v7064_v32  ;;  %v1580_v34 = vpop.f32.mrf.mxu1  ;;  %v1782_v47 = vpop.f32.mrf.mxu0 }
 0x264   : > { %v2036_v14 = vcombine.high %v2034_v42, %v2034_v42  ;;  %v5295_v4 = vrot.slane %v2035_v46, 9  ;;  %v5296_v7 = vrot.slane %v2034_v42, 9  ;;  %v2695_v21 = vmax.f32 %v2027_v43, %v5294_v48  ;;  %v6057_v43 = vld [vmem:[%s8530_s4 + $0x38] sm:$0xff]  }
 0x265   : > { %v3287_v25 = vsel %vm3181_vm15, %v7077_v27, %v3286_v53  ;;  %v3292_v60 = vsel %vm3177_vm13, %v7111_v11, %v3291_v63  ;;  %v3404_v61 = vsel %vm3175_vm12, %v7071_v37, %v3403_v8  ;;  %v3410_v57 = vsel %vm3173_vm11, %v7101_v5, %v7125_v31  ;;  %v7251_v32 = vpop.f32.mrf.mxu1  ;;  %v7253_v34 = vpop.f32.mrf.mxu0  ;;  %5469 = vmatpush3.bf16.msra.mxu1 %v6057_v43 }
 0x266   : > { %v5297_v48 = vrot.slane %v2036_v14, 9  ;;  %v2696_v53 = vmax.f32 %v2035_v46, %v5295_v4  ;;  %v2697_v47 = vmax.f32 %v2034_v42, %v5296_v7  ;;  %v2791_v50 = vmax.f32 %v2695_v21, 0.0 }
 0x267   : > { %v3288_v63 = vsel %vm3183_vm0, %v7095_v16, %v3287_v25  ;;  %v3293_v8 = vsel %vm3179_vm14, %v7105_v62, %v3292_v60  ;;  %v3405_v31 = vsel %vm3177_vm13, %v7074_v38, %v3404_v61  ;;  %v3411_v26 = vsel %vm3175_vm12, %v7111_v11, %v3410_v57  ;;  %v1785_v35 = vpop.f32.mrf.mxu0  ;;  %v1583_v17 = vpop.f32.mrf.mxu1 }
 0x268   : > { %v2698_v23 = vmax.f32 %v2036_v14, %v5297_v48  ;;  %v2792_v10 = vmax.f32 %v2696_v53, 0.0  ;;  %v2793_v46 = vmax.f32 %v2697_v47, 0.0  ;;  %v3014_v7 = vrot.slane %v2791_v50, %v6961_v18 }
 0x269   : > { %v3294_v21 = vsel %vm3181_vm15, %v7118_v54, %v3293_v8  ;;  %v3406_v42 = vsel %vm3179_vm14, %v7077_v27, %v3405_v31  ;;  %v3412_v4 = vsel %vm3177_vm13, %v7105_v62, %v3411_v26  ;;  %v1829_v25 = vmax.f32 %v7138_v15, %v7140_v51  ;;  %v7275_v35 = vpop.f32.mrf.mxu1  ;;  %v7277_v17 = vpop.f32.mrf.mxu0 }
 0x26a   : > { %v2794_v14 = vmax.f32 %v2698_v23, 0.0  ;;  %v3018_v60 = vrot.slane %v2792_v10, %v6961_v18  ;;  %v3022_v50 = vrot.slane %v2793_v46, %v6961_v18  ;;  %v3295_v61 = vsel %vm3183_vm0, %v7149_v58, %v3294_v21 }
 0x26b   : > { %v5926_v57 = vpack.i.bf16 %v3295_v61, %v3288_v63  ;;  %v3407_v43 = vsel %vm3181_vm15, %v7095_v16, %v3406_v42  ;;  %v3413_v26 = vsel %vm3179_vm14, %v7118_v54, %v3412_v4  ;;  %v2037_v15 = vcombine.high %v1829_v25, %v1829_v25  ;;  %v1588_v51 = vpop.f32.mrf.mxu1  ;;  %v1790_v48 = vpop.f32.mrf.mxu0 }
 0x26c   : > { %v7288_v53 = vrot.slane %v2794_v14, %v6961_v18  ;;  %v3199_v10 = vsel %vm3171_vm10, %v3018_v60, %v3014_v7  ;;  %v7292_v23 = vsel %vm3171_vm10, %v3022_v50, %v3018_v60  ;;  %v3408_v47 = vsel %vm3183_vm0, %v7220_v13, %v3407_v43 }
 0x26d   : > { %v7297_v63 = vsel %vm3173_vm11, %v3022_v50, %v3199_v10  ;;  %5927 = vrot.lane.b32.xlu0 %v5926_v57, %s6199_s28  ;;  %v3414_v8 = vsel %vm3181_vm15, %v7149_v58, %v3413_v26  ;;  %v2044_v31 = vrot.slane %v1829_v25, %v7044_v30  ;;  %v2051_v46 = vrot.slane %v2037_v15, %v7044_v30  ;;  %v7304_v7 = vpop.f32.mrf.mxu1  ;;  %v7306_v21 = vpop.f32.mrf.mxu0 }
 0x26e   : > { %8600 = vst [vmem:[#allocation27_spill] sm:$0xff] %v7288_v53  ;;  %8601 = vst [vmem:[#allocation28_spill] sm:$0xff] %v7297_v63  ;;  %v7310_v42 = vsel %vm3171_vm10, %v7288_v53, %v3022_v50  ;;  %v3415_v4 = vsel %vm3183_vm0, %v7237_v55, %v3414_v8  ;;  %v8602_v14 = vmax.f32 %v7085_v0, 0.0  ;;  %v8604_v25 = vmax.f32 %v7136_v45, 0.0 }
 0x26f   : > { %v5931_v57 = vpack.i.bf16 %v3415_v4, %v3408_v47  ;;  %v2052_v43 = vcombine.high %v2044_v31, %v2044_v31  ;;  %v2053_v26 = vcombine.high %v2051_v46, %v2051_v46  ;;  %v5298_v15 = vrot.slane %v2044_v31, 9  ;;  %v1591_v51 = vpop.f32.mrf.mxu1  ;;  %v1793_v50 = vpop.f32.mrf.mxu0 }
 0x270   : > { %v7317_v60 = vrot.slane %v8602_v14, %v6961_v18  ;;  %v7322_v61 = vrot.slane %v8604_v25, %v6961_v18  ;;  %v5300_v48 = vrot.slane %v2051_v46, 9  ;;  %v3522_v10 = vsel %vm3171_vm10, %v7067_v33, %v7054_v1 }
 0x271   : > { %v3529_v0 = vsel %vm3171_vm10, %v7101_v5, %v7108_v36  ;;  %v1830_v45 = vmax.f32 %v7153_v12, %v7155_v20  ;;  %5932 = vrot.lane.b32.xlu1 %v5931_v57, %s6200_s29  ;;  %v5299_v47 = vrot.slane %v2052_v43, 9  ;;  %v5301_v8 = vrot.slane %v2053_v26, 9  ;;  %v7335_v25 = vpop.f32.mrf.mxu1  ;;  %v7337_v51 = vpop.f32.mrf.mxu0 }
 0x272   : > { %8603 = vst [vmem:[#allocation29_spill] sm:$0xff] %v7317_v60  ;;  %8605 = vst [vmem:[#allocation30_spill] sm:$0xff] %v7322_v61  ;;  %v2699_v4 = vmax.f32 %v2044_v31, %v5298_v15  ;;  %v3523_v14 = vsel %vm3173_vm11, %v7071_v37, %v3522_v10  ;;  %v2701_v50 = vmax.f32 %v2051_v46, %v5300_v48 }
 0x273   : > { %v3524_v63 = vsel %vm3175_vm12, %v7074_v38, %v3523_v14  ;;  %v3530_v12 = vsel %vm3173_vm11, %v7111_v11, %v3529_v0  ;;  %v2054_v20 = vcombine.high %v1830_v45, %v1830_v45  ;;  %v2700_v36 = vmax.f32 %v2052_v43, %v5299_v47  ;;  %v1596_v15 = vpop.f32.mrf.mxu1  ;;  %v1798_v10 = vpop.f32.mrf.mxu0 }
 0x274   : > { %v2702_v57 = vmax.f32 %v2053_v26, %v5301_v8  ;;  %v2795_v1 = vmax.f32 %v2699_v4, 0.0  ;;  %v3525_v31 = vsel %vm3177_vm13, %v7077_v27, %v3524_v63  ;;  %v2797_v5 = vmax.f32 %v2701_v50, 0.0 }
 0x275   : > { %v3526_v37 = vsel %vm3179_vm14, %v7095_v16, %v3525_v31  ;;  %v3531_v46 = vsel %vm3175_vm12, %v7105_v62, %v3530_v12  ;;  %v2061_v48 = vrot.slane %v1830_v45, %v7044_v30  ;;  %v2796_v14 = vmax.f32 %v2700_v36, 0.0  ;;  %v7355_v63 = vpop.f32.mrf.mxu1  ;;  %v7357_v47 = vpop.f32.mrf.mxu0 }
 0x276   : > { %v2798_v0 = vmax.f32 %v2702_v57, 0.0  ;;  %v7351_v43 = vrot.slane %v2795_v1, %v6961_v18  ;;  %v3527_v26 = vsel %vm3181_vm15, %v7220_v13, %v3526_v37  ;;  %v7360_v8 = vrot.slane %v2797_v5, %v6961_v18 }
 0x277   : > { %v3528_v4 = vsel %vm3183_vm0, %v7317_v60, %v3527_v26  ;;  %v3532_v36 = vsel %vm3177_vm13, %v7118_v54, %v3531_v46  ;;  %v2068_v45 = vrot.slane %v2054_v20, %v7044_v30  ;;  %v7368_v1 = vrot.slane %v2796_v14, %v6961_v18  ;;  %v1599_v5 = vpop.f32.mrf.mxu1  ;;  %v1801_v57 = vpop.f32.mrf.mxu0  ;;  %v6058_v20 = vld [vmem:[%s8530_s4 + $0x70] sm:$0xff]  }
 0x278   : > { %v7371_v37 = vrot.slane %v2798_v0, %v6961_v18  ;;  %v3533_v50 = vsel %vm3179_vm14, %v7149_v58, %v3532_v36  ;;  %v2069_v12 = vcombine.high %v2061_v48, %v2061_v48  ;;  %v5302_v10 = vrot.slane %v2061_v48, 9  ;;  %v6059_v14 = vld [vmem:[%s8530_s4 + $0x30] sm:$0xff]   ;;  %v6060_v0 = vld [vmem:[%s8530_s4 + $0x68] sm:$0xff]   ;;  %5470 = vmatprep.subr.bf16.mxu1 %v6058_v20 }
 0x279   : > { %v3534_v31 = vsel %vm3181_vm15, %v7237_v55, %v3533_v50  ;;  %v2070_v15 = vcombine.high %v2068_v45, %v2068_v45  ;;  %v5304_v46 = vrot.slane %v2068_v45, 9  ;;  %v1831_v50 = vmax.f32 %v7168_v52, %v7170_v28  ;;  %v7392_v57 = vpop.f32.mrf.mxu1  ;;  %v7394_v55 = vpop.f32.mrf.mxu0  ;;  %5471 = vmatpush3.bf16.msra.mxu1 %v6059_v14 }
 0x27a   : > { %v3535_v26 = vsel %vm3183_vm0, %v7322_v61, %v3534_v31  ;;  %v5303_v36 = vrot.slane %v2069_v12, 9  ;;  %v1832_v5 = vmax.f32 %v7185_v49, %v7187_v24  ;;  %8606 = vst [vmem:[#allocation31_spill] sm:$0xff] %v7392_v57  ;;  %8607 = vst [vmem:[#allocation32_spill] sm:$0xff] %v7394_v55  ;;  %v2703_v54 = vmax.f32 %v2061_v48, %v5302_v10  ;;  %v6061_v49 = vld [vmem:[%s8530_s4 + $0x28] sm:$0xff]  }
 0x27b   : > { %v5936_v58 = vpack.i.bf16 %v3535_v26, %v3528_v4  ;;  %v5305_v60 = vrot.slane %v2070_v15, 9  ;;  %v7396_v13 = vmax.f32 %v2068_v45, %v5304_v46  ;;  %v2071_v31 = vcombine.high %v1831_v50, %v1831_v50  ;;  %v1604_v52 = vpop.f32.mrf.mxu1  ;;  %v1806_v28 = vpop.f32.mrf.mxu0  ;;  %5472 = vmatprep.subr.bf16.mxu1 %v6060_v0 }
 0x27c   : > { %v7398_v62 = vmax.f32 %v2069_v12, %v5303_v36  ;;  %v2078_v61 = vrot.slane %v1831_v50, %v7044_v30  ;;  %v2088_v16 = vcombine.high %v1832_v5, %v1832_v5  ;;  %v2799_v48 = vmax.f32 %v2703_v54, 0.0  ;;  %v6062_v12 = vld [vmem:[%s8530_s4 + $0x60] sm:$0xff]  }
 0x27d   : > { %5937 = vrot.lane.b32.xlu0 %v5936_v58, %s6201_s17  ;;  %v7405_v24 = vmax.f32 %v2070_v15, %v5305_v60  ;;  %v2095_v45 = vrot.slane %v1832_v5, %v7044_v30  ;;  %v2085_v46 = vrot.slane %v2071_v31, %v7044_v30  ;;  %v7414_v26 = vpop.f32.mrf.mxu1  ;;  %v7416_v58 = vpop.f32.mrf.mxu0  ;;  %5473 = vmatpush3.bf16.msra.mxu1 %v6061_v49  ;;  %v6063_v31 = vld [vmem:[%s8530_s4 + $0x20] sm:$0xff]  }
 0x27e   : > { %v2086_v20 = vcombine.high %v2078_v61, %v2078_v61  ;;  %v5306_v14 = vrot.slane %v2078_v61, 9  ;;  %8609 = vst [vmem:[#allocation34_spill] sm:$0xff] %v7414_v26  ;;  %8610 = vst [vmem:[#allocation35_spill] sm:$0xff] %v7416_v58  ;;  %v7419_v54 = vrot.slane %v2799_v48, %v6961_v18  ;;  %v2102_v60 = vrot.slane %v2088_v16, %v7044_v30  ;;  %v6064_v16 = vld [vmem:[%s8530_s4 + $0x58] sm:$0xff]  }
 0x27f   : > { %8608 = vst [vmem:[#allocation33_spill] sm:$0xff] %v7405_v24  ;;  %v2103_v15 = vcombine.high %v2095_v45, %v2095_v45  ;;  %v5310_v0 = vrot.slane %v2095_v45, 9  ;;  %v2087_v36 = vcombine.high %v2085_v46, %v2085_v46  ;;  %v5308_v5 = vrot.slane %v2085_v46, 9  ;;  %v1809_v28 = vpop.f32.mrf.mxu0  ;;  %v1607_v4 = vpop.f32.mrf.mxu1  ;;  %5474 = vmatprep.subr.bf16.mxu1 %v6062_v12 }
 0x280   : > { %8611 = vst [vmem:[#allocation36_spill] sm:$0xff] %v7419_v54  ;;  %v5307_v50 = vrot.slane %v2086_v20, 9  ;;  %v2707_v52 = vmax.f32 %v2078_v61, %v5306_v14  ;;  %v2104_v10 = vcombine.high %v2102_v60, %v2102_v60  ;;  %v5312_v11 = vrot.slane %v2102_v60, 9 }
 0x281   : > { %v5311_v24 = vrot.slane %v2103_v15, 9  ;;  %v2711_v48 = vmax.f32 %v2095_v45, %v5310_v0  ;;  %v5309_v27 = vrot.slane %v2087_v36, 9  ;;  %v2709_v33 = vmax.f32 %v2085_v46, %v5308_v5  ;;  %v7428_v14 = vpop.f32.mrf.mxu1  ;;  %v7430_v49 = vpop.f32.mrf.mxu0  ;;  %5475 = vmatpush3.bf16.msra.mxu1 %v6063_v31  ;;  %v6065_v46 = vld [vmem:[%s8530_s4 + $0x18] sm:$0xff]  }
 0x282   : > { %v2708_v38 = vmax.f32 %v2086_v20, %v5307_v50  ;;  %v2803_v61 = vmax.f32 %v2707_v52, 0.0  ;;  %8612 = vst [vmem:[#allocation37_spill] sm:$0xff] %v7428_v14  ;;  %8613 = vst [vmem:[#allocation38_spill] sm:$0xff] %v7430_v49  ;;  %v5313_v4 = vrot.slane %v2104_v10, 9  ;;  %v2713_v2 = vmax.f32 %v2102_v60, %v5312_v11  ;;  %5476 = vmatprep.subr.bf16.mxu1 %v6064_v16  ;;  %v6071_v49 = vld [vmem:[%s8530_s4] sm:$0xff]  }
 0x283   : > { %v2712_v28 = vmax.f32 %v2103_v15, %v5311_v24  ;;  %v2807_v26 = vmax.f32 %v2711_v48, 0.0  ;;  %v2710_v58 = vmax.f32 %v2087_v36, %v5309_v27  ;;  %v2805_v45 = vmax.f32 %v2709_v33, 0.0  ;;  %v1612_v0 = vpop.f32.mrf.mxu1  ;;  %v1814_v55 = vpop.f32.mrf.mxu0  ;;  %v6066_v33 = vld [vmem:[%s8530_s4 + $0x50] sm:$0xff]  }
 0x284   : > { %v2804_v57 = vmax.f32 %v2708_v38, 0.0  ;;  %v3046_v12 = vrot.slane %v2803_v61, %v6961_v18  ;;  %v2714_v20 = vmax.f32 %v2104_v10, %v5313_v4  ;;  %v2809_v5 = vmax.f32 %v2713_v2, 0.0  ;;  %v6067_v48 = vld [vmem:[%s8530_s4 + $0x10] sm:$0xff]   ;;  %v6068_v4 = vld [vmem:[%s8530_s4 + $0x48] sm:$0xff]  }
 0x285   : > { %v2808_v50 = vmax.f32 %v2712_v28, 0.0  ;;  %v7437_v52 = vrot.slane %v2807_v26, %v6961_v18  ;;  %v2806_v38 = vmax.f32 %v2710_v58, 0.0  ;;  %v3054_v11 = vrot.slane %v2805_v45, %v6961_v18  ;;  %v7446_v24 = vpop.f32.mrf.mxu1  ;;  %v7448_v10 = vpop.f32.mrf.mxu0  ;;  %5477 = vmatpush3.bf16.msra.mxu1 %v6065_v46 }
 0x286   : > { %v3050_v27 = vrot.slane %v2804_v57, %v6961_v18  ;;  %v1833_v55 = vmax.f32 %v7222_v44, %v7224_v41  ;;  %8614 = vst [vmem:[#allocation39_spill] sm:$0xff] %v7446_v24  ;;  %8615 = vst [vmem:[#allocation40_spill] sm:$0xff] %v7448_v10  ;;  %v2810_v2 = vmax.f32 %v2714_v20, 0.0  ;;  %v7454_v60 = vrot.slane %v2809_v5, %v6961_v18 }
 0x287   : > { %v7451_v26 = vrot.slane %v2808_v50, %v6961_v18  ;;  %v1834_v58 = vmax.f32 %v7251_v32, %v7253_v34  ;;  %v7459_v57 = vrot.slane %v2806_v38, %v6961_v18  ;;  %v1615_v36 = vpop.f32.mrf.mxu1  ;;  %v1817_v31 = vpop.f32.mrf.mxu0  ;;  %5478 = vmatprep.subr.bf16.mxu1 %v6066_v33  ;;  %v3297_v0 = vsel %vm3173_vm11, %v7160_v59, %v7166_v9 }
 0x288   : > { %v3206_v15 = vsel %vm3171_vm10, %v3050_v27, %v3046_v12  ;;  %v7463_v44 = vsel %vm3171_vm10, %v3054_v11, %v3050_v27  ;;  %v2105_v41 = vcombine.high %v1833_v55, %v1833_v55  ;;  %v7472_v32 = vrot.slane %v2810_v2, %v6961_v18 }
 0x289   : > { %8616 = vst [vmem:[#allocation41_spill] sm:$0xff] %v7459_v57  ;;  %v7469_v16 = vsel %vm3173_vm11, %v3054_v11, %v3206_v15  ;;  %v2112_v34 = vrot.slane %v1833_v55, %v7044_v30  ;;  %v2122_v61 = vcombine.high %v1834_v58, %v1834_v58  ;;  %v7480_v28 = vsel %vm3171_vm10, %v7459_v57, %v3054_v11  ;;  %v6069_v55 = vld [vmem:[%s8530_s4 + $0x8] sm:$0xff]  }
 0x28a   : > { %8617 = vst [vmem:[#allocation42_spill] sm:$0xff] %v7469_v16  ;;  %v2119_v45 = vrot.slane %v2105_v41, %v7044_v30  ;;  %v2129_v12 = vrot.slane %v1834_v58, %v7044_v30  ;;  %v3298_v5 = vsel %vm3175_vm12, %v7180_v39, %v3297_v0  ;;  %5479 = vmatpush3.bf16.msra.mxu1 %v6067_v48  ;;  %v6070_v41 = vld [vmem:[%s8530_s4 + $0x40] sm:$0xff]  }
 0x28b   : > { %v2120_v46 = vcombine.high %v2112_v34, %v2112_v34  ;;  %v5314_v20 = vrot.slane %v2112_v34, 9  ;;  %v2136_v50 = vrot.slane %v2122_v61, %v7044_v30  ;;  %5480 = vmatprep.subr.bf16.mxu1 %v6068_v4 }
 0x28c   : > { %v2121_v33 = vcombine.high %v2119_v45, %v2119_v45  ;;  %v5316_v38 = vrot.slane %v2119_v45, 9  ;;  %v2137_v27 = vcombine.high %v2129_v12, %v2129_v12  ;;  %v5318_v11 = vrot.slane %v2129_v12, 9 }
 0x28d   : > { %v5315_v2 = vrot.slane %v2120_v46, 9  ;;  %v2715_v58 = vmax.f32 %v2112_v34, %v5314_v20  ;;  %v2138_v15 = vcombine.high %v2136_v50, %v2136_v50  ;;  %v5320_v9 = vrot.slane %v2136_v50, 9 }
 0x28e   : > { %v5317_v36 = vrot.slane %v2121_v33, 9  ;;  %v7496_v31 = vmax.f32 %v2119_v45, %v5316_v38  ;;  %v5319_v61 = vrot.slane %v2137_v27, 9  ;;  %v2719_v0 = vmax.f32 %v2129_v12, %v5318_v11  ;;  %5481 = vmatpush3.bf16.msra.mxu1 %v6069_v55 }
 0x28f   : > { %v7498_v16 = vmax.f32 %v2120_v46, %v5315_v2  ;;  %v2811_v48 = vmax.f32 %v2715_v58, 0.0  ;;  %v5321_v24 = vrot.slane %v2138_v15, 9  ;;  %v2721_v10 = vmax.f32 %v2136_v50, %v5320_v9  ;;  %5482 = vmatprep.subr.bf16.mxu1 %v6070_v41 }
 0x290   : > { %v7500_v14 = vmax.f32 %v2121_v33, %v5317_v36  ;;  %v2720_v20 = vmax.f32 %v2137_v27, %v5319_v61  ;;  %v2815_v4 = vmax.f32 %v2719_v0, 0.0  ;;  %v3299_v27 = vsel %vm3177_vm13, %v7183_v29, %v3298_v5 }
 0x291   : > { %v7508_v12 = vrot.slane %v2811_v48, %v6961_v18  ;;  %v2722_v46 = vmax.f32 %v2138_v15, %v5321_v24  ;;  %v2817_v38 = vmax.f32 %v2721_v10, 0.0  ;;  %v3304_v11 = vsel %vm3173_vm11, %v7288_v53, %v7292_v23 }
 0x292   : > { %v2816_v50 = vmax.f32 %v2720_v20, 0.0  ;;  %v3078_v33 = vrot.slane %v2815_v4, %v6961_v18  ;;  %v3300_v58 = vsel %vm3179_vm14, %v7190_v22, %v3299_v27  ;;  %v3305_v24 = vsel %vm3175_vm12, %v7351_v43, %v3304_v11  ;;  %5483 = vmatpush3.bf16.msra.mxu1 %v6071_v49 }
 0x293   : > { %v2818_v55 = vmax.f32 %v2722_v46, 0.0  ;;  %v3086_v2 = vrot.slane %v2817_v38, %v6961_v18  ;;  %v3301_v15 = vsel %vm3181_vm15, %v7197_v40, %v3300_v58  ;;  %v3306_v5 = vsel %vm3177_vm13, %v7368_v1, %v3305_v24 }
 0x294   : > { %v3082_v10 = vrot.slane %v2816_v50, %v6961_v18  ;;  %v8618_v23 = vmax.f32 %v7199_v56, 0.0  ;;  %v3302_v36 = vsel %vm3183_vm0, %v7227_v6, %v3301_v15  ;;  %v3307_v61 = vsel %vm3179_vm14, %v7360_v8, %v3306_v5 }
 0x295   : > { %v7532_v41 = vrot.slane %v2818_v55, %v6961_v18  ;;  %v8621_v0 = vmax.f32 %v7398_v62, 0.0  ;;  %v3308_v49 = vsel %vm3181_vm15, %v7371_v37, %v3307_v61  ;;  %v3417_v4 = vsel %vm3173_vm11, %v7180_v39, %v7177_v3 }
 0x296   : > { %v7529_v9 = vrot.slane %v8618_v23, %v6961_v18  ;;  %v3213_v20 = vsel %vm3171_vm10, %v3082_v10, %v3078_v33  ;;  %v7545_v56 = vsel %vm3171_vm10, %v3086_v2, %v3082_v10  ;;  %v3309_v38 = vsel %vm3183_vm0, %v7419_v54, %v3308_v49 }
 0x297   : > { %8620 = vst [vmem:[#allocation44_spill] sm:$0xff] %v7532_v41  ;;  %v7541_v48 = vrot.slane %v8621_v0, %v6961_v18  ;;  %v7553_v46 = vsel %vm3173_vm11, %v3086_v2, %v3213_v20  ;;  %v7557_v62 = vsel %vm3171_vm10, %v7532_v41, %v3086_v2  ;;  %v3418_v50 = vsel %vm3175_vm12, %v7183_v29, %v3417_v4 }
 0x298   : > { %8619 = vst [vmem:[#allocation43_spill] sm:$0xff] %v7529_v9  ;;  %8623 = vst [vmem:[#allocation46_spill] sm:$0xff] %v7553_v46  ;;  %v5941_v33 = vpack.i.bf16 %v3309_v38, %v3302_v36  ;;  %v3419_v27 = vsel %vm3177_vm13, %v7190_v22, %v3418_v50  ;;  %v3424_v3 = vsel %vm3173_vm11, %v7351_v43, %v7310_v42  ;;  %v8624_v58 = vmax.f32 %v7192_v19, 0.0 }
 0x299   : > { %8622 = vst [vmem:[#allocation45_spill] sm:$0xff] %v7541_v48  ;;  %v1835_v11 = vmax.f32 %v7275_v35, %v7277_v17  ;;  %v3420_v55 = vsel %vm3179_vm14, %v7197_v40, %v3419_v27  ;;  %v3425_v2 = vsel %vm3175_vm12, %v7368_v1, %v3424_v3  ;;  %v8626_v10 = vmax.f32 %v7396_v13, 0.0 }
 0x29a   : > { %v7577_v24 = vrot.slane %v8624_v58, %v6961_v18  ;;  %5942 = vrot.lane.b32.xlu1 %v5941_v33, %s6199_s28  ;;  %v3421_v35 = vsel %vm3181_vm15, %v7227_v6, %v3420_v55  ;;  %v3426_v17 = vsel %vm3177_vm13, %v7360_v8, %v3425_v2  ;;  %v3536_v13 = vsel %vm3171_vm10, %v7180_v39, %v7160_v59 }
 0x29b   : > { %v7582_v15 = vrot.slane %v8626_v10, %v6961_v18  ;;  %v2139_v42 = vcombine.high %v1835_v11, %v1835_v11  ;;  %v2146_v5 = vrot.slane %v1835_v11, %v7044_v30  ;;  %v3422_v19 = vsel %vm3183_vm0, %v7529_v9, %v3421_v35 }
 0x29c   : > { %8625 = vst [vmem:[#allocation47_spill] sm:$0xff] %v7577_v24  ;;  %v3427_v23 = vsel %vm3179_vm14, %v7371_v37, %v3426_v17  ;;  %v3543_v36 = vsel %vm3171_vm10, %v7351_v43, %v7288_v53  ;;  %v3537_v38 = vsel %vm3173_vm11, %v7183_v29, %v3536_v13  ;;  %v1836_v33 = vmax.f32 %v7304_v7, %v7306_v21 }
 0x29d   : > { %8627 = vst [vmem:[#allocation48_spill] sm:$0xff] %v7582_v15  ;;  %v3428_v61 = vsel %vm3181_vm15, %v7419_v54, %v3427_v23  ;;  %v2153_v0 = vrot.slane %v2139_v42, %v7044_v30  ;;  %v2154_v20 = vcombine.high %v2146_v5, %v2146_v5  ;;  %v5322_v49 = vrot.slane %v2146_v5, 9 }
 0x29e   : > { %v3429_v4 = vsel %vm3183_vm0, %v7541_v48, %v3428_v61  ;;  %v3544_v50 = vsel %vm3173_vm11, %v7368_v1, %v3543_v36  ;;  %v3538_v58 = vsel %vm3175_vm12, %v7190_v22, %v3537_v38  ;;  %v2156_v35 = vcombine.high %v1836_v33, %v1836_v33 }
 0x29f   : > { %v5946_v27 = vpack.i.bf16 %v3429_v4, %v3422_v19  ;;  %v2155_v3 = vcombine.high %v2153_v0, %v2153_v0  ;;  %v5323_v11 = vrot.slane %v2154_v20, 9  ;;  %v5324_v55 = vrot.slane %v2153_v0, 9 }
 0x2a0   : > { %v2723_v2 = vmax.f32 %v2146_v5, %v5322_v49  ;;  %v3545_v10 = vsel %vm3175_vm12, %v7360_v8, %v3544_v50  ;;  %v3539_v7 = vsel %vm3177_vm13, %v7197_v40, %v3538_v58  ;;  %v2163_v13 = vrot.slane %v1836_v33, %v7044_v30 }
 0x2a1   : > { %5947 = vrot.lane.b32.xlu0 %v5946_v27, %s6200_s29  ;;  %v5325_v17 = vrot.slane %v2155_v3, 9  ;;  %v2724_v42 = vmax.f32 %v2154_v20, %v5323_v11  ;;  %v2725_v23 = vmax.f32 %v2153_v0, %v5324_v55  ;;  %v3540_v19 = vsel %vm3179_vm14, %v7227_v6, %v3539_v7 }
 0x2a2   : > { %v2819_v21 = vmax.f32 %v2723_v2, 0.0  ;;  %v3546_v5 = vsel %vm3177_vm13, %v7371_v37, %v3545_v10  ;;  %v3541_v4 = vsel %vm3181_vm15, %v7529_v9, %v3540_v19  ;;  %v2170_v50 = vrot.slane %v2156_v35, %v7044_v30 }
 0x2a3   : > { %v2726_v36 = vmax.f32 %v2155_v3, %v5325_v17  ;;  %v2820_v61 = vmax.f32 %v2724_v42, 0.0  ;;  %v2821_v49 = vmax.f32 %v2725_v23, 0.0  ;;  %v3542_v20 = vsel %vm3183_vm0, %v7577_v24, %v3541_v4  ;;  %v8628_v4 = vld [vmem:[#allocation32_spill] sm:$0xff] }
 0x2a4   : > { %v7626_v0 = vrot.slane %v2819_v21, %v6961_v18  ;;  %v3547_v38 = vsel %vm3179_vm14, %v7419_v54, %v3546_v5  ;;  %v2171_v2 = vcombine.high %v2163_v13, %v2163_v13  ;;  %v2172_v58 = vcombine.high %v2170_v50, %v2170_v50 }
 0x2a5   : > { %v2822_v27 = vmax.f32 %v2726_v36, 0.0  ;;  %v7634_v33 = vrot.slane %v2820_v61, %v6961_v18  ;;  %v7637_v3 = vrot.slane %v2821_v49, %v6961_v18  ;;  %v3548_v11 = vsel %vm3181_vm15, %v7541_v48, %v3547_v38  ;;  %v8629_v38 = vld [vmem:[#allocation31_spill] sm:$0xff] }
 0x2a6   : > { %v3549_v55 = vsel %vm3183_vm0, %v7582_v15, %v3548_v11  ;;  %v5326_v10 = vrot.slane %v2163_v13, 9  ;;  %v5328_v42 = vrot.slane %v2170_v50, 9  ;;  %v1837_v23 = vmax.f32 %v7335_v25, %v7337_v51 }
 0x2a7   : > { %v7644_v17 = vrot.slane %v2822_v27, %v6961_v18  ;;  %v5951_v35 = vpack.i.bf16 %v3549_v55, %v3542_v20  ;;  %v5327_v7 = vrot.slane %v2171_v2, 9  ;;  %v5329_v21 = vrot.slane %v2172_v58, 9 }
 0x2a8   : > { %v2727_v19 = vmax.f32 %v2163_v13, %v5326_v10  ;;  %v1838_v5 = vmax.f32 %v7355_v63, %v7357_v47  ;;  %v7651_v36 = vmax.f32 %v2170_v50, %v5328_v42  ;;  %v2173_v61 = vcombine.high %v1837_v23, %v1837_v23 }
 0x2a9   : > { %5952 = vrot.lane.b32.xlu1 %v5951_v35, %s6201_s17  ;;  %v2180_v49 = vrot.slane %v1837_v23, %v7044_v30  ;;  %v1839_v20 = vmax.f32 %v8629_v38, %v8628_v4  ;;  %v7656_v27 = vmax.f32 %v2171_v2, %v5327_v7  ;;  %v7658_v11 = vmax.f32 %v2172_v58, %v5329_v21 }
 0x2aa   : > { %v2823_v25 = vmax.f32 %v2727_v19, 0.0  ;;  %v2190_v51 = vcombine.high %v1838_v5, %v1838_v5  ;;  %v2187_v63 = vrot.slane %v2173_v61, %v7044_v30  ;;  %v2197_v35 = vrot.slane %v1838_v5, %v7044_v30 }
 0x2ab   : > { %v2188_v47 = vcombine.high %v2180_v49, %v2180_v49  ;;  %v5330_v55 = vrot.slane %v2180_v49, 9 }
 0x2ac   : > { %v7664_v10 = vrot.slane %v2823_v25, %v6961_v18  ;;  %v2204_v2 = vrot.slane %v2190_v51, %v7044_v30  ;;  %v2189_v42 = vcombine.high %v2187_v63, %v2187_v63  ;;  %v5332_v23 = vrot.slane %v2187_v63, 9 }
 0x2ad   : > { %v5331_v58 = vrot.slane %v2188_v47, 9  ;;  %v2731_v7 = vmax.f32 %v2180_v49, %v5330_v55  ;;  %v2205_v21 = vcombine.high %v2197_v35, %v2197_v35  ;;  %v5334_v4 = vrot.slane %v2197_v35, 9 }
 0x2ae   : > { %v2206_v19 = vcombine.high %v2204_v2, %v2204_v2  ;;  %v5336_v38 = vrot.slane %v2204_v2, 9  ;;  %v5333_v61 = vrot.slane %v2189_v42, 9  ;;  %v2733_v34 = vmax.f32 %v2187_v63, %v5332_v23 }
 0x2af   : > { %v2732_v13 = vmax.f32 %v2188_v47, %v5331_v58  ;;  %v2827_v45 = vmax.f32 %v2731_v7, 0.0  ;;  %v5335_v50 = vrot.slane %v2205_v21, 9  ;;  %v2735_v25 = vmax.f32 %v2197_v35, %v5334_v4 }
 0x2b0   : > { %v5337_v46 = vrot.slane %v2206_v19, 9  ;;  %v2737_v53 = vmax.f32 %v2204_v2, %v5336_v38  ;;  %v2734_v59 = vmax.f32 %v2189_v42, %v5333_v61  ;;  %v2829_v15 = vmax.f32 %v2733_v34, 0.0  ;;  %v8632_v2 = vld [vmem:[#allocation35_spill] sm:$0xff]  ;;  %v8633_v42 = vld [vmem:[#allocation34_spill] sm:$0xff] }
 0x2b1   : > { %v2828_v5 = vmax.f32 %v2732_v13, 0.0  ;;  %v3110_v51 = vrot.slane %v2827_v45, %v6961_v18  ;;  %v2736_v48 = vmax.f32 %v2205_v21, %v5335_v50  ;;  %v2831_v49 = vmax.f32 %v2735_v25, 0.0 }
 0x2b2   : > { %v2738_v24 = vmax.f32 %v2206_v19, %v5337_v46  ;;  %v2833_v55 = vmax.f32 %v2737_v53, 0.0  ;;  %v2830_v54 = vmax.f32 %v2734_v59, 0.0  ;;  %v3118_v47 = vrot.slane %v2829_v15, %v6961_v18 }
 0x2b3   : > { %v3114_v9 = vrot.slane %v2828_v5, %v6961_v18  ;;  %v2207_v63 = vcombine.high %v1839_v20, %v1839_v20  ;;  %v2832_v58 = vmax.f32 %v2736_v48, 0.0  ;;  %v7672_v35 = vrot.slane %v2831_v49, %v6961_v18 }
 0x2b4   : > { %v2834_v23 = vmax.f32 %v2738_v24, 0.0  ;;  %v7675_v13 = vrot.slane %v2833_v55, %v6961_v18  ;;  %v7678_v34 = vrot.slane %v2830_v54, %v6961_v18  ;;  %v2214_v53 = vrot.slane %v1839_v20, %v7044_v30 }
 0x2b5   : > { %v3220_v45 = vsel %vm3171_vm10, %v3114_v9, %v3110_v51  ;;  %v7682_v59 = vsel %vm3171_vm10, %v3118_v47, %v3114_v9  ;;  %v7689_v48 = vrot.slane %v2832_v58, %v6961_v18  ;;  %v2221_v15 = vrot.slane %v2207_v63, %v7044_v30 }
 0x2b6   : > { %8630 = vst [vmem:[#allocation32_spill] sm:$0xff] %v7678_v34  ;;  %v7686_v46 = vsel %vm3173_vm11, %v3118_v47, %v3220_v45  ;;  %v7692_v24 = vrot.slane %v2834_v23, %v6961_v18  ;;  %v7697_v54 = vsel %vm3171_vm10, %v7678_v34, %v3118_v47  ;;  %v2222_v50 = vcombine.high %v2214_v53, %v2214_v53 }
 0x2b7   : > { %8631 = vst [vmem:[#allocation31_spill] sm:$0xff] %v7686_v46  ;;  %v5338_v9 = vrot.slane %v2214_v53, 9  ;;  %v1840_v20 = vmax.f32 %v8633_v42, %v8632_v2  ;;  %v2223_v7 = vcombine.high %v2221_v15, %v2221_v15  ;;  %v5340_v21 = vrot.slane %v2221_v15, 9 }
 0x2b8   : > { %v3311_v19 = vsel %vm3173_vm11, %v7459_v57, %v7463_v44  ;;  %v3318_v4 = vsel %vm3173_vm11, %v7532_v41, %v7545_v56  ;;  %v5339_v38 = vrot.slane %v2222_v50, 9 }
 0x2b9   : > { %v2739_v61 = vmax.f32 %v2214_v53, %v5338_v9  ;;  %v2224_v25 = vcombine.high %v1840_v20, %v1840_v20  ;;  %v2231_v5 = vrot.slane %v1840_v20, %v7044_v30  ;;  %v5341_v51 = vrot.slane %v2223_v7, 9 }
 0x2ba   : > { %v7708_v49 = vmax.f32 %v2221_v15, %v5340_v21  ;;  %v3312_v55 = vsel %vm3175_vm12, %v7437_v52, %v3311_v19  ;;  %v3319_v47 = vsel %vm3175_vm12, %v7626_v0, %v3318_v4  ;;  %v7714_v63 = vmax.f32 %v2222_v50, %v5339_v38 }
 0x2bb   : > { %v2835_v44 = vmax.f32 %v2739_v61, 0.0  ;;  %v2238_v58 = vrot.slane %v2224_v25, %v7044_v30  ;;  %v2239_v56 = vcombine.high %v2231_v5, %v2231_v5  ;;  %v7717_v23 = vmax.f32 %v2223_v7, %v5341_v51 }
 0x2bc   : > { %v5342_v53 = vrot.slane %v2231_v5, 9  ;;  %v3313_v15 = vsel %vm3177_vm13, %v7451_v26, %v3312_v55  ;;  %v3320_v7 = vsel %vm3177_vm13, %v7634_v33, %v3319_v47 }
 0x2bd   : > { %v7724_v2 = vrot.slane %v2835_v44, %v6961_v18  ;;  %v2240_v42 = vcombine.high %v2238_v58, %v2238_v58  ;;  %v5343_v50 = vrot.slane %v2239_v56, 9  ;;  %v5344_v20 = vrot.slane %v2238_v58, 9 }
 0x2be   : > { %v2743_v21 = vmax.f32 %v2231_v5, %v5342_v53  ;;  %v3314_v19 = vsel %vm3179_vm14, %v7454_v60, %v3313_v15  ;;  %v3321_v25 = vsel %vm3179_vm14, %v7637_v3, %v3320_v7 }
 0x2bf   : > { %v5345_v4 = vrot.slane %v2240_v42, 9  ;;  %v2744_v38 = vmax.f32 %v2239_v56, %v5343_v50  ;;  %v3315_v61 = vsel %vm3181_vm15, %v7472_v32, %v3314_v19  ;;  %v2745_v51 = vmax.f32 %v2238_v58, %v5344_v20 }
 0x2c0   : > { %v2839_v55 = vmax.f32 %v2743_v21, 0.0  ;;  %v3316_v44 = vsel %vm3183_vm0, %v7508_v12, %v3315_v61  ;;  %v3322_v5 = vsel %vm3181_vm15, %v7644_v17, %v3321_v25  ;;  %v8634_v56 = vmax.f32 %v7498_v16, 0.0 }
 0x2c1   : > { %v2746_v53 = vmax.f32 %v2240_v42, %v5345_v4  ;;  %v2840_v15 = vmax.f32 %v2744_v38, 0.0  ;;  %v3323_v47 = vsel %vm3183_vm0, %v7664_v10, %v3322_v5  ;;  %v2841_v19 = vmax.f32 %v2745_v51, 0.0  ;;  %v8636_v51 = vld [vmem:[#allocation38_spill] sm:$0xff] }
 0x2c2   : > { %v7743_v50 = vrot.slane %v8634_v56, %v6961_v18  ;;  %v3142_v58 = vrot.slane %v2839_v55, %v6961_v18  ;;  %v5956_v20 = vpack.i.bf16 %v3323_v47, %v3316_v44  ;;  %v8635_v21 = vmax.f32 %v7656_v27, 0.0  ;;  %v8637_v55 = vld [vmem:[#allocation37_spill] sm:$0xff] }
 0x2c3   : > { %v2842_v61 = vmax.f32 %v2746_v53, 0.0  ;;  %v3146_v42 = vrot.slane %v2840_v15, %v6961_v18  ;;  %v3431_v4 = vsel %vm3173_vm11, %v7437_v52, %v7480_v28  ;;  %v3438_v16 = vsel %vm3173_vm11, %v7626_v0, %v7557_v62 }
 0x2c4   : > { %v7749_v7 = vrot.slane %v8635_v21, %v6961_v18  ;;  %v3150_v38 = vrot.slane %v2841_v19, %v6961_v18  ;;  %5957 = vrot.lane.b32.xlu0 %v5956_v20, %s6199_s28  ;;  %v3432_v27 = vsel %vm3175_vm12, %v7451_v26, %v3431_v4  ;;  %v3439_v25 = vsel %vm3175_vm12, %v7634_v33, %v3438_v16 }
 0x2c5   : > { %v1841_v44 = vmax.f32 %v8637_v55, %v8636_v51  ;;  %v7767_v5 = vrot.slane %v2842_v61, %v6961_v18  ;;  %v3227_v28 = vsel %vm3171_vm10, %v3146_v42, %v3142_v58  ;;  %v3433_v62 = vsel %vm3177_vm13, %v7454_v60, %v3432_v27 }
 0x2c6   : > { %v3440_v53 = vsel %vm3177_vm13, %v7637_v3, %v3439_v25  ;;  %v7775_v15 = vsel %vm3173_vm11, %v3150_v38, %v3227_v28  ;;  %v3331_v47 = vsel %vm3171_vm10, %v3150_v38, %v3146_v42  ;;  %v3434_v56 = vsel %vm3179_vm14, %v7472_v32, %v3433_v62 }
 0x2c7   : > { %8638 = vst [vmem:[#allocation35_spill] sm:$0xff] %v7767_v5  ;;  %8639 = vst [vmem:[#allocation34_spill] sm:$0xff] %v7775_v15  ;;  %v3441_v19 = vsel %vm3179_vm14, %v7644_v17, %v3440_v53  ;;  %v7784_v58 = vsel %vm3171_vm10, %v7767_v5, %v3150_v38  ;;  %v3435_v20 = vsel %vm3181_vm15, %v7508_v12, %v3434_v56  ;;  %v8640_v27 = vmax.f32 %v7496_v31, 0.0 }
 0x2c8   : > { %v3442_v21 = vsel %vm3181_vm15, %v7664_v10, %v3441_v19  ;;  %v2241_v61 = vcombine.high %v1841_v44, %v1841_v44  ;;  %v3436_v42 = vsel %vm3183_vm0, %v7743_v50, %v3435_v20  ;;  %v2248_v16 = vrot.slane %v1841_v44, %v7044_v30 }
 0x2c9   : > { %v3443_v4 = vsel %vm3183_vm0, %v7749_v7, %v3442_v21  ;;  %v7798_v38 = vrot.slane %v8640_v27, %v6961_v18  ;;  %v8641_v55 = vmax.f32 %v7651_v36, 0.0  ;;  %v3550_v62 = vsel %vm3171_vm10, %v7437_v52, %v7459_v57  ;;  %v8660_v57 = vld [vmem:[#allocation25_spill] sm:$0xff] }
 0x2ca   : > { %v5961_v25 = vpack.i.bf16 %v3443_v4, %v3436_v42  ;;  %v2255_v51 = vrot.slane %v2241_v61, %v7044_v30  ;;  %v2256_v53 = vcombine.high %v2248_v16, %v2248_v16  ;;  %v5346_v56 = vrot.slane %v2248_v16, 9  ;;  %v7822_v61 = vld [vmem:[%s8530_s4 + $0xb0] ss:$0 sps:$4 sm:$0xff]  }
 0x2cb   : > { %v7804_v28 = vrot.slane %v8641_v55, %v6961_v18  ;;  %v3551_v44 = vsel %vm3173_vm11, %v7451_v26, %v3550_v62  ;;  %v3557_v31 = vsel %vm3171_vm10, %v7626_v0, %v7532_v41  ;;  %8642 = vst [vmem:[#allocation38_spill] sm:$0xff] %v7822_v61  ;;  %5635 = vmatprep.subr.msk.bf16.mxu1 %vm788_vm3, %v7822_v61 }
 0x2cc   : > { %5962 = vrot.lane.b32.xlu1 %v5961_v25, %s6200_s29  ;;  %v2257_v19 = vcombine.high %v2255_v51, %v2255_v51  ;;  %v5348_v20 = vrot.slane %v2255_v51, 9  ;;  %v3552_v36 = vsel %vm3175_vm12, %v7454_v60, %v3551_v44  ;;  %v3558_v21 = vsel %vm3173_vm11, %v7634_v33, %v3557_v31 }
 0x2cd   : > { %v5347_v42 = vrot.slane %v2256_v53, 9  ;;  %v2747_v4 = vmax.f32 %v2248_v16, %v5346_v56  ;;  %v3553_v27 = vsel %vm3177_vm13, %v7472_v32, %v3552_v36  ;;  %v3559_v25 = vsel %vm3175_vm12, %v7637_v3, %v3558_v21 }
 0x2ce   : > { %v5349_v55 = vrot.slane %v2257_v19, 9  ;;  %v2749_v62 = vmax.f32 %v2255_v51, %v5348_v20  ;;  %v3554_v44 = vsel %vm3179_vm14, %v7508_v12, %v3553_v27  ;;  %v3560_v31 = vsel %vm3177_vm13, %v7644_v17, %v3559_v25 }
 0x2cf   : > { %v2748_v45 = vmax.f32 %v2256_v53, %v5347_v42  ;;  %v2843_v9 = vmax.f32 %v2747_v4, 0.0  ;;  %v3555_v16 = vsel %vm3181_vm15, %v7743_v50, %v3554_v44  ;;  %v3561_v56 = vsel %vm3179_vm14, %v7664_v10, %v3560_v31  ;;  %v8643_v42 = vld [vmem:[#allocation40_spill] sm:$0xff]  ;;  %v8644_v4 = vld [vmem:[#allocation39_spill] sm:$0xff] }
 0x2d0   : > { %v2750_v36 = vmax.f32 %v2257_v19, %v5349_v55  ;;  %v2845_v21 = vmax.f32 %v2749_v62, 0.0  ;;  %v3556_v51 = vsel %vm3183_vm0, %v7798_v38, %v3555_v16  ;;  %v3562_v20 = vsel %vm3181_vm15, %v7749_v7, %v3561_v56 }
 0x2d1   : > { %v2844_v27 = vmax.f32 %v2748_v45, 0.0  ;;  %v7843_v25 = vrot.slane %v2843_v9, %v6961_v18  ;;  %v3563_v53 = vsel %vm3183_vm0, %v7804_v28, %v3562_v20  ;;  %v1842_v44 = vmax.f32 %v8644_v4, %v8643_v42 }
 0x2d2   : > { %v2846_v41 = vmax.f32 %v2750_v36, 0.0  ;;  %v7850_v19 = vrot.slane %v2845_v21, %v6961_v18  ;;  %v5966_v55 = vpack.i.bf16 %v3563_v53, %v3556_v51  ;;  %v3325_v62 = vsel %vm3173_vm11, %v7678_v34, %v7682_v59 }
 0x2d3   : > { %v7856_v45 = vrot.slane %v2844_v27, %v6961_v18  ;;  %v2258_v9 = vcombine.high %v1842_v44, %v1842_v44  ;;  %v2265_v31 = vrot.slane %v1842_v44, %v7044_v30  ;;  %v3326_v16 = vsel %vm3175_vm12, %v7672_v35, %v3325_v62 }
 0x2d4   : > { %v7862_v56 = vrot.slane %v2846_v41, %v6961_v18  ;;  %5967 = vrot.lane.b32.xlu0 %v5966_v55, %s6201_s17  ;;  %v3327_v36 = vsel %vm3177_vm13, %v7689_v48, %v3326_v16  ;;  %v3332_v59 = vsel %vm3173_vm11, %v7767_v5, %v3331_v47  ;;  %v8645_v21 = vmax.f32 %v7714_v63, 0.0 }
 0x2d5   : > { %v2272_v20 = vrot.slane %v2258_v9, %v7044_v30  ;;  %v2273_v27 = vcombine.high %v2265_v31, %v2265_v31  ;;  %v5350_v53 = vrot.slane %v2265_v31, 9  ;;  %v3328_v41 = vsel %vm3179_vm14, %v7675_v13, %v3327_v36 }
 0x2d6   : > { %v7872_v51 = vrot.slane %v8645_v21, %v6961_v18  ;;  %v3329_v42 = vsel %vm3181_vm15, %v7692_v24, %v3328_v41  ;;  %v3333_v4 = vsel %vm3175_vm12, %v7843_v25, %v3332_v59  ;;  %v3445_v47 = vsel %vm3173_vm11, %v7672_v35, %v7697_v54 }
 0x2d7   : > { %v3452_v63 = vsel %vm3173_vm11, %v7843_v25, %v7784_v58  ;;  %v2274_v44 = vcombine.high %v2272_v20, %v2272_v20  ;;  %v5351_v55 = vrot.slane %v2273_v27, 9  ;;  %v5352_v62 = vrot.slane %v2272_v20, 9 }
 0x2d8   : > { %v2751_v9 = vmax.f32 %v2265_v31, %v5350_v53  ;;  %v3330_v16 = vsel %vm3183_vm0, %v7724_v2, %v3329_v42  ;;  %v3334_v36 = vsel %vm3177_vm13, %v7856_v45, %v3333_v4  ;;  %v3446_v59 = vsel %vm3175_vm12, %v7689_v48, %v3445_v47 }
 0x2d9   : > { %v3453_v54 = vsel %vm3175_vm12, %v7856_v45, %v3452_v63  ;;  %v5353_v21 = vrot.slane %v2274_v44, 9  ;;  %v2752_v41 = vmax.f32 %v2273_v27, %v5351_v55  ;;  %v2753_v30 = vmax.f32 %v2272_v20, %v5352_v62 }
 0x2da   : > { %v2847_v58 = vmax.f32 %v2751_v9, 0.0  ;;  %v3335_v15 = vsel %vm3179_vm14, %v7850_v19, %v3334_v36  ;;  %v3447_v31 = vsel %vm3177_vm13, %v7675_v13, %v3446_v59  ;;  %v3454_v53 = vsel %vm3177_vm13, %v7850_v19, %v3453_v54 }
 0x2db   : > { %v8646_v42 = vmax.f32 %v7708_v49, 0.0  ;;  %v7906_v47 = vmax.f32 %v2274_v44, %v5353_v21  ;;  %v2848_v63 = vmax.f32 %v2752_v41, 0.0  ;;  %v2849_v27 = vmax.f32 %v2753_v30, 0.0 }
 0x2dc   : > { %v7909_v20 = vrot.slane %v2847_v58, %v6961_v18  ;;  %v3336_v55 = vsel %vm3181_vm15, %v7862_v56, %v3335_v15  ;;  %v3448_v62 = vsel %vm3179_vm14, %v7692_v24, %v3447_v31  ;;  %v3455_v9 = vsel %vm3179_vm14, %v7862_v56, %v3454_v53 }
 0x2dd   : > { %v7904_v4 = vrot.slane %v8646_v42, %v6961_v18  ;;  %v3564_v49 = vsel %vm3171_vm10, %v7672_v35, %v7678_v34  ;;  %v7923_v30 = vrot.slane %v2848_v63, %v6961_v18  ;;  %v3449_v36 = vsel %vm3181_vm15, %v7724_v2, %v3448_v62  ;;  %v8650_v62 = vld [vmem:[#allocation20_spill] sm:$0xff] }
 0x2de   : > { %v3337_v44 = vsel %vm3183_vm0, %v7909_v20, %v3336_v55  ;;  %v3456_v15 = vsel %vm3181_vm15, %v7909_v20, %v3455_v9  ;;  %v3450_v54 = vsel %vm3183_vm0, %v7872_v51, %v3449_v36  ;;  %v7932_v21 = vrot.slane %v2849_v27, %v6961_v18 }
 0x2df   : > { %8647 = vst [vmem:[#allocation37_spill] sm:$0xff] %v7923_v30  ;;  %v5971_v59 = vpack.i.bf16 %v3337_v44, %v3330_v16  ;;  %v3565_v41 = vsel %vm3173_vm11, %v7689_v48, %v3564_v49  ;;  %v3457_v58 = vsel %vm3183_vm0, %v7923_v30, %v3456_v15  ;;  %v3571_v53 = vsel %vm3171_vm10, %v7843_v25, %v7767_v5  ;;  %v8649_v16 = vld [vmem:[#allocation12_spill] sm:$0xff]  ;;  %v8656_v5 = vld [vmem:[#allocation17_spill] sm:$0xff] }
 0x2e0   : > { %8648 = vst [vmem:[#allocation40_spill] sm:$0xff] %v7932_v21  ;;  %v3566_v31 = vsel %vm3175_vm12, %v7675_v13, %v3565_v41  ;;  %v2766_v42 = vmax.f32 %v8649_v16, 0.0  ;;  %v5976_v63 = vpack.i.bf16 %v3457_v58, %v3450_v54  ;;  %v3572_v55 = vsel %vm3173_vm11, %v7856_v45, %v3571_v53  ;;  %v8651_v15 = vld [vmem:[#allocation8_spill] sm:$0xff]  ;;  %v8652_v41 = vld [vmem:[#allocation9_spill] sm:$0xff]  ;;  %v8653_v53 = vld [vmem:[#allocation10_spill] sm:$0xff] }
 0x2e1   : > { %5972 = vrot.lane.b32.xlu1 %v5971_v59, %s6199_s28  ;;  %v3567_v27 = vsel %vm3177_vm13, %v7692_v24, %v3566_v31  ;;  %v2778_v9 = vmax.f32 %v8650_v62, 0.0  ;;  %v3573_v44 = vsel %vm3175_vm12, %v7850_v19, %v3572_v55  ;;  %v3642_v59 = vsel %vm3171_vm10, %v8652_v41, %v8651_v15  ;;  %v8654_v55 = vld [vmem:[#allocation11_spill] sm:$0xff]  ;;  %v8655_v62 = vld [vmem:[#allocation14_spill] sm:$0xff]  ;;  %s6202_s28 = smov 32  }
 0x2e2   : > { %v3568_v49 = vsel %vm3179_vm14, %v7724_v2, %v3567_v27  ;;  %v3613_v36 = vrot.slane %v2766_v42, %v6961_v18  ;;  %5977 = vrot.lane.b32.xlu0 %v5976_v63, %s6200_s29  ;;  %v3574_v58 = vsel %vm3177_vm13, %v7862_v56, %v3573_v44  ;;  %v3643_v16 = vsel %vm3173_vm11, %v8653_v53, %v3642_v59  ;;  %v8658_v59 = vld [vmem:[#allocation15_spill] sm:$0xff]  ;;  %s328_s29 = scalar_lea.vmem [#allocation2], %s5163_s16 }
 0x2e3   : > { %v3569_v54 = vsel %vm3181_vm15, %v7872_v51, %v3568_v49  ;;  %v3617_v31 = vrot.slane %v2778_v9, %v6961_v18  ;;  %v3575_v27 = vsel %vm3179_vm14, %v7909_v20, %v3574_v58  ;;  %v3644_v63 = vsel %vm3175_vm12, %v8654_v55, %v3643_v16  ;;  %v8657_v9 = vld [vmem:[#allocation13_spill] sm:$0xff]  ;;  %v8661_v55 = vld [vmem:[#allocation18_spill] sm:$0xff] }
 0x2e4   : > { %v3570_v42 = vsel %vm3183_vm0, %v7904_v4, %v3569_v54  ;;  %v3649_v49 = vsel %vm3171_vm10, %v8656_v5, %v8655_v62  ;;  %v3576_v44 = vsel %vm3181_vm15, %v7923_v30, %v3575_v27  ;;  %v3645_v34 = vsel %vm3177_vm13, %v8657_v9, %v3644_v63  ;;  %v8659_v54 = vld [vmem:[#allocation24_spill] sm:$0xff]  ;;  %v8662_v62 = vld [vmem:[#allocation33_spill] sm:$0xff] }
 0x2e5   : > { %v3650_v46 = vsel %vm3173_vm11, %v8658_v59, %v3649_v49  ;;  %v2790_v61 = vmax.f32 %v8659_v54, 0.0  ;;  %v3577_v58 = vsel %vm3183_vm0, %v7932_v21, %v3576_v44  ;;  %v3646_v16 = vsel %vm3179_vm14, %v8660_v57, %v3645_v34  ;;  %v8663_v30 = vld [vmem:[#allocation29_spill] sm:$0xff]  ;;  %v8665_v44 = vld [vmem:[#allocation26_spill] sm:$0xff] }
 0x2e6   : > { %v3651_v5 = vsel %vm3175_vm12, %v8661_v55, %v3650_v46  ;;  %v2802_v53 = vmax.f32 %v8662_v62, 0.0  ;;  %v5981_v27 = vpack.i.bf16 %v3577_v58, %v3570_v42  ;;  %v3647_v63 = vsel %vm3181_vm15, %v8663_v30, %v3646_v16  ;;  %v8664_v9 = vld [vmem:[#allocation21_spill] sm:$0xff]  ;;  %v8666_v46 = vld [vmem:[#allocation30_spill] sm:$0xff] }
 0x2e7   : > { %v3652_v49 = vsel %vm3177_vm13, %v8664_v9, %v3651_v5  ;;  %v3621_v54 = vrot.slane %v2790_v61, %v6961_v18  ;;  %v3648_v59 = vsel %vm3183_vm0, %v3613_v36, %v3647_v63  ;;  %v3656_v34 = vsel %vm3171_vm10, %v7183_v29, %v7180_v39  ;;  %v8668_v9 = vld [vmem:[#allocation36_spill] sm:$0xff] }
 0x2e8   : > { %v3653_v21 = vsel %vm3179_vm14, %v8665_v44, %v3652_v49  ;;  %v3625_v57 = vrot.slane %v2802_v53, %v6961_v18  ;;  %5982 = vrot.lane.b32.xlu1 %v5981_v27, %s6201_s17  ;;  %v3657_v5 = vsel %vm3173_vm11, %v7190_v22, %v3656_v34  ;;  %v3663_v61 = vsel %vm3171_vm10, %v7368_v1, %v7351_v43  ;;  %v8670_v34 = vld [vmem:[#allocation45_spill] sm:$0xff]  ;;  %s5100_s17 = sshll.u32 %s328_s29, 4  ;;  %s5101_s17 = int_to_ptr.vmem [resolvable:$true] %s5100_s17 }
 0x2e9   : > { %v3654_v30 = vsel %vm3181_vm15, %v8666_v46, %v3653_v21  ;;  %v2814_v36 = vmax.f32 %v7500_v14, 0.0  ;;  %v3658_v42 = vsel %vm3175_vm12, %v7197_v40, %v3657_v5  ;;  %v3664_v62 = vsel %vm3173_vm11, %v7360_v8, %v3663_v61  ;;  %v8667_v14 = vld [vmem:[#allocation43_spill] sm:$0xff] }
 0x2ea   : > { %v3655_v53 = vsel %vm3183_vm0, %v3617_v31, %v3654_v30  ;;  %v2826_v58 = vmax.f32 %v7658_v11, 0.0  ;;  %v3659_v16 = vsel %vm3177_vm13, %v7227_v6, %v3658_v42  ;;  %v3665_v27 = vsel %vm3175_vm12, %v7371_v37, %v3664_v62  ;;  %v8669_v6 = vld [vmem:[#allocation47_spill] sm:$0xff] }
 0x2eb   : > { %v5986_v21 = vpack.i.bf16 %v3655_v53, %v3648_v59  ;;  %v3629_v63 = vrot.slane %v2814_v36, %v6961_v18  ;;  %v3660_v31 = vsel %vm3179_vm14, %v8667_v14, %v3659_v16  ;;  %v3666_v49 = vsel %vm3177_vm13, %v8668_v9, %v3665_v27  ;;  %v8671_v36 = vld [vmem:[#allocation48_spill] sm:$0xff] }
 0x2ec   : > { %v3633_v44 = vrot.slane %v2826_v58, %v6961_v18  ;;  %v3670_v11 = vsel %vm3171_vm10, %v7451_v26, %v7437_v52  ;;  %v3661_v59 = vsel %vm3181_vm15, %v8669_v6, %v3660_v31  ;;  %v3667_v46 = vsel %vm3179_vm14, %v8670_v34, %v3666_v49  ;;  %v8672_v34 = vld [vmem:[#allocation7_spill] sm:$0xff] }
 0x2ed   : > { %5987 = vrot.lane.b32.xlu0 %v5986_v21, %s6202_s28  ;;  %v3671_v30 = vsel %vm3173_vm11, %v7454_v60, %v3670_v11  ;;  %v3677_v5 = vsel %vm3171_vm10, %v7634_v33, %v7626_v0  ;;  %v3662_v61 = vsel %vm3183_vm0, %v3621_v54, %v3661_v59  ;;  %v3668_v53 = vsel %vm3181_vm15, %v8671_v36, %v3667_v46  ;;  %v5928_v11 = vpop.permute.xlu0 %5927  ;;  %v8673_v46 = vld [vmem:[#allocation6_spill] sm:$0xff] }
 0x2ee   : > { %v3672_v42 = vsel %vm3175_vm12, %v7472_v32, %v3671_v30  ;;  %v3678_v62 = vsel %vm3173_vm11, %v7637_v3, %v3677_v5  ;;  %v3669_v58 = vsel %vm3183_vm0, %v3625_v57, %v3668_v53  ;;  %v2838_v27 = vmax.f32 %v7717_v23, 0.0 }
 0x2ef   : > { %v3673_v21 = vsel %vm3177_vm13, %v7508_v12, %v3672_v42  ;;  %v3679_v16 = vsel %vm3175_vm12, %v7644_v17, %v3678_v62  ;;  %v5991_v54 = vpack.i.bf16 %v3669_v58, %v3662_v61  ;;  %v2850_v9 = vmax.f32 %v7906_v47, 0.0  ;;  %v6079_v61 = vld [vmem:[%s8532_s6 + $0x78] sm:$0xff]   ;;  %v8675_v62 = vld [vmem:[#allocation16_spill] sm:$0xff] }
 0x2f0   : > { %v3674_v14 = vsel %vm3179_vm14, %v7743_v50, %v3673_v21  ;;  %v3680_v31 = vsel %vm3177_vm13, %v7664_v10, %v3679_v16  ;;  %v3637_v49 = vrot.slane %v2838_v27, %v6961_v18  ;;  %v3684_v23 = vsel %vm3171_vm10, %v7689_v48, %v7672_v35  ;;  %v8676_v16 = vld [vmem:[#allocation10_spill] sm:$0xff]  ;;  %5611 = vmatprep.subr.bf16.mxu0 %v6079_v61 }
 0x2f1   : > { %v3675_v57 = vsel %vm3181_vm15, %v7798_v38, %v3674_v14  ;;  %v3681_v12 = vsel %vm3179_vm14, %v7749_v7, %v3680_v31  ;;  %5992 = vrot.lane.b32.xlu1 %v5991_v54, %s6202_s28  ;;  %v3641_v47 = vrot.slane %v2850_v9, %v6961_v18  ;;  %v3685_v38 = vsel %vm3173_vm11, %v7675_v13, %v3684_v23  ;;  %v8677_v27 = vld [vmem:[#allocation14_spill] sm:$0xff]  ;;  %v5933_v14 = vpop.permute.xlu1 %5932  ;;  %v8678_v31 = vld [vmem:[#allocation37_spill] sm:$0xff] }
 0x2f2   : > { %v3676_v50 = vsel %vm3183_vm0, %v3629_v63, %v3675_v57  ;;  %v3682_v10 = vsel %vm3181_vm15, %v7804_v28, %v3681_v12  ;;  %v3686_v6 = vsel %vm3175_vm12, %v7692_v24, %v3685_v38  ;;  %v3691_v59 = vsel %vm3171_vm10, %v7856_v45, %v7843_v25  ;;  %v8679_v57 = vld [vmem:[#allocation11_spill] sm:$0xff]  ;;  %v8680_v23 = vld [vmem:[#allocation17_spill] sm:$0xff]  ;;  %5612 = vmatpush3.bf16.msra.mxu0 %v6079_v61 }
 0x2f3   : > { %v3683_v7 = vsel %vm3183_vm0, %v3633_v44, %v3682_v10  ;;  %v3176_v63 = vsel %vm3175_vm12, %v8673_v46, %v8672_v34  ;;  %v3687_v28 = vsel %vm3177_vm13, %v7724_v2, %v3686_v6  ;;  %v3692_v5 = vsel %vm3173_vm11, %v7850_v19, %v3691_v59  ;;  %v8674_v2 = vld [vmem:[#allocation19_spill] sm:$0xff] }
 0x2f4   : > { %v5996_v30 = vpack.i.bf16 %v3683_v7, %v3676_v50  ;;  %v3178_v44 = vsel %vm3177_vm13, %v8651_v15, %v3176_v63  ;;  %v3688_v36 = vsel %vm3179_vm14, %v7872_v51, %v3687_v28  ;;  %v3693_v53 = vsel %vm3175_vm12, %v7862_v56, %v3692_v5  ;;  %v8115_v50 = vpop.permute.xlu0 %5937  ;;  %v8682_v38 = vld [vmem:[#allocation15_spill] sm:$0xff] }
 0x2f5   : > { %v3180_v42 = vsel %vm3179_vm14, %v8652_v41, %v3178_v44  ;;  %v3187_v58 = vsel %vm3175_vm12, %v8675_v62, %v8674_v2  ;;  %v3689_v15 = vsel %vm3181_vm15, %v7904_v4, %v3688_v36  ;;  %v3694_v21 = vsel %vm3177_vm13, %v7909_v20, %v3693_v53  ;;  %v8681_v20 = vld [vmem:[#allocation40_spill] sm:$0xff]  ;;  %v8684_v2 = vld [vmem:[#allocation41_spill] sm:$0xff] }
 0x2f6   : > { %5997 = vrot.lane.b32.xlu0 %v5996_v30, %s6202_s28  ;;  %v3182_v51 = vsel %vm3181_vm15, %v8676_v16, %v3180_v42  ;;  %v3188_v54 = vsel %vm3177_vm13, %v8677_v27, %v3187_v58  ;;  %v3690_v41 = vsel %vm3183_vm0, %v3637_v49, %v3689_v15  ;;  %v3695_v9 = vsel %vm3179_vm14, %v8678_v31, %v3694_v21  ;;  %v8683_v42 = vld [vmem:[#allocation42_spill] sm:$0xff]  ;;  %v6073_v16 = vld [vmem:[%s8530_s4 + $0xa8] sm:$0xff]  }
 0x2f7   : > { %v3184_v12 = vsel %vm3183_vm0, %v8679_v57, %v3182_v51  ;;  %v3189_v4 = vsel %vm3179_vm14, %v8680_v23, %v3188_v54  ;;  %v3696_v10 = vsel %vm3181_vm15, %v8681_v20, %v3695_v9  ;;  %v5930_v49 = vunpack.i.h.bf16 %v5928_v11  ;;  %v8685_v54 = vld [vmem:[#allocation38_spill] sm:$0xff]  ;;  %v8689_v9 = vld [vmem:[#allocation35_spill] sm:$0xff] }
 0x2f8   : > { %v3190_v7 = vsel %vm3181_vm15, %v8682_v38, %v3189_v4  ;;  %v3697_v6 = vsel %vm3183_vm0, %v3641_v47, %v3696_v10  ;;  %v5929_v34 = vunpack.i.l.bf16 %v5928_v11  ;;  %v5935_v46 = vunpack.i.h.bf16 %v5933_v14  ;;  %v8688_v31 = vld [vmem:[#allocation34_spill] sm:$0xff]  ;;  %v8690_v20 = vld [vmem:[#allocation23_spill] sm:$0xff] }
 0x2f9   : > { %v3191_v59 = vsel %vm3183_vm0, %v8661_v55, %v3190_v7  ;;  %v6001_v63 = vpack.i.bf16 %v3697_v6, %v3690_v41  ;;  %v5934_v28 = vunpack.i.l.bf16 %v5933_v14  ;;  %v5940_v5 = vunpack.i.h.bf16 %v8115_v50  ;;  %v8687_v41 = vld [vmem:[#allocation32_spill] sm:$0xff]  ;;  %v8691_v10 = vld [vmem:[#allocation22_spill] sm:$0xff] }
 0x2fa   : > { %v3724_v30 = vsel %vm3722_vm1, %v3191_v59, %v5930_v49  ;;  %v3723_v44 = vsel %vm3722_vm1, %v3184_v12, %v5929_v34  ;;  %v3732_v36 = vsel %vm1451_vm9, %v5930_v49, %v5935_v46  ;;  %v5939_v53 = vunpack.i.l.bf16 %v8115_v50  ;;  %v8692_v7 = vld [vmem:[#allocation28_spill] sm:$0xff]  ;;  %v8693_v49 = vld [vmem:[#allocation27_spill] sm:$0xff]  ;;  %v6075_v59 = vld [vmem:[%s8530_s4 + $0x98] sm:$0xff]  }
 0x2fb   : > { %6002 = vrot.lane.b32.xlu1 %v6001_v63, %s6202_s28  ;;  %v3757_v47 = vpack.c.bf16 %v3724_v30, %v3723_v44  ;;  %v3731_v55 = vsel %vm1451_vm9, %v5929_v34, %v5934_v28  ;;  %v3741_v11 = vsel %vm3739_vm2, %v3732_v36, %v5940_v5  ;;  %v3208_v62 = vsel %vm3175_vm12, %v8684_v2, %v8683_v42  ;;  %v6078_v36 = vld [vmem:[%s8530_s4 + $0x80] sm:$0xff]   ;;  %s5464_s28 = sshll.u32 %s6276_s13, 7  ;;  %s6204_s13 = smov [#allocation2]  }
 0x2fc   : > { %v3740_v61 = vsel %vm3739_vm2, %v3731_v55, %v5939_v53  ;;  %v3209_v15 = vsel %vm3177_vm13, %v7437_v52, %v3208_v62  ;;  %v3970_v14 = vsel %vm788_vm3, %v8685_v54, 0  ;;  %v8686_v52 = vld [vmem:[#allocation31_spill] sm:$0xff]  ;;  %v3229_v57 = vsel %vm3175_vm12, %v8689_v9, %v8688_v31  ;;  %s8491_s25 = scalar_lea.hbm %s8535_s9, %s5464_s28  ;;  %s6135_s16 = sshll.u32 %s6204_s13, 4  ;;  %s6136_s16 = int_to_ptr.vmem [resolvable:$false] %s6135_s16 }
 0x2fd   : > { %v3758_v58 = vpack.c.bf16 %v3741_v11, %v3740_v61  ;;  %v3210_v21 = vsel %vm3179_vm14, %v7451_v26, %v3209_v15  ;;  %v3222_v26 = vsel %vm3175_vm12, %v8687_v41, %v8686_v52  ;;  %v3230_v12 = vsel %vm3177_vm13, %v7843_v25, %v3229_v57  ;;  %s6137_s22 = scalar_lea.vmem %s6136_s16, 256  ;;  %p6138_p0 = scmp.lt.s32.totalorder %s5101_s17, %s6136_s16 }
 0x2fe   : > { %v3211_v51 = vsel %vm3181_vm15, %v7454_v60, %v3210_v21  ;;  %v6074_v60 = vld [vmem:[%s8530_s4 + $0xa0] sm:$0xff]   ;;  %v3231_v4 = vsel %vm3179_vm14, %v7856_v45, %v3230_v12  ;;  %v3194_v38 = vsel %vm3175_vm12, %v8691_v10, %v8690_v20  ;;  %v3201_v6 = vsel %vm3175_vm12, %v8693_v49, %v8692_v7  ;;  %v8694_v21 = vld [vmem:[#allocation46_spill] sm:$0xff] }
 0x2ff   : > { %4004 = vmatprep.mubr.bf16.mxu1 %v3758_v58  ;;  %v8151_v27 = vsel %vm3183_vm0, %v7472_v32, %v3211_v51  ;;  %v3223_v32 = vsel %vm3177_vm13, %v7672_v35, %v3222_v26  ;;  %v3232_v25 = vsel %vm3181_vm15, %v7850_v19, %v3231_v4  ;;  %v3202_v19 = vsel %vm3177_vm13, %v7351_v43, %v3201_v6 }
 0x300   : > { %4005 = vmatmul.mubr.bf16.vlgmr.msra.gmra.mxu1 %v3757_v47  ;;  %v3224_v23 = vsel %vm3179_vm14, %v7689_v48, %v3223_v32  ;;  %v8188_v45 = vsel %vm3183_vm0, %v7862_v56, %v3232_v25  ;;  %v3203_v34 = vsel %vm3179_vm14, %v7368_v1, %v3202_v19  ;;  %v6076_v56 = vld [vmem:[%s8530_s4 + $0x90] sm:$0xff]   ;;  %vm3748_vm3 = vcmask 261120  }
 0x301   : > { %5566 = vmatpush3.bf16.msra.mxu1 %v3970_v14  ;;  %v3225_v35 = vsel %vm3181_vm15, %v7675_v13, %v3224_v23  ;;  %v3195_v13 = vsel %vm3177_vm13, %v7180_v39, %v3194_v38  ;;  %v3204_v39 = vsel %vm3181_vm15, %v7360_v8, %v3203_v34 }
 0x302   : > { %5567 = vmatprep.subr.bf16.mxu1 %v6073_v16  ;;  %v8184_v48 = vsel %vm3183_vm0, %v7692_v24, %v3225_v35  ;;  %v3196_v24 = vsel %vm3179_vm14, %v7183_v29, %v3195_v13  ;;  %v6077_v29 = vld [vmem:[%s8530_s4 + $0x88] sm:$0xff]   ;;  %v3205_v28 = vsel %vm3183_vm0, %v7371_v37, %v3204_v39 }
 0x303   : > { %v3197_v46 = vsel %vm3181_vm15, %v7190_v22, %v3196_v24 }
 0x304   : > { %v3198_v30 = vsel %vm3183_vm0, %v7197_v40, %v3197_v46 }
 0x305   : > { %5568 = vmatpush3.bf16.msra.mxu1 %v6073_v16  ;;  %v8695_v16 = vld [vmem:[#allocation44_spill] sm:$0xff] }
 0x306   : > { %5569 = vmatprep.subr.bf16.mxu1 %v6074_v60  ;;  %v3215_v51 = vsel %vm3175_vm12, %v8695_v16, %v8694_v21  ;;  %v6082_v21 = vld [vmem:[%s8532_s6 + $0x60] sm:$0xff]  }
 0x307   : > { %v3216_v54 = vsel %vm3177_vm13, %v7626_v0, %v3215_v51 }
 0x308   : > { %v3217_v14 = vsel %vm3179_vm14, %v7634_v33, %v3216_v54 }
 0x309   : > { %5570 = vmatpush3.bf16.msra.mxu1 %v6074_v60  ;;  %v3218_v52 = vsel %vm3181_vm15, %v7637_v3, %v3217_v14  ;;  %v6080_v3 = vld [vmem:[%s8532_s6 + $0x70] sm:$0xff]  }
 0x30a   : > { %5571 = vmatprep.subr.bf16.mxu1 %v6075_v59  ;;  %v3219_v9 = vsel %vm3183_vm0, %v7644_v17, %v3218_v52  ;;  %v6081_v17 = vld [vmem:[%s8532_s6 + $0x68] sm:$0xff]   ;;  %5613 = vmatprep.subr.bf16.mxu0 %v6080_v3 }
 0x30b   : > { %5614 = vmatpush3.bf16.msra.mxu0 %v6080_v3 }
 0x30c   : > { %v5943_v43 = vpop.permute.xlu1 %5942  ;;  %5615 = vmatprep.subr.bf16.mxu0 %v6081_v17 }
 0x30d   : > { %5572 = vmatpush3.bf16.msra.mxu1 %v6075_v59  ;;  %v5945_v63 = vunpack.i.h.bf16 %v5943_v43  ;;  %v5944_v1 = vunpack.i.l.bf16 %v5943_v43 }
 0x30e   : > { %5573 = vmatprep.subr.bf16.mxu1 %v6076_v56 }
 0x30f   : > { %v3725_v22 = vsel %vm3722_vm1, %v3198_v30, %v5944_v1  ;;  %v3726_v44 = vsel %vm3722_vm1, %v3205_v28, %v5945_v63  ;;  %5616 = vmatpush3.bf16.msra.mxu0 %v6081_v17 }
 0x310   : > { %v3760_v8 = vpack.c.bf16 %v3726_v44, %v3725_v22  ;;  %5617 = vmatprep.subr.bf16.mxu0 %v6082_v21 }
 0x311   : > { %5574 = vmatpush3.bf16.msra.mxu1 %v6076_v56 }
 0x312   : > { %5575 = vmatprep.subr.bf16.mxu1 %v6077_v29 }
 0x313   : > { %v5948_v47 = vpop.permute.xlu0 %5947  ;;  %5618 = vmatpush3.bf16.msra.mxu0 %v6082_v21 }
 0x314   : > { %v5950_v55 = vunpack.i.h.bf16 %v5948_v47  ;;  %v5949_v40 = vunpack.i.l.bf16 %v5948_v47 }
 0x315   : > { %5576 = vmatpush3.bf16.msra.mxu1 %v6077_v29 }
 0x316   : > { %5577 = vmatprep.subr.bf16.mxu1 %v6078_v36  ;;  %v3734_v42 = vsel %vm1451_vm9, %v5945_v63, %v5950_v55  ;;  %v3733_v2 = vsel %vm1451_vm9, %v5944_v1, %v5949_v40 }
 0x319   : > { %5578 = vmatpush3.bf16.msra.mxu1 %v6078_v36 }
 0x31b   : > { %v8220_v11 = vpop.permute.xlu1 %5952 }
 0x31c   : > { %v5955_v37 = vunpack.i.h.bf16 %v8220_v11  ;;  %v5954_v61 = vunpack.i.l.bf16 %v8220_v11  ;;  %v6083_v11 = vld [vmem:[%s8532_s6 + $0x58] sm:$0xff]  }
 0x31d   : > { %5619 = vmatprep.subr.bf16.mxu0 %v6083_v11 }
 0x31e   : > { %v3742_v62 = vsel %vm3739_vm2, %v3733_v2, %v5954_v61  ;;  %v3743_v58 = vsel %vm3739_vm2, %v3734_v42, %v5955_v37  ;;  %5620 = vmatpush3.bf16.msra.mxu0 %v6083_v11 }
 0x31f   : > { %v3761_v15 = vpack.c.bf16 %v3743_v58, %v3742_v62 }
 0x321   : > { %4012 = vmatprep.mubr.bf16.mxu1 %v3761_v15 }
 0x322   : > { %4013 = vmatmul.mubr.bf16.gmra.mxu1 %v3760_v8 }
 0x336   : > { %v5958_v41 = vpop.permute.xlu0 %5957 }
 0x337   : > { %v5960_v26 = vunpack.i.h.bf16 %v5958_v41  ;;  %v5959_v31 = vunpack.i.l.bf16 %v5958_v41  ;;  %v6084_v41 = vld [vmem:[%s8532_s6 + $0x50] sm:$0xff]  }
 0x338   : > { %5621 = vmatprep.subr.bf16.mxu0 %v6084_v41 }
 0x339   : > { %v3727_v57 = vsel %vm3722_vm1, %v8151_v27, %v5959_v31  ;;  %v3728_v60 = vsel %vm3722_vm1, %v3219_v9, %v5960_v26  ;;  %v6087_v9 = vld [vmem:[%s8532_s6 + $0x48] sm:$0xff]   ;;  %5622 = vmatpush3.bf16.msra.mxu0 %v6084_v41 }
 0x33a   : > { %v3763_v32 = vpack.c.bf16 %v3728_v60, %v3727_v57  ;;  %5623 = vmatprep.subr.bf16.mxu0 %v6087_v9  ;;  %v6088_v57 = vld [vmem:[%s8532_s6 + $0x28] sm:$0xff]   ;;  %v6089_v60 = vld [vmem:[%s8532_s6 + $0x20] sm:$0xff]  }
 0x33d   : > { %5624 = vmatpush3.bf16.msra.mxu0 %v6087_v9  ;;  %v6097_v9 = vld [vmem:[%s8533_s7 + $0x70] sm:$0xff]  }
 0x33e   : > { %v5963_v12 = vpop.permute.xlu1 %5962 }
 0x33f   : > { %v5965_v0 = vunpack.i.h.bf16 %v5963_v12  ;;  %v5964_v23 = vunpack.i.l.bf16 %v5963_v12  ;;  %v6091_v12 = vld [vmem:[%s8532_s6 + $0x40] sm:$0xff]  }
 0x340   : > { %5625 = vmatprep.subr.bf16.mxu0 %v6091_v12 }
 0x341   : > { %v3736_v10 = vsel %vm1451_vm9, %v5960_v26, %v5965_v0  ;;  %v3735_v27 = vsel %vm1451_vm9, %v5959_v31, %v5964_v23  ;;  %v6085_v26 = vld [vmem:[%s8532_s6 + $0x38] sm:$0xff]   ;;  %v6086_v31 = vld [vmem:[%s8532_s6 + $0x30] sm:$0xff]   ;;  %5626 = vmatpush3.bf16.msra.mxu0 %v6091_v12  ;;  %v6093_v23 = vld [vmem:[%s8532_s6 + $0x8] sm:$0xff]  }
 0x342   : > { %5587 = vmatprep.subr.bf16.mxu1 %v6085_v26  ;;  %v6092_v0 = vld [vmem:[%s8532_s6 + $0x10] sm:$0xff]   ;;  %v6101_v12 = vld [vmem:[%s8533_s7 + $0x60] sm:$0xff]  }
 0x346   : > { %v5968_v4 = vpop.permute.xlu0 %5967 }
 0x347   : > { %v5970_v33 = vunpack.i.h.bf16 %v5968_v4  ;;  %v5969_v20 = vunpack.i.l.bf16 %v5968_v4  ;;  %v6094_v4 = vld [vmem:[%s8532_s6] sm:$0xff]  }
 0x349   : > { %v3744_v38 = vsel %vm3739_vm2, %v3735_v27, %v5969_v20  ;;  %v3745_v7 = vsel %vm3739_vm2, %v3736_v10, %v5970_v33 }
 0x34a   : > { %v3764_v49 = vpack.c.bf16 %v3745_v7, %v3744_v38 }
 0x34c   : > { %4020 = vmatprep.mubr.bf16.mxu1 %v3764_v49 }
 0x34d   : > { %4021 = vmatmul.mubr.bf16.gmra.mxu1 %v3763_v32  ;;  %v6090_v32 = vld [vmem:[%s8532_s6 + $0x18] sm:$0xff]  }
 0x353   : > { %v5973_v6 = vpop.permute.xlu1 %5972 }
 0x354   : > { %v5975_v35 = vunpack.i.h.bf16 %v5973_v6  ;;  %v5974_v25 = vunpack.i.l.bf16 %v5973_v6  ;;  %v5978_v59 = vpop.permute.xlu0 %5977 }
 0x355   : > { %v5980_v34 = vunpack.i.h.bf16 %v5978_v59  ;;  %v5979_v56 = vunpack.i.l.bf16 %v5978_v59 }
 0x356   : > { %v3729_v13 = vsel %vm3722_vm1, %v8184_v48, %v5974_v25  ;;  %v3730_v19 = vsel %vm3722_vm1, %v8188_v45, %v5975_v35 }
 0x357   : > { %v3766_v24 = vpack.c.bf16 %v3730_v19, %v3729_v13  ;;  %v3738_v29 = vsel %vm1451_vm9, %v5975_v35, %v5980_v34  ;;  %v3737_v63 = vsel %vm1451_vm9, %v5974_v25, %v5979_v56 }
 0x35a   : > { %v5983_v46 = vpop.permute.xlu1 %5982 }
 0x35b   : > { %v5985_v39 = vunpack.i.h.bf16 %v5983_v46  ;;  %v5984_v43 = vunpack.i.l.bf16 %v5983_v46 }
 0x35d   : > { %v3746_v1 = vsel %vm3739_vm2, %v3737_v63, %v5984_v43  ;;  %v3747_v30 = vsel %vm3739_vm2, %v3738_v29, %v5985_v39  ;;  %v5354_v29 = vld [vmem:[%s8531_s5] ss:$0 sm:$0xff] }
 0x35e   : > { %v3767_v48 = vpack.c.bf16 %v3747_v30, %v3746_v1 }
 0x35f   : > { %v5988_v28 = vpop.permute.xlu0 %5987 }
 0x360   : > { %v5990_v22 = vunpack.i.h.bf16 %v5988_v28  ;;  %v5989_v44 = vunpack.i.l.bf16 %v5988_v28  ;;  %4028 = vmatprep.mubr.bf16.mxu1 %v3767_v48 }
 0x361   : > { %4029 = vmatmul.mubr.bf16.gmra.mxu1 %v3766_v24 }
 0x362   : > { %v3750_v45 = vsel %vm3748_vm3, %v5940_v5, %v5990_v22  ;;  %v3749_v8 = vsel %vm3748_vm3, %v5939_v53, %v5989_v44 }
 0x363   : > { %v3759_v36 = vpack.c.bf16 %v3750_v45, %v3749_v8  ;;  %v5993_v47 = vpop.permute.xlu1 %5992 }
 0x364   : > { %v5995_v55 = vunpack.i.h.bf16 %v5993_v47  ;;  %v5994_v40 = vunpack.i.l.bf16 %v5993_v47 }
 0x365   : > { %5579 = vmatprep.mubr.msk.bf16.mxu1 %vm3956_vm4, %v3759_v36 }
 0x366   : > { %v3752_v42 = vsel %vm3748_vm3, %v5955_v37, %v5995_v55  ;;  %v3751_v5 = vsel %vm3748_vm3, %v5954_v61, %v5994_v40 }
 0x367   : > { %v3762_v2 = vpack.c.bf16 %v3752_v42, %v3751_v5 }
 0x368   : > { %v5998_v50 = vpop.permute.xlu0 %5997 }
 0x369   : > { %v6000_v62 = vunpack.i.h.bf16 %v5998_v50  ;;  %v5999_v53 = vunpack.i.l.bf16 %v5998_v50  ;;  %5580 = vmatmul.mubr.msk.bf16.vlgmr.msra.gmra.mxu1 %vm3956_vm4, %v3762_v2 }
 0x36a   : > { %5588 = vmatpush3.bf16.msra.mxu1 %v6085_v26  ;;  %v6095_v26 = vld [vmem:[%s8533_s7 + $0x78] sm:$0xff]  }
 0x36b   : > { %v3754_v58 = vsel %vm3748_vm3, %v5970_v33, %v6000_v62  ;;  %v3753_v15 = vsel %vm3748_vm3, %v5969_v20, %v5999_v53  ;;  %5589 = vmatprep.subr.bf16.mxu1 %v6086_v31 }
 0x36c   : > { %v3765_v37 = vpack.c.bf16 %v3754_v58, %v3753_v15 }
 0x36d   : > { %v6003_v61 = vpop.permute.xlu1 %6002 }
 0x36e   : > { %5583 = vmatprep.mubr.msk.bf16.mxu1 %vm3956_vm4, %v3765_v37  ;;  %v6005_v16 = vunpack.i.h.bf16 %v6003_v61  ;;  %v6004_v51 = vunpack.i.l.bf16 %v6003_v61  ;;  %5590 = vmatpush3.bf16.msra.mxu1 %v6086_v31  ;;  %v6096_v31 = vld [vmem:[%s8533_s7 + $0x38] sm:$0xff]  }
 0x36f   : > { %5591 = vmatprep.subr.bf16.mxu1 %v6088_v57 }
 0x370   : > { %v3756_v54 = vsel %vm3748_vm3, %v5985_v39, %v6005_v16  ;;  %v3755_v14 = vsel %vm3748_vm3, %v5984_v43, %v6004_v51 }
 0x371   : > { %v3768_v52 = vpack.c.bf16 %v3756_v54, %v3755_v14 }
 0x372   : > { %5592 = vmatpush3.bf16.msra.mxu1 %v6088_v57  ;;  %v6098_v57 = vld [vmem:[%s8533_s7 + $0x30] sm:$0xff]  }
 0x373   : > { %5584 = vmatmul.mubr.msk.bf16.gmra.mxu1 %vm3956_vm4, %v3768_v52  ;;  %5593 = vmatprep.subr.bf16.mxu1 %v6089_v60 }
 0x376   : > { %5594 = vmatpush3.bf16.msra.mxu1 %v6089_v60  ;;  %v6099_v60 = vld [vmem:[%s8533_s7 + $0x68] sm:$0xff]  }
 0x377   : > { %5595 = vmatprep.subr.bf16.mxu1 %v6090_v32 }
 0x37a   : > { %5596 = vmatpush3.bf16.msra.mxu1 %v6090_v32  ;;  %v6100_v32 = vld [vmem:[%s8533_s7 + $0x28] sm:$0xff]  }
 0x37b   : > { %5597 = vmatprep.subr.bf16.mxu1 %v6092_v0 }
 0x37e   : > { %5598 = vmatpush3.bf16.msra.mxu1 %v6092_v0  ;;  %v6102_v0 = vld [vmem:[%s8533_s7 + $0x20] sm:$0xff]  }
 0x37f   : > { %5599 = vmatprep.subr.bf16.mxu1 %v6093_v23 }
 0x382   : > { %5600 = vmatpush3.bf16.msra.mxu1 %v6093_v23  ;;  %v6103_v23 = vld [vmem:[%s8533_s7 + $0x58] sm:$0xff]  }
 0x383   : > { %5601 = vmatprep.subr.bf16.mxu1 %v6094_v4 }
 0x386   : > { %5602 = vmatpush3.bf16.msra.mxu1 %v6094_v4  ;;  %v6104_v4 = vld [vmem:[%s8533_s7 + $0x18] sm:$0xff]  }
 0x387   : > { %5543 = vmatprep.subr.bf16.mxu1 %v6095_v26 }
 0x3c0   : > { %v5484_v33 = vpop.f32.mrf.mxu1 }
 0x3c2   : > { %v5485_v20 = vpop.f32.mrf.mxu1 }
 0x3c3   : > { %v5486_v46 = vadd.f32 %v5485_v20, %v5484_v33  ;;  %v6105_v33 = vld [vmem:[%s8533_s7 + $0x50] sm:$0xff]  }
 0x3c4   : > { %v5487_v3 = vpop.f32.mrf.mxu1  ;;  %v6106_v20 = vld [vmem:[%s8533_s7 + $0x10] sm:$0xff]  }
 0x3c5   : > { %v4007_v28 = vadd.f32 %v5486_v46, %v5354_v29 }
 0x3c6   : > { %v5488_v17 = vpop.f32.mrf.mxu1 }
 0x3c7   : > { %v5489_v39 = vadd.f32 %v5488_v17, %v5487_v3  ;;  %v6107_v3 = vld [vmem:[%s8533_s7 + $0x48] sm:$0xff]  }
 0x3c8   : > { %v6108_v17 = vld [vmem:[%s8533_s7 + $0x8] sm:$0xff]  }
 0x3c9   : > { %v4010_v48 = vadd.f32 %v5489_v39, %v5354_v29 }
 0x3e2   : > { %v5490_v10 = vpop.f32.mrf.mxu1 }
 0x3e4   : > { %v5491_v27 = vpop.f32.mrf.mxu1 }
 0x3e5   : > { %v5492_v43 = vadd.f32 %v5491_v27, %v5490_v10 }
 0x3e6   : > { %v5493_v38 = vpop.f32.mrf.mxu1 }
 0x3e7   : > { %v4015_v22 = vadd.f32 %v5492_v43, %v5354_v29 }
 0x3e8   : > { %v5494_v7 = vpop.f32.mrf.mxu1 }
 0x3e9   : > { %v5495_v34 = vadd.f32 %v5494_v7, %v5493_v38 }
 0x3eb   : > { %v4018_v1 = vadd.f32 %v5495_v34, %v5354_v29 }
 0x40d   : > { %v5496_v49 = vpop.f32.mrf.mxu1 }
 0x40f   : > { %v5497_v6 = vpop.f32.mrf.mxu1 }
 0x410   : > { %v5498_v2 = vadd.f32 %v5497_v6, %v5496_v49 }
 0x411   : > { %v5499_v35 = vpop.f32.mrf.mxu1 }
 0x412   : > { %v4023_v21 = vadd.f32 %v5498_v2, %v5354_v29 }
 0x413   : > { %v5500_v25 = vpop.f32.mrf.mxu1 }
 0x414   : > { %v5501_v50 = vadd.f32 %v5500_v25, %v5499_v35  ;;  %v8696_v35 = vld [vmem:[#allocation5_spill] sm:$0xff] }
 0x416   : > { %v4026_v11 = vadd.f32 %v5501_v50, %v5354_v29 }
 0x421   : > { %v5502_v59 = vpop.f32.mrf.mxu1 }
 0x423   : > { %v5503_v13 = vpop.f32.mrf.mxu1 }
 0x424   : > { %v5504_v62 = vadd.f32 %v5503_v13, %v5502_v59 }
 0x425   : > { %v5505_v19 = vpop.f32.mrf.mxu1 }
 0x426   : > { %v4031_v37 = vadd.f32 %v5504_v62, %v5354_v29 }
 0x427   : > { %v5506_v24 = vpop.f32.mrf.mxu1 }
 0x428   : > { %v5507_v40 = vadd.f32 %v5506_v24, %v5505_v19 }
 0x429   : > { %v5581_v56 = vpop.f32.mrf.mxu1 }
 0x42a   : > { %v4080_v47 = vadd.f32 %v5581_v56, %v4015_v22  ;;  %v4034_v58 = vadd.f32 %v5507_v40, %v5354_v29 }
 0x42b   : > { %v4071_v63 = vpop.f32.mrf.mxu1 }
 0x42c   : > { %v4072_v8 = vadd.f32 %v4071_v63, %v4007_v28 }
 0x42d   : > { %v5582_v30 = vpop.f32.mrf.mxu1 }
 0x42e   : > { %v4083_v44 = vadd.f32 %v5582_v30, %v4018_v1 }
 0x42f   : > { %v4074_v45 = vpop.f32.mrf.mxu1 }
 0x430   : > { %v4075_v36 = vadd.f32 %v4074_v45, %v4010_v48  ;;  %v4103_v42 = vpack.c.bf16 %v4083_v44, %v4080_v47 }
 0x432   : > { %v4102_v55 = vpack.c.bf16 %v4075_v36, %v4072_v8 }
 0x433   : > { %v5585_v5 = vpop.f32.mrf.mxu1 }
 0x434   : > { %5603 = vmatprep.mubr.bf16.mxu1 %v4102_v55  ;;  %5627 = vmatprep.mubr.bf16.mxu0 %v4102_v55  ;;  %v4096_v14 = vadd.f32 %v5585_v5, %v4031_v37 }
 0x435   : > { %v4087_v53 = vpop.f32.mrf.mxu1  ;;  %5604 = vmatmul.mubr.bf16.vlgmr.msra.gmra.mxu1 %v4103_v42  ;;  %5628 = vmatmul.mubr.bf16.vlgmr.msra.gmra.mxu0 %v4103_v42 }
 0x436   : > { %v4088_v51 = vadd.f32 %v4087_v53, %v4023_v21  ;;  %5544 = vmatpush3.bf16.msra.mxu1 %v6096_v31 }
 0x437   : > { %v5586_v15 = vpop.f32.mrf.mxu1  ;;  %5545 = vmatprep.subr.bf16.mxu1 %v6097_v9 }
 0x438   : > { %v4099_v61 = vadd.f32 %v5586_v15, %v4034_v58 }
 0x439   : > { %v4090_v16 = vpop.f32.mrf.mxu1 }
 0x43a   : > { %v4091_v54 = vadd.f32 %v4090_v16, %v4026_v11  ;;  %v4105_v41 = vpack.c.bf16 %v4099_v61, %v4096_v14  ;;  %5546 = vmatpush3.bf16.msra.mxu1 %v6098_v57 }
 0x43b   : > { %5547 = vmatprep.subr.bf16.mxu1 %v6099_v60 }
 0x43c   : > { %v4104_v52 = vpack.c.bf16 %v4091_v54, %v4088_v51 }
 0x43e   : > { %5607 = vmatprep.mubr.bf16.mxu1 %v4104_v52  ;;  %5631 = vmatprep.mubr.bf16.mxu0 %v4104_v52 }
 0x43f   : > { %5608 = vmatmul.mubr.bf16.gmra.mxu1 %v4105_v41  ;;  %5632 = vmatmul.mubr.bf16.gmra.mxu0 %v4105_v41 }
 0x440   : > { %5548 = vmatpush3.bf16.msra.mxu1 %v6100_v32 }
 0x441   : > { %5549 = vmatprep.subr.bf16.mxu1 %v6101_v12 }
 0x444   : > { %5550 = vmatpush3.bf16.msra.mxu1 %v6102_v0 }
 0x445   : > { %5551 = vmatprep.subr.bf16.mxu1 %v6103_v23 }
 0x448   : > { %5552 = vmatpush3.bf16.msra.mxu1 %v6104_v4 }
 0x449   : > { %5553 = vmatprep.subr.bf16.mxu1 %v6105_v33 }
 0x44c   : > { %5554 = vmatpush3.bf16.msra.mxu1 %v6106_v20 }
 0x44d   : > { %5555 = vmatprep.subr.bf16.mxu1 %v6107_v3 }
 0x450   : > { %5556 = vmatpush3.bf16.msra.mxu1 %v6108_v17 }
 0x4f5   : > { %v5605_v10 = vpop.f32.mrf.mxu1  ;;  %v5629_v27 = vpop.f32.mrf.mxu0 }
 0x4f6   : > { %v4367_v38 = vmax.f32 %v5605_v10, %v5629_v27 }
 0x4f7   : > { %v4204_v7 = vpop.f32.mrf.mxu1  ;;  %v4334_v49 = vpop.f32.mrf.mxu0 }
 0x4f8   : > { %v4415_v6 = vcombine.high %v4367_v38, %v4367_v38  ;;  %v4422_v25 = vrot.slane %v4367_v38, %v8696_v35  ;;  %v4365_v59 = vmax.f32 %v4204_v7, %v4334_v49 }
 0x4f9   : > { %v5606_v13 = vpop.f32.mrf.mxu1  ;;  %v5630_v19 = vpop.f32.mrf.mxu0 }
 0x4fa   : > { %v4429_v24 = vrot.slane %v4415_v6, %v8696_v35  ;;  %v4430_v34 = vcombine.high %v4422_v25, %v4422_v25  ;;  %v5422_v56 = vrot.slane %v4422_v25, 9  ;;  %v4381_v46 = vcombine.high %v4365_v59, %v4365_v59 }
 0x4fb   : > { %v4388_v39 = vrot.slane %v4365_v59, %v8696_v35  ;;  %v4368_v43 = vmax.f32 %v5606_v13, %v5630_v19  ;;  %v4207_v53 = vpop.f32.mrf.mxu1  ;;  %v4337_v58 = vpop.f32.mrf.mxu0 }
 0x4fc   : > { %v4431_v29 = vcombine.high %v4429_v24, %v4429_v24  ;;  %v5423_v63 = vrot.slane %v4430_v34, 9  ;;  %v5424_v1 = vrot.slane %v4429_v24, 9  ;;  %v4653_v30 = vmax.f32 %v4422_v25, %v5422_v56 }
 0x4fd   : > { %v4395_v28 = vrot.slane %v4381_v46, %v8696_v35  ;;  %v4396_v48 = vcombine.high %v4388_v39, %v4388_v39  ;;  %v5414_v22 = vrot.slane %v4388_v39, 9  ;;  %v4432_v62 = vcombine.high %v4368_v43, %v4368_v43 }
 0x4fe   : > { %v5425_v44 = vrot.slane %v4431_v29, 9  ;;  %v4654_v45 = vmax.f32 %v4430_v34, %v5423_v63  ;;  %v4655_v8 = vmax.f32 %v4429_v24, %v5424_v1  ;;  %v4685_v36 = vmax.f32 %v4653_v30, 0.0 }
 0x4ff   : > { %v4397_v47 = vcombine.high %v4395_v28, %v4395_v28  ;;  %v5415_v55 = vrot.slane %v4396_v48, 9  ;;  %v5416_v40 = vrot.slane %v4395_v28, 9  ;;  %v4645_v42 = vmax.f32 %v4388_v39, %v5414_v22  ;;  %v5609_v9 = vpop.f32.mrf.mxu1  ;;  %v5633_v57 = vpop.f32.mrf.mxu0 }
 0x500   : > { %v4656_v5 = vmax.f32 %v4431_v29, %v5425_v44  ;;  %v4686_v2 = vmax.f32 %v4654_v45, 0.0  ;;  %v4687_v50 = vmax.f32 %v4655_v8, 0.0  ;;  %v4439_v61 = vrot.slane %v4368_v43, %v8696_v35 }
 0x501   : > { %v5417_v15 = vrot.slane %v4397_v47, 9  ;;  %v4646_v21 = vmax.f32 %v4396_v48, %v5415_v55  ;;  %v4647_v11 = vmax.f32 %v4395_v28, %v5416_v40  ;;  %v4677_v37 = vmax.f32 %v4645_v42, 0.0  ;;  %v4220_v39 = vpop.f32.mrf.mxu1  ;;  %v4350_v43 = vpop.f32.mrf.mxu0 }
 0x502   : > { %v4688_v16 = vmax.f32 %v4656_v5, 0.0  ;;  %v8374_v51 = vrot.slane %v4685_v36, %v6961_v18  ;;  %v8377_v54 = vrot.slane %v4686_v2, %v6961_v18  ;;  %v8380_v52 = vrot.slane %v4687_v50, %v6961_v18 }
 0x503   : > { %v4648_v14 = vmax.f32 %v4397_v47, %v5417_v15  ;;  %v4446_v41 = vrot.slane %v4432_v62, %v8696_v35  ;;  %v4447_v26 = vcombine.high %v4439_v61, %v4439_v61  ;;  %v5426_v31 = vrot.slane %v4439_v61, 9  ;;  %v5610_v2 = vpop.f32.mrf.mxu1  ;;  %v5634_v50 = vpop.f32.mrf.mxu0 }
 0x504   : > { %v4678_v60 = vmax.f32 %v4646_v21, 0.0  ;;  %v4679_v32 = vmax.f32 %v4647_v11, 0.0  ;;  %v4720_v12 = vrot.slane %v4677_v37, %v6961_v18  ;;  %v4366_v0 = vmax.f32 %v4207_v53, %v4337_v58 }
 0x505   : > { %v4680_v23 = vmax.f32 %v4648_v14, 0.0  ;;  %v4448_v4 = vcombine.high %v4446_v41, %v4446_v41  ;;  %v5427_v33 = vrot.slane %v4447_v26, 9  ;;  %v5428_v20 = vrot.slane %v4446_v41, 9 }
 0x506   : > { %v8385_v3 = vrot.slane %v4688_v16, %v6961_v18  ;;  %v4398_v17 = vcombine.high %v4366_v0, %v4366_v0  ;;  %v4405_v10 = vrot.slane %v4366_v0, %v8696_v35  ;;  %v4371_v27 = vmax.f32 %v5609_v9, %v5633_v57  ;;  %v4353_v0 = vpop.f32.mrf.mxu0 }
 0x507   : > { %v5429_v38 = vrot.slane %v4448_v4, 9  ;;  %v4657_v7 = vmax.f32 %v4439_v61, %v5426_v31  ;;  %v4658_v49 = vmax.f32 %v4447_v26, %v5427_v33  ;;  %v4659_v6 = vmax.f32 %v4446_v41, %v5428_v20 }
 0x508   : > { %v4768_v25 = vrot.slane %v4678_v60, %v6961_v18  ;;  %v4412_v59 = vrot.slane %v4398_v17, %v8696_v35  ;;  %v4413_v13 = vcombine.high %v4405_v10, %v4405_v10  ;;  %v5418_v19 = vrot.slane %v4405_v10, 9 }
 0x509   : > { %v4818_v24 = vrot.slane %v4679_v32, %v6961_v18  ;;  %v4866_v34 = vrot.slane %v4680_v23, %v6961_v18  ;;  %v4660_v56 = vmax.f32 %v4448_v4, %v5429_v38  ;;  %v4483_v46 = vcombine.high %v4371_v27, %v4371_v27  ;;  %v4223_v32 = vpop.f32.mrf.mxu1 }
 0x50a   : > { %v4414_v29 = vcombine.high %v4412_v59, %v4412_v59  ;;  %v5419_v63 = vrot.slane %v4413_v13, 9  ;;  %v5420_v1 = vrot.slane %v4412_v59, 9  ;;  %v4649_v30 = vmax.f32 %v4405_v10, %v5418_v19 }
 0x50b   : > { %v4689_v28 = vmax.f32 %v4657_v7, 0.0  ;;  %v4690_v48 = vmax.f32 %v4658_v49, 0.0  ;;  %v4691_v22 = vmax.f32 %v4659_v6, 0.0  ;;  %v4490_v44 = vrot.slane %v4371_v27, %v8696_v35 }
 0x50c   : > { %v5421_v45 = vrot.slane %v4414_v29, 9  ;;  %v4650_v8 = vmax.f32 %v4413_v13, %v5419_v63  ;;  %v4651_v36 = vmax.f32 %v4412_v59, %v5420_v1  ;;  %v4681_v47 = vmax.f32 %v4649_v30, 0.0 }
 0x50d   : > { %v4692_v55 = vmax.f32 %v4660_v56, 0.0  ;;  %v4497_v40 = vrot.slane %v4483_v46, %v8696_v35  ;;  %v4498_v42 = vcombine.high %v4490_v44, %v4490_v44  ;;  %v5438_v5 = vrot.slane %v4490_v44, 9 }
 0x50e   : > { %v4652_v62 = vmax.f32 %v4414_v29, %v5421_v45  ;;  %v4682_v53 = vmax.f32 %v4650_v8, 0.0  ;;  %v4683_v58 = vmax.f32 %v4651_v36, 0.0  ;;  %v4724_v15 = vrot.slane %v4681_v47, %v6961_v18 }
 0x50f   : > { %v4499_v21 = vcombine.high %v4497_v40, %v4497_v40  ;;  %v5439_v11 = vrot.slane %v4498_v42, 9  ;;  %v5440_v37 = vrot.slane %v4497_v40, 9  ;;  %v4669_v61 = vmax.f32 %v4490_v44, %v5438_v5 }
 0x510   : > { %v4684_v16 = vmax.f32 %v4652_v62, 0.0  ;;  %v4749_v14 = vsel %vm3171_vm10, %v4724_v15, %v4720_v12  ;;  %v4772_v41 = vrot.slane %v4682_v53, %v6961_v18  ;;  %v4822_v26 = vrot.slane %v4683_v58, %v6961_v18 }
 0x511   : > { %v8400_v31 = vsel %vm3173_vm11, %v8374_v51, %v4749_v14  ;;  %v5441_v9 = vrot.slane %v4499_v21, 9  ;;  %v4670_v57 = vmax.f32 %v4498_v42, %v5439_v11  ;;  %v4671_v60 = vmax.f32 %v4497_v40, %v5440_v37 }
 0x512   : > { %v8403_v23 = vrot.slane %v4689_v28, %v6961_v18  ;;  %v8406_v4 = vrot.slane %v4690_v48, %v6961_v18  ;;  %v8409_v12 = vsel %vm3171_vm10, %v4822_v26, %v4818_v24  ;;  %v4870_v33 = vrot.slane %v4684_v16, %v6961_v18 }
 0x513   : > { %v8413_v20 = vrot.slane %v4691_v22, %v6961_v18  ;;  %v4672_v51 = vmax.f32 %v4499_v21, %v5441_v9  ;;  %v4701_v17 = vmax.f32 %v4669_v61, 0.0  ;;  %v4369_v10 = vmax.f32 %v4220_v39, %v4350_v43 }
 0x514   : > { %v8416_v27 = vrot.slane %v4692_v55, %v6961_v18  ;;  %v4797_v38 = vsel %vm3171_vm10, %v4772_v41, %v4768_v25  ;;  %v4372_v7 = vmax.f32 %v5610_v2, %v5634_v50  ;;  %v4370_v49 = vmax.f32 %v4223_v32, %v4353_v0 }
 0x515   : > { %v4895_v6 = vsel %vm3171_vm10, %v4870_v33, %v4866_v34  ;;  %v4702_v59 = vmax.f32 %v4670_v57, 0.0  ;;  %v4703_v13 = vmax.f32 %v4671_v60, 0.0  ;;  %v4449_v19 = vcombine.high %v4369_v10, %v4369_v10 }
 0x516   : > { %v4456_v24 = vrot.slane %v4369_v10, %v8696_v35  ;;  %v4500_v56 = vcombine.high %v4372_v7, %v4372_v7  ;;  %v4507_v46 = vrot.slane %v4372_v7, %v8696_v35  ;;  %v4466_v29 = vcombine.high %v4370_v49, %v4370_v49 }
 0x517   : > { %v4704_v63 = vmax.f32 %v4672_v51, 0.0  ;;  %v8423_v39 = vrot.slane %v4701_v17, %v6961_v18  ;;  %v4463_v43 = vrot.slane %v4449_v19, %v8696_v35  ;;  %v4473_v25 = vrot.slane %v4370_v49, %v8696_v35 }
 0x518   : > { %v4464_v1 = vcombine.high %v4456_v24, %v4456_v24  ;;  %v5430_v30 = vrot.slane %v4456_v24, 9  ;;  %v4514_v34 = vrot.slane %v4500_v56, %v8696_v35  ;;  %v4515_v28 = vcombine.high %v4507_v46, %v4507_v46 }
 0x519   : > { %v4465_v48 = vcombine.high %v4463_v43, %v4463_v43  ;;  %v5432_v22 = vrot.slane %v4463_v43, 9  ;;  %v5442_v44 = vrot.slane %v4507_v46, 9  ;;  %v4480_v45 = vrot.slane %v4466_v29, %v8696_v35 }
 0x51a   : > { %v5431_v8 = vrot.slane %v4464_v1, 9  ;;  %v4661_v36 = vmax.f32 %v4456_v24, %v5430_v30  ;;  %v4516_v47 = vcombine.high %v4514_v34, %v4514_v34  ;;  %v5443_v55 = vrot.slane %v4515_v28, 9 }
 0x51b   : > { %v5433_v40 = vrot.slane %v4465_v48, 9  ;;  %v4663_v42 = vmax.f32 %v4463_v43, %v5432_v22  ;;  %v5444_v5 = vrot.slane %v4514_v34, 9  ;;  %v4673_v2 = vmax.f32 %v4507_v46, %v5442_v44 }
 0x51c   : > { %v4662_v50 = vmax.f32 %v4464_v1, %v5431_v8  ;;  %v4693_v62 = vmax.f32 %v4661_v36, 0.0  ;;  %v5445_v53 = vrot.slane %v4516_v47, 9  ;;  %v4674_v58 = vmax.f32 %v4515_v28, %v5443_v55 }
 0x51d   : > { %v4664_v15 = vmax.f32 %v4465_v48, %v5433_v40  ;;  %v4695_v21 = vmax.f32 %v4663_v42, 0.0  ;;  %v4675_v11 = vmax.f32 %v4514_v34, %v5444_v5  ;;  %v4705_v37 = vmax.f32 %v4673_v2, 0.0 }
 0x51e   : > { %v4792_v61 = vrot.slane %v4702_v59, %v6961_v18  ;;  %v4842_v35 = vrot.slane %v4703_v13, %v6961_v18  ;;  %v4694_v16 = vmax.f32 %v4662_v50, 0.0  ;;  %v4798_v14 = vsel %vm3173_vm11, %v8377_v54, %v4797_v38 }
 0x51f   : > { %v4696_v41 = vmax.f32 %v4664_v15, 0.0  ;;  %v4736_v26 = vrot.slane %v4693_v62, %v6961_v18  ;;  %v4676_v9 = vmax.f32 %v4516_v47, %v5445_v53  ;;  %v4890_v57 = vrot.slane %v4704_v63, %v6961_v18 }
 0x520   : > { %v4706_v60 = vmax.f32 %v4674_v58, 0.0  ;;  %v4481_v32 = vcombine.high %v4473_v25, %v4473_v25  ;;  %v4482_v0 = vcombine.high %v4480_v45, %v4480_v45  ;;  %v5434_v33 = vrot.slane %v4473_v25, 9 }
 0x521   : > { %v4834_v51 = vrot.slane %v4695_v21, %v6961_v18  ;;  %v4707_v17 = vmax.f32 %v4675_v11, 0.0  ;;  %v4748_v10 = vrot.slane %v4705_v37, %v6961_v18  ;;  %v5436_v7 = vrot.slane %v4480_v45, 9 }
 0x522   : > { %v4784_v49 = vrot.slane %v4694_v16, %v6961_v18  ;;  %v5435_v59 = vrot.slane %v4481_v32, 9  ;;  %v5437_v54 = vrot.slane %v4482_v0, 9  ;;  %v4665_v38 = vmax.f32 %v4473_v25, %v5434_v33 }
 0x523   : > { %v4882_v13 = vrot.slane %v4696_v41, %v6961_v18  ;;  %v4667_v19 = vmax.f32 %v4480_v45, %v5436_v7  ;;  %v4708_v24 = vmax.f32 %v4676_v9, 0.0  ;;  %v4896_v56 = vsel %vm3173_vm11, %v8385_v3, %v4895_v6  ;;  %v6109_v3 = vld [vmem:[%s8533_s7 + $0x40] sm:$0xff]  }
 0x524   : > { %v4666_v46 = vmax.f32 %v4481_v32, %v5435_v59  ;;  %v4668_v29 = vmax.f32 %v4482_v0, %v5437_v54  ;;  %v4697_v63 = vmax.f32 %v4665_v38, 0.0  ;;  %v4799_v43 = vsel %vm3175_vm12, %v8406_v4, %v4798_v14  ;;  %v6110_v6 = vld [vmem:[%s8533_s7] sm:$0xff]   ;;  %5557 = vmatprep.subr.bf16.mxu1 %v6109_v3 }
 0x525   : > { %v4699_v1 = vmax.f32 %v4667_v19, 0.0  ;;  %v4796_v30 = vrot.slane %v4706_v60, %v6961_v18  ;;  %v4897_v34 = vsel %vm3175_vm12, %v8416_v27, %v4896_v56  ;;  %v4751_v25 = vsel %vm3175_vm12, %v8403_v23, %v8400_v31  ;;  %5558 = vmatpush3.bf16.msra.mxu1 %v6110_v6 }
 0x526   : > { %v4698_v28 = vmax.f32 %v4666_v46, 0.0  ;;  %v4700_v4 = vmax.f32 %v4668_v29, 0.0  ;;  %v4740_v48 = vrot.slane %v4697_v63, %v6961_v18  ;;  %v4752_v22 = vsel %vm3177_vm13, %v4736_v26, %v4751_v25  ;;  %v5446_v26 = vld [vmem:[%s8534_s8] ss:$0 sm:$0xff] }
 0x527   : > { %v4838_v27 = vrot.slane %v4699_v1, %v6961_v18  ;;  %v4800_v44 = vsel %vm3177_vm13, %v4784_v49, %v4799_v43  ;;  %v4894_v31 = vrot.slane %v4708_v24, %v6961_v18  ;;  %v4848_v23 = vsel %vm3173_vm11, %v8380_v52, %v8409_v12 }
 0x528   : > { %v4788_v45 = vrot.slane %v4698_v28, %v6961_v18  ;;  %v4886_v8 = vrot.slane %v4700_v4, %v6961_v18  ;;  %v4753_v36 = vsel %vm3179_vm14, %v4740_v48, %v4752_v22  ;;  %v4849_v47 = vsel %vm3175_vm12, %v8413_v20, %v4848_v23 }
 0x529   : > { %v4898_v55 = vsel %vm3177_vm13, %v4882_v13, %v4897_v34  ;;  %v4754_v40 = vsel %vm3181_vm15, %v8423_v39, %v4753_v36  ;;  %v4846_v42 = vrot.slane %v4707_v17, %v6961_v18  ;;  %v4850_v5 = vsel %vm3177_vm13, %v4834_v51, %v4849_v47 }
 0x52a   : > { %v4801_v52 = vsel %vm3179_vm14, %v4788_v45, %v4800_v44  ;;  %v4899_v12 = vsel %vm3179_vm14, %v4886_v8, %v4898_v55  ;;  %v4755_v2 = vsel %vm3183_vm0, %v4748_v10, %v4754_v40  ;;  %v4851_v50 = vsel %vm3179_vm14, %v4838_v27, %v4850_v5 }
 0x52b   : > { %v4802_v62 = vsel %vm3181_vm15, %v4792_v61, %v4801_v52  ;;  %v4900_v20 = vsel %vm3181_vm15, %v4890_v57, %v4899_v12  ;;  %v4852_v53 = vsel %vm3181_vm15, %v4842_v35, %v4851_v50 }
 0x52c   : > { %v4803_v39 = vsel %vm3183_vm0, %v4796_v30, %v4802_v62  ;;  %v4901_v18 = vsel %vm3183_vm0, %v4894_v31, %v4900_v20  ;;  %v4853_v58 = vsel %vm3183_vm0, %v4846_v42, %v4852_v53 }
 0x52d   : > { %v6006_v15 = vpack.i.bf16 %v4803_v39, %v4901_v18 }
 0x52f   : > { %6007 = vrot.lane.b32.xlu0 %v6006_v15, %s6203_s26  ;;  %s6131_s26 = scalar_lea.vmem %s5101_s17, 128 }
 0x530   : > { %p6132_p11 = scmp.ne.s32.totalorder %s5101_s17, %s6131_s26  ;;  %p6139_p1 = scmp.lt.s32.totalorder %s6137_s22, %s6131_s26 }
 0x532   : > { %p6133_p12 = pnand %p6132_p11, %p6293_p5  ;;  %p6140_p2 = por %p6139_p1, %p6138_p0 }
 0x534   : > { %p6134_p13 = pneg %p6133_p12 }
 0x536   : > { %p6141_p3 = pnand %p6140_p2, %p6134_p13 }
 0x5a1   : > { %v6008_v21 = vpop.permute.xlu0 %6007 }
 0x5a2   : > { %v6010_v11 = vunpack.i.h.bf16 %v6008_v21  ;;  %v6009_v37 = vunpack.i.l.bf16 %v6008_v21 }
 0x5a4   : > { %v4906_v61 = vsel %vm4905_vm5, %v4755_v2, %v6010_v11  ;;  %v4907_v16 = vsel %vm4905_vm5, %v4853_v58, %v6009_v37 }
 0x5a5   : > { %v4908_v14 = vpack.c.bf16 %v4906_v61, %v4906_v61  ;;  %v4909_v41 = vpack.c.bf16 %v4907_v16, %v4907_v16 }
 0x5a7   : > { %5077 = vmatprep.mubr.bf16.mxu1 %v4909_v41 }
 0x5a8   : > { %5078 = vmatmul.mubr.bf16.vlgmr.msra.gmra.mxu1 %v4908_v14 }
 0x668   : > { %v5559_v35 = vpop.f32.mrf.mxu1 }
 0x66a   : > { %v5560_v9 = vpop.f32.mrf.mxu1 }
 0x66b   : > { %v5561_v57 = vadd.f32 %v5560_v9, %v5559_v35 }
 0x66c   : > { %v5562_v60 = vpop.f32.mrf.mxu1 }
 0x66d   : > { %v5080_v32 = vadd.f32 %v5561_v57, %v5446_v26 }
 0x66e   : > { %v5563_v0 = vpop.f32.mrf.mxu1 }
 0x66f   : > { %5085 = vst [vmem:[%s328_s29] sm:$0xff] %v5080_v32 }
 0x670   : > { %6144 = shalt.err (!%p6141_p3)
}
 0x671   : > { %s6145_s23 = scalar_lea.hbm %s8491_s25, 128  ;;  %s6149_s29 = scalar_lea.hbm %s8535_s9, 256 }
 0x672   : > { %p6146_p4 = scmp.ne.s32.totalorder %s8491_s25, %s6145_s23  ;;  %p6150_p9 = scmp.lt.s32.totalorder %s8491_s25, %s8535_s9 }
 0x673   : > { %p6151_p10 = scmp.lt.s32.totalorder %s6149_s29, %s6145_s23 }
 0x674   : > { %p6147_p7 = pnand %p6146_p4, %p6293_p5 }
 0x675   : > { %p6152_p11 = por %p6151_p10, %p6150_p9 }
 0x676   : > { %p6148_p8 = pneg %p6147_p7 }
 0x678   : > { %p6153_p12 = pnand %p6152_p11, %p6148_p8 }
 0x67a   : > { %6156 = shalt.err (!%p6153_p12)
}
 0x67b   : > { %5636 = dma.vmem_to_hbm [thread:$0]  (%p6293_p5), %s5101_s17, 128, %s8491_s25, %s5087_s14  }
 0x67c PF: > { %p5642_p13 = scmp.ge.s32.totalorder %s6191_s12, 2  ;;  %s5112_s26 = sand.u32 1, %s6179_s30  }
 0x67d   : > { %s5113_s13 = scalar_lea.sflag [#allocation3], %s5112_s26 }
 0x67e   : > { %p5639_p0 = pnand %p5642_p13, %p6297_p6 }
 0x680   : > { %p5640_p1 = pneg %p5639_p0 }
 0x682   : > { %6174 = dma.done.wait (%p5640_p1), %s5113_s13, 128  }
 0x683   : > { %6176 = vsyncadd (%p5640_p1), %s5113_s13, 4294967168  ;;  %p19_p2 = scmp.ge.s32.totalorder %s6280_s15, 4   ;;  %s8697_s30 = smov %s6183_s10 }
 0x684   : > { %s8698_s10 = smov %s6187_s11  ;;  %s8699_s11 = smov %s6291_s18 }
 0x685   : > { %s8700_s12 = smov %s6280_s15  ;;  %21 = sbr.rel (!%p19_p2) target bundleno = 3 (0x3), region = 93 }
 0x68a   :  { %5118 = vsyncpa [#allocation3], 1 }
 0x68b   :  { %5120 = vsyncpa [#allocation3 + $0x1], 1 }

</bundles_post_ra>
